<compile_context>
chip_gen: v5e
topology: v5e:2x2
jax: 0.10.0
libtpu: 0.0.40
codegen_flags: <defaults>
</compile_context>

<pallas_src>
import jax
import jax.numpy as jnp
from jax import lax
from jax.experimental import pallas as pl
from jax.experimental.pallas import tpu as pltpu

EPS = 1e-5  # PyTorch InstanceNorm2d default


def _make_kernel(Cout, H, Wo, TR):
    """Kernel closure over static sizes.  Wo = 2*W (upsampled width), TR = rows/tile."""

    def kernel(xt_ref, w_ref, g_ref, b_ref, o_ref, sum_ref, ssq_ref):
        # xt_ref : (Cin, TR+2, Wo+2) bf16  column-upsampled, edge-padded row tile (halo=2)
        # w_ref  : (12, Cout, Cin)   bf16  phase-combined taps, k = (pi*2 + dy)*3 + kx
        # g_ref  : (Cout, 1) f32 ; b_ref : (Cout, 1) f32   (CIN gamma / beta, per sample)
        # o_ref  : (Cout, H, 2*Wo) f32    o[:, i, pi*Wo + J] == out[:, 2*i+pi, J]
        # sum_ref / ssq_ref : (Cout, 1) f32   cross-tile instance-norm statistics
        t = pl.program_id(1)

        @pl.when(t == 0)
        def _init():
            sum_ref[...] = jnp.zeros_like(sum_ref)
            ssq_ref[...] = jnp.zeros_like(ssq_ref)

        w_taps = [w_ref[k] for k in range(12)]          # each (Cout, Cin) bf16

        row0 = pl.multiple_of(t * TR, TR)               # first output row of this tile
        part_sum = jnp.zeros((Cout, 1), jnp.float32)
        part_ssq = jnp.zeros((Cout, 1), jnp.float32)

        for r in range(TR):                             # static unroll over tile rows
            # padded rows r, r+1, r+2 feed row-phases 0 (r, r+1) and 1 (r+1, r+2)
            rows = [xt_ref[:, r + q, :] for q in range(3)]       # (Cin, Wo+2) each
            for pi in range(2):                                   # row phase
                acc = jnp.zeros((Cout, Wo), jnp.float32)
                for dy in range(2):                               # row tap
                    xrow = rows[pi + dy]
                    for kx in range(3):                           # col tap (lane shift)
                        k = (pi * 2 + dy) * 3 + kx
                        seg = xrow[:, kx:kx + Wo]                 # (Cin, Wo) bf16
                        acc = acc + jnp.dot(
                            w_taps[k], seg, preferred_element_type=jnp.float32)
                part_sum = part_sum + jnp.sum(acc, axis=1, keepdims=True)
                part_ssq = part_ssq + jnp.sum(acc * acc, axis=1, keepdims=True)
                o_ref[:, row0 + r, pi * Wo:(pi + 1) * Wo] = acc

        sum_ref[...] += part_sum
        ssq_ref[...] += part_ssq

        @pl.when(t == pl.num_programs(1) - 1)
        def _finalize():
            # Instance norm (biased var, eps=1e-5) + affine + ReLU over the whole
            # VMEM-resident per-sample output block.
            inv_cnt = 1.0 / float(H * 2 * Wo)
            mean = sum_ref[...] * inv_cnt                      # (Cout, 1)
            var = ssq_ref[...] * inv_cnt - mean * mean         # one-pass stats
            inv_std = lax.rsqrt(var + EPS)
            g = g_ref[...]                                     # (Cout, 1)
            bt = b_ref[...]
            scale = (g * inv_std)[:, :, None]                  # (Cout, 1, 1)
            shift = (bt - g * mean * inv_std)[:, :, None]
            o_ref[...] = jnp.maximum(o_ref[...] * scale + shift, 0.0)

    return kernel


def upsampling_forward(x, w, b, gamma, beta, *, scale_factor=2, kernel_size=3,
                       row_tile=8):
    """x: (N, Cin, H, W) NCHW; w: (Cout, Cin, 3, 3); b: (Cout,);
    gamma/beta: (N, Cout) (style_num == batch).  Returns (N, Cout, 2H, 2W) f32."""
    assert scale_factor == 2 and kernel_size == 3, "kernel specialized to sf=2, k=3"
    N, Cin, H, W = x.shape
    Cout = w.shape[0]
    Wo = 2 * W
    Wpp = Wo + 2

    TR = max(1, min(row_tile, H))
    while H % TR:                       # pick a divisor of H (small images)
        TR -= 1
    T = H // TR

    # Conv bias is a per-channel constant -> exactly cancelled by the InstanceNorm
    # mean subtraction, so it never enters the kernel.
    del b

    # ---- host glue (original row resolution; no im2col, no full 2x2 upsample) ----
    xb = x.astype(jnp.bfloat16)
    xw = jnp.repeat(xb, 2, axis=3)                                    # (N,Cin,H,2W)
    # reflect-pad of the 2x-upsampled image == edge-pad in this hybrid layout
    xwp = jnp.pad(xw, ((0, 0), (0, 0), (1, 1), (1, 1)), mode="edge")  # (N,Cin,H+2,Wo+2)
    # row tiles with a 2-row halo (tiny duplication), flattened to a 4D array
    xtiles = jnp.stack(
        [xwp[:, :, t * TR:t * TR + TR + 2, :] for t in range(T)],
        axis=1).reshape(N * T, Cin, TR + 2, Wpp)

    # Phase-combined weights: row-phase 0 taps rows (i, i+1) with weights
    # (w[ky=0], w[ky=1]+w[ky=2]); row-phase 1 taps rows (i+1, i+2) with
    # (w[ky=0]+w[ky=1], w[ky=2]).  Column taps stay the standard 3 (kx) taps.
    wr0 = jnp.stack([w[:, :, 0, :], w[:, :, 1, :] + w[:, :, 2, :]], axis=2)
    wr1 = jnp.stack([w[:, :, 0, :] + w[:, :, 1, :], w[:, :, 2, :]], axis=2)
    w12 = (jnp.stack([wr0, wr1], axis=2)             # (Cout, Cin, 2=pi, 2=dy, 3=kx)
           .transpose(2, 3, 4, 0, 1)
           .reshape(12, Cout, Cin)
           .astype(jnp.bfloat16))

    gamma3 = gamma.astype(jnp.float32).reshape(N, Cout, 1)
    beta3 = beta.astype(jnp.float32).reshape(N, Cout, 1)

    kernel = _make_kernel(Cout, H, Wo, TR)

    # rough per-step working set -> explicit scoped-VMEM limit (kept <= 64 MiB for v7x)
    in_block = Cin * (TR + 2) * Wpp * 2
    out_block = Cout * H * 2 * Wo * 4
    est = 2 * in_block + out_block + 12 * Cout * Cin * 2 + 8 * Cout * 4
    vmem_limit = int(min(64 * 2 ** 20, max(32 * 2 ** 20, 2 * est)))

    cost = pl.CostEstimate(
        flops=2 * N * H * 2 * 6 * Cout * Cin * Wo,
        transcendentals=N * Cout,
        bytes_accessed=(xtiles.size * 2 + w12.size * 2 + gamma3.size * 4
                        + beta3.size * 4 + N * Cout * H * 2 * Wo * 4),
    )

    out_flat = pl.pallas_call(
        kernel,
        out_shape=jax.ShapeDtypeStruct((N, Cout, H, 2 * Wo), jnp.float32),
        grid_spec=pltpu.PrefetchScalarGridSpec(
            num_scalar_prefetch=0,
            grid=(N, T),
            in_specs=[
                pl.BlockSpec((None, Cin, TR + 2, Wpp),
                             lambda n, t: (n * T + t, 0, 0, 0)),
                pl.BlockSpec((12, Cout, Cin), lambda n, t: (0, 0, 0)),
                pl.BlockSpec((None, Cout, 1), lambda n, t: (n, 0, 0)),
                pl.BlockSpec((None, Cout, 1), lambda n, t: (n, 0, 0)),
            ],
            out_specs=pl.BlockSpec((None, Cout, H, 2 * Wo),
                                   lambda n, t: (n, 0, 0, 0)),
            scratch_shapes=[pltpu.VMEM((Cout, 1), jnp.float32),
                            pltpu.VMEM((Cout, 1), jnp.float32)],
        ),
        compiler_params=pltpu.CompilerParams(
            dimension_semantics=("parallel", "arbitrary"),
            vmem_limit_bytes=vmem_limit),
        cost_estimate=cost,
    )(xtiles, w12, gamma3, beta3)

    # free, layout-preserving reshapes: [.., i, pi*Wo + J] -> [.., 2i+pi, J]  (NCHW)
    return out_flat.reshape(N, Cout, H, 2, Wo).reshape(N, Cout, 2 * H, Wo)


def reference_forward(x, w, b, gamma, beta, *, scale_factor=2, kernel_size=3):
    """Pure-JAX f32 reference mirroring the PyTorch module semantics."""
    pad = kernel_size // 2
    up = jnp.repeat(jnp.repeat(x, scale_factor, axis=2), scale_factor, axis=3)
    xpad = jnp.pad(up, ((0, 0), (0, 0), (pad, pad), (pad, pad)), mode="reflect")
    conv = lax.conv_general_dilated(
        xpad, w, window_strides=(1, 1), padding="VALID",
        dimension_numbers=("NCHW", "OIHW", "NCHW")) + b.reshape(1, -1, 1, 1)
    mean = conv.mean(axis=(2, 3), keepdims=True)
    var = ((conv - mean) ** 2).mean(axis=(2, 3), keepdims=True)
    normed = (conv - mean) / jnp.sqrt(var + EPS)
    y = (gamma.reshape(-1, gamma.shape[1], 1, 1) * normed
         + beta.reshape(-1, beta.shape[1], 1, 1))
    return jnp.maximum(y, 0.0)


if __name__ == "__main__":
    key = jax.random.PRNGKey(0)
    k_x, k_w, k_b, k_g = jax.random.split(key, 4)

    N, Cin, Cout, H, W = 2, 4, 8, 16, 16   # style_num == N == 2
    x = jax.random.normal(k_x, (N, Cin, H, W), dtype=jnp.float32)
    w = 0.1 * jax.random.normal(k_w, (Cout, Cin, 3, 3), dtype=jnp.float32)
    b = 0.1 * jax.random.normal(k_b, (Cout,), dtype=jnp.float32)
    gamma = 1.0 + 0.02 * jax.random.normal(k_g, (N, Cout), dtype=jnp.float32)
    beta = jnp.zeros((N, Cout), dtype=jnp.float32)

    fwd = jax.jit(upsampling_forward)
    out = jax.block_until_ready(fwd(x, w, b, gamma, beta))

    ref = reference_forward(x, w, b, gamma, beta)
    assert out.shape == (N, Cout, 2 * H, 2 * W), out.shape
    max_err = float(jnp.max(jnp.abs(out - ref)))
    # bf16 MXU operands (inputs + weights) vs. a pure-f32 reference -> ~1e-2 scale error
    assert jnp.allclose(out, ref, rtol=3e-2, atol=3e-2), max_err
    print("KERNEL_OK")
</pallas_src>

<mosaic_0001>
module attributes {stable_mosaic.version = 11 : i64} {
  func.func @kernel(%arg0: i32, %arg1: i32, %arg2: memref<1x4x10x34xbf16, #tpu.memory_space<vmem>>, %arg3: memref<12x8x4xbf16, #tpu.memory_space<vmem>>, %arg4: memref<1x8x1xf32, #tpu.memory_space<vmem>>, %arg5: memref<1x8x1xf32, #tpu.memory_space<vmem>>, %arg6: memref<1x8x16x64xf32, #tpu.memory_space<vmem>>, %arg7: memref<8x1xf32, #tpu.memory_space<vmem>>, %arg8: memref<8x1xf32, #tpu.memory_space<vmem>>) attributes {dimension_semantics = [#tpu.dimension_semantics<parallel>, #tpu.dimension_semantics<arbitrary>], iteration_bounds = array<i64: 2, 2>, scalar_prefetch = 0 : i64, scratch_operands = 2 : i64, tpu.core_type = #tpu.core_type<tc>, window_params = [{transform_indices = @transform_0, window_bounds = array<i64: 1, 4, 10, 34>}, {pipeline_mode = #tpu.pipeline_mode<synchronous>, transform_indices = @transform_1, window_bounds = array<i64: 12, 8, 4>}, {transform_indices = @transform_2, window_bounds = array<i64: 1, 8, 1>}, {transform_indices = @transform_3, window_bounds = array<i64: 1, 8, 1>}, {transform_indices = @transform_4, window_bounds = array<i64: 1, 8, 16, 64>}]} {
    %c0_i32 = arith.constant 0 : i32
    %0 = arith.cmpi eq, %arg1, %c0_i32 : i32
    %1 = arith.extui %0 : i1 to i32
    %c0_i32_0 = arith.constant 0 : i32
    %2 = arith.cmpi ne, %1, %c0_i32_0 : i32
    scf.if %2 {
      %cst_332 = arith.constant 0.000000e+00 : f32
      %584 = vector.broadcast %cst_332 : f32 to vector<8x1xf32>
      %c0_333 = arith.constant 0 : index
      %c0_334 = arith.constant 0 : index
      %585 = vector.load %arg7[%c0_333, %c0_334] : memref<8x1xf32, #tpu.memory_space<vmem>>, vector<8x1xf32>
      tpu.vector_store %arg7[%c0_333, %c0_334], %584 {strides = array<i32>} : memref<8x1xf32, #tpu.memory_space<vmem>>, vector<8x1xf32>,
      %cst_335 = arith.constant 0.000000e+00 : f32
      %586 = vector.broadcast %cst_335 : f32 to vector<8x1xf32>
      %c0_336 = arith.constant 0 : index
      %c0_337 = arith.constant 0 : index
      %587 = vector.load %arg8[%c0_336, %c0_337] : memref<8x1xf32, #tpu.memory_space<vmem>>, vector<8x1xf32>
      tpu.vector_store %arg8[%c0_336, %c0_337], %586 {strides = array<i32>} : memref<8x1xf32, #tpu.memory_space<vmem>>, vector<8x1xf32>,
    } else {
    }
    %c0 = arith.constant 0 : index
    %c0_1 = arith.constant 0 : index
    %c0_2 = arith.constant 0 : index
    %3 = vector.load %arg3[%c0, %c0_1, %c0_2] : memref<12x8x4xbf16, #tpu.memory_space<vmem>>, vector<1x8x4xbf16>
    %4 = vector.shape_cast %3 : vector<1x8x4xbf16> to vector<8x4xbf16>
    %c1 = arith.constant 1 : index
    %c0_3 = arith.constant 0 : index
    %c0_4 = arith.constant 0 : index
    %5 = vector.load %arg3[%c1, %c0_3, %c0_4] : memref<12x8x4xbf16, #tpu.memory_space<vmem>>, vector<1x8x4xbf16>
    %6 = vector.shape_cast %5 : vector<1x8x4xbf16> to vector<8x4xbf16>
    %c2 = arith.constant 2 : index
    %c0_5 = arith.constant 0 : index
    %c0_6 = arith.constant 0 : index
    %7 = vector.load %arg3[%c2, %c0_5, %c0_6] : memref<12x8x4xbf16, #tpu.memory_space<vmem>>, vector<1x8x4xbf16>
    %8 = vector.shape_cast %7 : vector<1x8x4xbf16> to vector<8x4xbf16>
    %c3 = arith.constant 3 : index
    %c0_7 = arith.constant 0 : index
    %c0_8 = arith.constant 0 : index
    %9 = vector.load %arg3[%c3, %c0_7, %c0_8] : memref<12x8x4xbf16, #tpu.memory_space<vmem>>, vector<1x8x4xbf16>
    %10 = vector.shape_cast %9 : vector<1x8x4xbf16> to vector<8x4xbf16>
    %c4 = arith.constant 4 : index
    %c0_9 = arith.constant 0 : index
    %c0_10 = arith.constant 0 : index
    %11 = vector.load %arg3[%c4, %c0_9, %c0_10] : memref<12x8x4xbf16, #tpu.memory_space<vmem>>, vector<1x8x4xbf16>
    %12 = vector.shape_cast %11 : vector<1x8x4xbf16> to vector<8x4xbf16>
    %c5 = arith.constant 5 : index
    %c0_11 = arith.constant 0 : index
    %c0_12 = arith.constant 0 : index
    %13 = vector.load %arg3[%c5, %c0_11, %c0_12] : memref<12x8x4xbf16, #tpu.memory_space<vmem>>, vector<1x8x4xbf16>
    %14 = vector.shape_cast %13 : vector<1x8x4xbf16> to vector<8x4xbf16>
    %c6 = arith.constant 6 : index
    %c0_13 = arith.constant 0 : index
    %c0_14 = arith.constant 0 : index
    %15 = vector.load %arg3[%c6, %c0_13, %c0_14] : memref<12x8x4xbf16, #tpu.memory_space<vmem>>, vector<1x8x4xbf16>
    %16 = vector.shape_cast %15 : vector<1x8x4xbf16> to vector<8x4xbf16>
    %c7 = arith.constant 7 : index
    %c0_15 = arith.constant 0 : index
    %c0_16 = arith.constant 0 : index
    %17 = vector.load %arg3[%c7, %c0_15, %c0_16] : memref<12x8x4xbf16, #tpu.memory_space<vmem>>, vector<1x8x4xbf16>
    %18 = vector.shape_cast %17 : vector<1x8x4xbf16> to vector<8x4xbf16>
    %c8 = arith.constant 8 : index
    %c0_17 = arith.constant 0 : index
    %c0_18 = arith.constant 0 : index
    %19 = vector.load %arg3[%c8, %c0_17, %c0_18] : memref<12x8x4xbf16, #tpu.memory_space<vmem>>, vector<1x8x4xbf16>
    %20 = vector.shape_cast %19 : vector<1x8x4xbf16> to vector<8x4xbf16>
    %c9 = arith.constant 9 : index
    %c0_19 = arith.constant 0 : index
    %c0_20 = arith.constant 0 : index
    %21 = vector.load %arg3[%c9, %c0_19, %c0_20] : memref<12x8x4xbf16, #tpu.memory_space<vmem>>, vector<1x8x4xbf16>
    %22 = vector.shape_cast %21 : vector<1x8x4xbf16> to vector<8x4xbf16>
    %c10 = arith.constant 10 : index
    %c0_21 = arith.constant 0 : index
    %c0_22 = arith.constant 0 : index
    %23 = vector.load %arg3[%c10, %c0_21, %c0_22] : memref<12x8x4xbf16, #tpu.memory_space<vmem>>, vector<1x8x4xbf16>
    %24 = vector.shape_cast %23 : vector<1x8x4xbf16> to vector<8x4xbf16>
    %c11 = arith.constant 11 : index
    %c0_23 = arith.constant 0 : index
    %c0_24 = arith.constant 0 : index
    %25 = vector.load %arg3[%c11, %c0_23, %c0_24] : memref<12x8x4xbf16, #tpu.memory_space<vmem>>, vector<1x8x4xbf16>
    %26 = vector.shape_cast %25 : vector<1x8x4xbf16> to vector<8x4xbf16>
    %c8_i32 = arith.constant 8 : i32
    %27 = arith.muli %arg1, %c8_i32 : i32
    %28 = tpu.assume_multiple %27, 8 : i32
    %cst = arith.constant 0.000000e+00 : f32
    %29 = vector.broadcast %cst : f32 to vector<8x1xf32>
    %cst_25 = arith.constant 0.000000e+00 : f32
    %30 = vector.broadcast %cst_25 : f32 to vector<8x1xf32>
    %c0_26 = arith.constant 0 : index
    %c0_27 = arith.constant 0 : index
    %c0_28 = arith.constant 0 : index
    %c0_29 = arith.constant 0 : index
    %31 = vector.load %arg2[%c0_26, %c0_27, %c0_28, %c0_29] : memref<1x4x10x34xbf16, #tpu.memory_space<vmem>>, vector<1x4x1x34xbf16>
    %32 = vector.shape_cast %31 : vector<1x4x1x34xbf16> to vector<4x34xbf16>
    %c0_30 = arith.constant 0 : index
    %c0_31 = arith.constant 0 : index
    %c1_32 = arith.constant 1 : index
    %c0_33 = arith.constant 0 : index
    %33 = vector.load %arg2[%c0_30, %c0_31, %c1_32, %c0_33] : memref<1x4x10x34xbf16, #tpu.memory_space<vmem>>, vector<1x4x1x34xbf16>
    %34 = vector.shape_cast %33 : vector<1x4x1x34xbf16> to vector<4x34xbf16>
    %c0_34 = arith.constant 0 : index
    %c0_35 = arith.constant 0 : index
    %c2_36 = arith.constant 2 : index
    %c0_37 = arith.constant 0 : index
    %35 = vector.load %arg2[%c0_34, %c0_35, %c2_36, %c0_37] : memref<1x4x10x34xbf16, #tpu.memory_space<vmem>>, vector<1x4x1x34xbf16>
    %36 = vector.shape_cast %35 : vector<1x4x1x34xbf16> to vector<4x34xbf16>
    %cst_38 = arith.constant 0.000000e+00 : f32
    %37 = vector.broadcast %cst_38 : f32 to vector<8x32xf32>
    %38 = vector.extract_strided_slice %32 {offsets = [0, 0], sizes = [4, 32], strides = [1, 1]} : vector<4x34xbf16> to vector<4x32xbf16>
    %cst_39 = arith.constant dense<0.000000e+00> : vector<8x32xf32>
    %39 = tpu.matmul %4, %38, %cst_39 {dimension_numbers = #tpu.dot_dimension_numbers<[1], [0], [0], [1], [0, 0, 1, 1], [], []>} : vector<8x4xbf16>, vector<4x32xbf16>, vector<8x32xf32> -> vector<8x32xf32>
    %40 = arith.addf %37, %39 : vector<8x32xf32>
    %41 = vector.extract_strided_slice %32 {offsets = [0, 1], sizes = [4, 32], strides = [1, 1]} : vector<4x34xbf16> to vector<4x32xbf16>
    %cst_40 = arith.constant dense<0.000000e+00> : vector<8x32xf32>
    %42 = tpu.matmul %6, %41, %cst_40 {dimension_numbers = #tpu.dot_dimension_numbers<[1], [0], [0], [1], [0, 0, 1, 1], [], []>} : vector<8x4xbf16>, vector<4x32xbf16>, vector<8x32xf32> -> vector<8x32xf32>
    %43 = arith.addf %40, %42 : vector<8x32xf32>
    %44 = vector.extract_strided_slice %32 {offsets = [0, 2], sizes = [4, 32], strides = [1, 1]} : vector<4x34xbf16> to vector<4x32xbf16>
    %cst_41 = arith.constant dense<0.000000e+00> : vector<8x32xf32>
    %45 = tpu.matmul %8, %44, %cst_41 {dimension_numbers = #tpu.dot_dimension_numbers<[1], [0], [0], [1], [0, 0, 1, 1], [], []>} : vector<8x4xbf16>, vector<4x32xbf16>, vector<8x32xf32> -> vector<8x32xf32>
    %46 = arith.addf %43, %45 : vector<8x32xf32>
    %47 = vector.extract_strided_slice %34 {offsets = [0, 0], sizes = [4, 32], strides = [1, 1]} : vector<4x34xbf16> to vector<4x32xbf16>
    %cst_42 = arith.constant dense<0.000000e+00> : vector<8x32xf32>
    %48 = tpu.matmul %10, %47, %cst_42 {dimension_numbers = #tpu.dot_dimension_numbers<[1], [0], [0], [1], [0, 0, 1, 1], [], []>} : vector<8x4xbf16>, vector<4x32xbf16>, vector<8x32xf32> -> vector<8x32xf32>
    %49 = arith.addf %46, %48 : vector<8x32xf32>
    %50 = vector.extract_strided_slice %34 {offsets = [0, 1], sizes = [4, 32], strides = [1, 1]} : vector<4x34xbf16> to vector<4x32xbf16>
    %cst_43 = arith.constant dense<0.000000e+00> : vector<8x32xf32>
    %51 = tpu.matmul %12, %50, %cst_43 {dimension_numbers = #tpu.dot_dimension_numbers<[1], [0], [0], [1], [0, 0, 1, 1], [], []>} : vector<8x4xbf16>, vector<4x32xbf16>, vector<8x32xf32> -> vector<8x32xf32>
    %52 = arith.addf %49, %51 : vector<8x32xf32>
    %53 = vector.extract_strided_slice %34 {offsets = [0, 2], sizes = [4, 32], strides = [1, 1]} : vector<4x34xbf16> to vector<4x32xbf16>
    %cst_44 = arith.constant dense<0.000000e+00> : vector<8x32xf32>
    %54 = tpu.matmul %14, %53, %cst_44 {dimension_numbers = #tpu.dot_dimension_numbers<[1], [0], [0], [1], [0, 0, 1, 1], [], []>} : vector<8x4xbf16>, vector<4x32xbf16>, vector<8x32xf32> -> vector<8x32xf32>
    %55 = arith.addf %52, %54 : vector<8x32xf32>
    %cst_45 = arith.constant dense<0.000000e+00> : vector<8xf32>
    %56 = vector.multi_reduction <add>, %55, %cst_45 [1] : vector<8x32xf32> to vector<8xf32>
    %57 = vector.shape_cast %56 : vector<8xf32> to vector<8x1xf32>
    %58 = arith.addf %29, %57 : vector<8x1xf32>
    %59 = arith.mulf %55, %55 : vector<8x32xf32>
    %cst_46 = arith.constant dense<0.000000e+00> : vector<8xf32>
    %60 = vector.multi_reduction <add>, %59, %cst_46 [1] : vector<8x32xf32> to vector<8xf32>
    %61 = vector.shape_cast %60 : vector<8xf32> to vector<8x1xf32>
    %62 = arith.addf %30, %61 : vector<8x1xf32>
    %c0_i32_47 = arith.constant 0 : i32
    %63 = arith.addi %28, %c0_i32_47 : i32
    %c0_48 = arith.constant 0 : index
    %c0_49 = arith.constant 0 : index
    %64 = arith.index_cast %63 : i32 to index
    %c0_50 = arith.constant 0 : index
    %65 = vector.load %arg6[%c0_48, %c0_49, %64, %c0_50] : memref<1x8x16x64xf32, #tpu.memory_space<vmem>>, vector<1x8x1x32xf32>
    %66 = vector.shape_cast %65 : vector<1x8x1x32xf32> to vector<8x32xf32>
    %67 = vector.shape_cast %55 : vector<8x32xf32> to vector<1x8x1x32xf32>
    tpu.vector_store %arg6[%c0_48, %c0_49, %64, %c0_50], %67 {strides = array<i32>} : memref<1x8x16x64xf32, #tpu.memory_space<vmem>>, vector<1x8x1x32xf32>,
    %cst_51 = arith.constant 0.000000e+00 : f32
    %68 = vector.broadcast %cst_51 : f32 to vector<8x32xf32>
    %69 = vector.extract_strided_slice %34 {offsets = [0, 0], sizes = [4, 32], strides = [1, 1]} : vector<4x34xbf16> to vector<4x32xbf16>
    %cst_52 = arith.constant dense<0.000000e+00> : vector<8x32xf32>
    %70 = tpu.matmul %16, %69, %cst_52 {dimension_numbers = #tpu.dot_dimension_numbers<[1], [0], [0], [1], [0, 0, 1, 1], [], []>} : vector<8x4xbf16>, vector<4x32xbf16>, vector<8x32xf32> -> vector<8x32xf32>
    %71 = arith.addf %68, %70 : vector<8x32xf32>
    %72 = vector.extract_strided_slice %34 {offsets = [0, 1], sizes = [4, 32], strides = [1, 1]} : vector<4x34xbf16> to vector<4x32xbf16>
    %cst_53 = arith.constant dense<0.000000e+00> : vector<8x32xf32>
    %73 = tpu.matmul %18, %72, %cst_53 {dimension_numbers = #tpu.dot_dimension_numbers<[1], [0], [0], [1], [0, 0, 1, 1], [], []>} : vector<8x4xbf16>, vector<4x32xbf16>, vector<8x32xf32> -> vector<8x32xf32>
    %74 = arith.addf %71, %73 : vector<8x32xf32>
    %75 = vector.extract_strided_slice %34 {offsets = [0, 2], sizes = [4, 32], strides = [1, 1]} : vector<4x34xbf16> to vector<4x32xbf16>
    %cst_54 = arith.constant dense<0.000000e+00> : vector<8x32xf32>
    %76 = tpu.matmul %20, %75, %cst_54 {dimension_numbers = #tpu.dot_dimension_numbers<[1], [0], [0], [1], [0, 0, 1, 1], [], []>} : vector<8x4xbf16>, vector<4x32xbf16>, vector<8x32xf32> -> vector<8x32xf32>
    %77 = arith.addf %74, %76 : vector<8x32xf32>
    %78 = vector.extract_strided_slice %36 {offsets = [0, 0], sizes = [4, 32], strides = [1, 1]} : vector<4x34xbf16> to vector<4x32xbf16>
    %cst_55 = arith.constant dense<0.000000e+00> : vector<8x32xf32>
    %79 = tpu.matmul %22, %78, %cst_55 {dimension_numbers = #tpu.dot_dimension_numbers<[1], [0], [0], [1], [0, 0, 1, 1], [], []>} : vector<8x4xbf16>, vector<4x32xbf16>, vector<8x32xf32> -> vector<8x32xf32>
    %80 = arith.addf %77, %79 : vector<8x32xf32>
    %81 = vector.extract_strided_slice %36 {offsets = [0, 1], sizes = [4, 32], strides = [1, 1]} : vector<4x34xbf16> to vector<4x32xbf16>
    %cst_56 = arith.constant dense<0.000000e+00> : vector<8x32xf32>
    %82 = tpu.matmul %24, %81, %cst_56 {dimension_numbers = #tpu.dot_dimension_numbers<[1], [0], [0], [1], [0, 0, 1, 1], [], []>} : vector<8x4xbf16>, vector<4x32xbf16>, vector<8x32xf32> -> vector<8x32xf32>
    %83 = arith.addf %80, %82 : vector<8x32xf32>
    %84 = vector.extract_strided_slice %36 {offsets = [0, 2], sizes = [4, 32], strides = [1, 1]} : vector<4x34xbf16> to vector<4x32xbf16>
    %cst_57 = arith.constant dense<0.000000e+00> : vector<8x32xf32>
    %85 = tpu.matmul %26, %84, %cst_57 {dimension_numbers = #tpu.dot_dimension_numbers<[1], [0], [0], [1], [0, 0, 1, 1], [], []>} : vector<8x4xbf16>, vector<4x32xbf16>, vector<8x32xf32> -> vector<8x32xf32>
    %86 = arith.addf %83, %85 : vector<8x32xf32>
    %cst_58 = arith.constant dense<0.000000e+00> : vector<8xf32>
    %87 = vector.multi_reduction <add>, %86, %cst_58 [1] : vector<8x32xf32> to vector<8xf32>
    %88 = vector.shape_cast %87 : vector<8xf32> to vector<8x1xf32>
    %89 = arith.addf %58, %88 : vector<8x1xf32>
    %90 = arith.mulf %86, %86 : vector<8x32xf32>
    %cst_59 = arith.constant dense<0.000000e+00> : vector<8xf32>
    %91 = vector.multi_reduction <add>, %90, %cst_59 [1] : vector<8x32xf32> to vector<8xf32>
    %92 = vector.shape_cast %91 : vector<8xf32> to vector<8x1xf32>
    %93 = arith.addf %62, %92 : vector<8x1xf32>
    %c0_i32_60 = arith.constant 0 : i32
    %94 = arith.addi %28, %c0_i32_60 : i32
    %c0_61 = arith.constant 0 : index
    %c0_62 = arith.constant 0 : index
    %95 = arith.index_cast %94 : i32 to index
    %c32 = arith.constant 32 : index
    %96 = vector.load %arg6[%c0_61, %c0_62, %95, %c32] : memref<1x8x16x64xf32, #tpu.memory_space<vmem>>, vector<1x8x1x32xf32>
    %97 = vector.shape_cast %96 : vector<1x8x1x32xf32> to vector<8x32xf32>
    %98 = vector.shape_cast %86 : vector<8x32xf32> to vector<1x8x1x32xf32>
    tpu.vector_store %arg6[%c0_61, %c0_62, %95, %c32], %98 {strides = array<i32>} : memref<1x8x16x64xf32, #tpu.memory_space<vmem>>, vector<1x8x1x32xf32>,
    %c0_63 = arith.constant 0 : index
    %c0_64 = arith.constant 0 : index
    %c1_65 = arith.constant 1 : index
    %c0_66 = arith.constant 0 : index
    %99 = vector.load %arg2[%c0_63, %c0_64, %c1_65, %c0_66] : memref<1x4x10x34xbf16, #tpu.memory_space<vmem>>, vector<1x4x1x34xbf16>
    %100 = vector.shape_cast %99 : vector<1x4x1x34xbf16> to vector<4x34xbf16>
    %c0_67 = arith.constant 0 : index
    %c0_68 = arith.constant 0 : index
    %c2_69 = arith.constant 2 : index
    %c0_70 = arith.constant 0 : index
    %101 = vector.load %arg2[%c0_67, %c0_68, %c2_69, %c0_70] : memref<1x4x10x34xbf16, #tpu.memory_space<vmem>>, vector<1x4x1x34xbf16>
    %102 = vector.shape_cast %101 : vector<1x4x1x34xbf16> to vector<4x34xbf16>
    %c0_71 = arith.constant 0 : index
    %c0_72 = arith.constant 0 : index
    %c3_73 = arith.constant 3 : index
    %c0_74 = arith.constant 0 : index
    %103 = vector.load %arg2[%c0_71, %c0_72, %c3_73, %c0_74] : memref<1x4x10x34xbf16, #tpu.memory_space<vmem>>, vector<1x4x1x34xbf16>
    %104 = vector.shape_cast %103 : vector<1x4x1x34xbf16> to vector<4x34xbf16>
    %cst_75 = arith.constant 0.000000e+00 : f32
    %105 = vector.broadcast %cst_75 : f32 to vector<8x32xf32>
    %106 = vector.extract_strided_slice %100 {offsets = [0, 0], sizes = [4, 32], strides = [1, 1]} : vector<4x34xbf16> to vector<4x32xbf16>
    %cst_76 = arith.constant dense<0.000000e+00> : vector<8x32xf32>
    %107 = tpu.matmul %4, %106, %cst_76 {dimension_numbers = #tpu.dot_dimension_numbers<[1], [0], [0], [1], [0, 0, 1, 1], [], []>} : vector<8x4xbf16>, vector<4x32xbf16>, vector<8x32xf32> -> vector<8x32xf32>
    %108 = arith.addf %105, %107 : vector<8x32xf32>
    %109 = vector.extract_strided_slice %100 {offsets = [0, 1], sizes = [4, 32], strides = [1, 1]} : vector<4x34xbf16> to vector<4x32xbf16>
    %cst_77 = arith.constant dense<0.000000e+00> : vector<8x32xf32>
    %110 = tpu.matmul %6, %109, %cst_77 {dimension_numbers = #tpu.dot_dimension_numbers<[1], [0], [0], [1], [0, 0, 1, 1], [], []>} : vector<8x4xbf16>, vector<4x32xbf16>, vector<8x32xf32> -> vector<8x32xf32>
    %111 = arith.addf %108, %110 : vector<8x32xf32>
    %112 = vector.extract_strided_slice %100 {offsets = [0, 2], sizes = [4, 32], strides = [1, 1]} : vector<4x34xbf16> to vector<4x32xbf16>
    %cst_78 = arith.constant dense<0.000000e+00> : vector<8x32xf32>
    %113 = tpu.matmul %8, %112, %cst_78 {dimension_numbers = #tpu.dot_dimension_numbers<[1], [0], [0], [1], [0, 0, 1, 1], [], []>} : vector<8x4xbf16>, vector<4x32xbf16>, vector<8x32xf32> -> vector<8x32xf32>
    %114 = arith.addf %111, %113 : vector<8x32xf32>
    %115 = vector.extract_strided_slice %102 {offsets = [0, 0], sizes = [4, 32], strides = [1, 1]} : vector<4x34xbf16> to vector<4x32xbf16>
    %cst_79 = arith.constant dense<0.000000e+00> : vector<8x32xf32>
    %116 = tpu.matmul %10, %115, %cst_79 {dimension_numbers = #tpu.dot_dimension_numbers<[1], [0], [0], [1], [0, 0, 1, 1], [], []>} : vector<8x4xbf16>, vector<4x32xbf16>, vector<8x32xf32> -> vector<8x32xf32>
    %117 = arith.addf %114, %116 : vector<8x32xf32>
    %118 = vector.extract_strided_slice %102 {offsets = [0, 1], sizes = [4, 32], strides = [1, 1]} : vector<4x34xbf16> to vector<4x32xbf16>
    %cst_80 = arith.constant dense<0.000000e+00> : vector<8x32xf32>
    %119 = tpu.matmul %12, %118, %cst_80 {dimension_numbers = #tpu.dot_dimension_numbers<[1], [0], [0], [1], [0, 0, 1, 1], [], []>} : vector<8x4xbf16>, vector<4x32xbf16>, vector<8x32xf32> -> vector<8x32xf32>
    %120 = arith.addf %117, %119 : vector<8x32xf32>
    %121 = vector.extract_strided_slice %102 {offsets = [0, 2], sizes = [4, 32], strides = [1, 1]} : vector<4x34xbf16> to vector<4x32xbf16>
    %cst_81 = arith.constant dense<0.000000e+00> : vector<8x32xf32>
    %122 = tpu.matmul %14, %121, %cst_81 {dimension_numbers = #tpu.dot_dimension_numbers<[1], [0], [0], [1], [0, 0, 1, 1], [], []>} : vector<8x4xbf16>, vector<4x32xbf16>, vector<8x32xf32> -> vector<8x32xf32>
    %123 = arith.addf %120, %122 : vector<8x32xf32>
    %cst_82 = arith.constant dense<0.000000e+00> : vector<8xf32>
    %124 = vector.multi_reduction <add>, %123, %cst_82 [1] : vector<8x32xf32> to vector<8xf32>
    %125 = vector.shape_cast %124 : vector<8xf32> to vector<8x1xf32>
    %126 = arith.addf %89, %125 : vector<8x1xf32>
    %127 = arith.mulf %123, %123 : vector<8x32xf32>
    %cst_83 = arith.constant dense<0.000000e+00> : vector<8xf32>
    %128 = vector.multi_reduction <add>, %127, %cst_83 [1] : vector<8x32xf32> to vector<8xf32>
    %129 = vector.shape_cast %128 : vector<8xf32> to vector<8x1xf32>
    %130 = arith.addf %93, %129 : vector<8x1xf32>
    %c1_i32 = arith.constant 1 : i32
    %131 = arith.addi %28, %c1_i32 : i32
    %c0_84 = arith.constant 0 : index
    %c0_85 = arith.constant 0 : index
    %132 = arith.index_cast %131 : i32 to index
    %c0_86 = arith.constant 0 : index
    %133 = vector.load %arg6[%c0_84, %c0_85, %132, %c0_86] : memref<1x8x16x64xf32, #tpu.memory_space<vmem>>, vector<1x8x1x32xf32>
    %134 = vector.shape_cast %133 : vector<1x8x1x32xf32> to vector<8x32xf32>
    %135 = vector.shape_cast %123 : vector<8x32xf32> to vector<1x8x1x32xf32>
    tpu.vector_store %arg6[%c0_84, %c0_85, %132, %c0_86], %135 {strides = array<i32>} : memref<1x8x16x64xf32, #tpu.memory_space<vmem>>, vector<1x8x1x32xf32>,
    %cst_87 = arith.constant 0.000000e+00 : f32
    %136 = vector.broadcast %cst_87 : f32 to vector<8x32xf32>
    %137 = vector.extract_strided_slice %102 {offsets = [0, 0], sizes = [4, 32], strides = [1, 1]} : vector<4x34xbf16> to vector<4x32xbf16>
    %cst_88 = arith.constant dense<0.000000e+00> : vector<8x32xf32>
    %138 = tpu.matmul %16, %137, %cst_88 {dimension_numbers = #tpu.dot_dimension_numbers<[1], [0], [0], [1], [0, 0, 1, 1], [], []>} : vector<8x4xbf16>, vector<4x32xbf16>, vector<8x32xf32> -> vector<8x32xf32>
    %139 = arith.addf %136, %138 : vector<8x32xf32>
    %140 = vector.extract_strided_slice %102 {offsets = [0, 1], sizes = [4, 32], strides = [1, 1]} : vector<4x34xbf16> to vector<4x32xbf16>
    %cst_89 = arith.constant dense<0.000000e+00> : vector<8x32xf32>
    %141 = tpu.matmul %18, %140, %cst_89 {dimension_numbers = #tpu.dot_dimension_numbers<[1], [0], [0], [1], [0, 0, 1, 1], [], []>} : vector<8x4xbf16>, vector<4x32xbf16>, vector<8x32xf32> -> vector<8x32xf32>
    %142 = arith.addf %139, %141 : vector<8x32xf32>
    %143 = vector.extract_strided_slice %102 {offsets = [0, 2], sizes = [4, 32], strides = [1, 1]} : vector<4x34xbf16> to vector<4x32xbf16>
    %cst_90 = arith.constant dense<0.000000e+00> : vector<8x32xf32>
    %144 = tpu.matmul %20, %143, %cst_90 {dimension_numbers = #tpu.dot_dimension_numbers<[1], [0], [0], [1], [0, 0, 1, 1], [], []>} : vector<8x4xbf16>, vector<4x32xbf16>, vector<8x32xf32> -> vector<8x32xf32>
    %145 = arith.addf %142, %144 : vector<8x32xf32>
    %146 = vector.extract_strided_slice %104 {offsets = [0, 0], sizes = [4, 32], strides = [1, 1]} : vector<4x34xbf16> to vector<4x32xbf16>
    %cst_91 = arith.constant dense<0.000000e+00> : vector<8x32xf32>
    %147 = tpu.matmul %22, %146, %cst_91 {dimension_numbers = #tpu.dot_dimension_numbers<[1], [0], [0], [1], [0, 0, 1, 1], [], []>} : vector<8x4xbf16>, vector<4x32xbf16>, vector<8x32xf32> -> vector<8x32xf32>
    %148 = arith.addf %145, %147 : vector<8x32xf32>
    %149 = vector.extract_strided_slice %104 {offsets = [0, 1], sizes = [4, 32], strides = [1, 1]} : vector<4x34xbf16> to vector<4x32xbf16>
    %cst_92 = arith.constant dense<0.000000e+00> : vector<8x32xf32>
    %150 = tpu.matmul %24, %149, %cst_92 {dimension_numbers = #tpu.dot_dimension_numbers<[1], [0], [0], [1], [0, 0, 1, 1], [], []>} : vector<8x4xbf16>, vector<4x32xbf16>, vector<8x32xf32> -> vector<8x32xf32>
    %151 = arith.addf %148, %150 : vector<8x32xf32>
    %152 = vector.extract_strided_slice %104 {offsets = [0, 2], sizes = [4, 32], strides = [1, 1]} : vector<4x34xbf16> to vector<4x32xbf16>
    %cst_93 = arith.constant dense<0.000000e+00> : vector<8x32xf32>
    %153 = tpu.matmul %26, %152, %cst_93 {dimension_numbers = #tpu.dot_dimension_numbers<[1], [0], [0], [1], [0, 0, 1, 1], [], []>} : vector<8x4xbf16>, vector<4x32xbf16>, vector<8x32xf32> -> vector<8x32xf32>
    %154 = arith.addf %151, %153 : vector<8x32xf32>
    %cst_94 = arith.constant dense<0.000000e+00> : vector<8xf32>
    %155 = vector.multi_reduction <add>, %154, %cst_94 [1] : vector<8x32xf32> to vector<8xf32>
    %156 = vector.shape_cast %155 : vector<8xf32> to vector<8x1xf32>
    %157 = arith.addf %126, %156 : vector<8x1xf32>
    %158 = arith.mulf %154, %154 : vector<8x32xf32>
    %cst_95 = arith.constant dense<0.000000e+00> : vector<8xf32>
    %159 = vector.multi_reduction <add>, %158, %cst_95 [1] : vector<8x32xf32> to vector<8xf32>
    %160 = vector.shape_cast %159 : vector<8xf32> to vector<8x1xf32>
    %161 = arith.addf %130, %160 : vector<8x1xf32>
    %c1_i32_96 = arith.constant 1 : i32
    %162 = arith.addi %28, %c1_i32_96 : i32
    %c0_97 = arith.constant 0 : index
    %c0_98 = arith.constant 0 : index
    %163 = arith.index_cast %162 : i32 to index
    %c32_99 = arith.constant 32 : index
    %164 = vector.load %arg6[%c0_97, %c0_98, %163, %c32_99] : memref<1x8x16x64xf32, #tpu.memory_space<vmem>>, vector<1x8x1x32xf32>
    %165 = vector.shape_cast %164 : vector<1x8x1x32xf32> to vector<8x32xf32>
    %166 = vector.shape_cast %154 : vector<8x32xf32> to vector<1x8x1x32xf32>
    tpu.vector_store %arg6[%c0_97, %c0_98, %163, %c32_99], %166 {strides = array<i32>} : memref<1x8x16x64xf32, #tpu.memory_space<vmem>>, vector<1x8x1x32xf32>,
    %c0_100 = arith.constant 0 : index
    %c0_101 = arith.constant 0 : index
    %c2_102 = arith.constant 2 : index
    %c0_103 = arith.constant 0 : index
    %167 = vector.load %arg2[%c0_100, %c0_101, %c2_102, %c0_103] : memref<1x4x10x34xbf16, #tpu.memory_space<vmem>>, vector<1x4x1x34xbf16>
    %168 = vector.shape_cast %167 : vector<1x4x1x34xbf16> to vector<4x34xbf16>
    %c0_104 = arith.constant 0 : index
    %c0_105 = arith.constant 0 : index
    %c3_106 = arith.constant 3 : index
    %c0_107 = arith.constant 0 : index
    %169 = vector.load %arg2[%c0_104, %c0_105, %c3_106, %c0_107] : memref<1x4x10x34xbf16, #tpu.memory_space<vmem>>, vector<1x4x1x34xbf16>
    %170 = vector.shape_cast %169 : vector<1x4x1x34xbf16> to vector<4x34xbf16>
    %c0_108 = arith.constant 0 : index
    %c0_109 = arith.constant 0 : index
    %c4_110 = arith.constant 4 : index
    %c0_111 = arith.constant 0 : index
    %171 = vector.load %arg2[%c0_108, %c0_109, %c4_110, %c0_111] : memref<1x4x10x34xbf16, #tpu.memory_space<vmem>>, vector<1x4x1x34xbf16>
    %172 = vector.shape_cast %171 : vector<1x4x1x34xbf16> to vector<4x34xbf16>
    %cst_112 = arith.constant 0.000000e+00 : f32
    %173 = vector.broadcast %cst_112 : f32 to vector<8x32xf32>
    %174 = vector.extract_strided_slice %168 {offsets = [0, 0], sizes = [4, 32], strides = [1, 1]} : vector<4x34xbf16> to vector<4x32xbf16>
    %cst_113 = arith.constant dense<0.000000e+00> : vector<8x32xf32>
    %175 = tpu.matmul %4, %174, %cst_113 {dimension_numbers = #tpu.dot_dimension_numbers<[1], [0], [0], [1], [0, 0, 1, 1], [], []>} : vector<8x4xbf16>, vector<4x32xbf16>, vector<8x32xf32> -> vector<8x32xf32>
    %176 = arith.addf %173, %175 : vector<8x32xf32>
    %177 = vector.extract_strided_slice %168 {offsets = [0, 1], sizes = [4, 32], strides = [1, 1]} : vector<4x34xbf16> to vector<4x32xbf16>
    %cst_114 = arith.constant dense<0.000000e+00> : vector<8x32xf32>
    %178 = tpu.matmul %6, %177, %cst_114 {dimension_numbers = #tpu.dot_dimension_numbers<[1], [0], [0], [1], [0, 0, 1, 1], [], []>} : vector<8x4xbf16>, vector<4x32xbf16>, vector<8x32xf32> -> vector<8x32xf32>
    %179 = arith.addf %176, %178 : vector<8x32xf32>
    %180 = vector.extract_strided_slice %168 {offsets = [0, 2], sizes = [4, 32], strides = [1, 1]} : vector<4x34xbf16> to vector<4x32xbf16>
    %cst_115 = arith.constant dense<0.000000e+00> : vector<8x32xf32>
    %181 = tpu.matmul %8, %180, %cst_115 {dimension_numbers = #tpu.dot_dimension_numbers<[1], [0], [0], [1], [0, 0, 1, 1], [], []>} : vector<8x4xbf16>, vector<4x32xbf16>, vector<8x32xf32> -> vector<8x32xf32>
    %182 = arith.addf %179, %181 : vector<8x32xf32>
    %183 = vector.extract_strided_slice %170 {offsets = [0, 0], sizes = [4, 32], strides = [1, 1]} : vector<4x34xbf16> to vector<4x32xbf16>
    %cst_116 = arith.constant dense<0.000000e+00> : vector<8x32xf32>
    %184 = tpu.matmul %10, %183, %cst_116 {dimension_numbers = #tpu.dot_dimension_numbers<[1], [0], [0], [1], [0, 0, 1, 1], [], []>} : vector<8x4xbf16>, vector<4x32xbf16>, vector<8x32xf32> -> vector<8x32xf32>
    %185 = arith.addf %182, %184 : vector<8x32xf32>
    %186 = vector.extract_strided_slice %170 {offsets = [0, 1], sizes = [4, 32], strides = [1, 1]} : vector<4x34xbf16> to vector<4x32xbf16>
    %cst_117 = arith.constant dense<0.000000e+00> : vector<8x32xf32>
    %187 = tpu.matmul %12, %186, %cst_117 {dimension_numbers = #tpu.dot_dimension_numbers<[1], [0], [0], [1], [0, 0, 1, 1], [], []>} : vector<8x4xbf16>, vector<4x32xbf16>, vector<8x32xf32> -> vector<8x32xf32>
    %188 = arith.addf %185, %187 : vector<8x32xf32>
    %189 = vector.extract_strided_slice %170 {offsets = [0, 2], sizes = [4, 32], strides = [1, 1]} : vector<4x34xbf16> to vector<4x32xbf16>
    %cst_118 = arith.constant dense<0.000000e+00> : vector<8x32xf32>
    %190 = tpu.matmul %14, %189, %cst_118 {dimension_numbers = #tpu.dot_dimension_numbers<[1], [0], [0], [1], [0, 0, 1, 1], [], []>} : vector<8x4xbf16>, vector<4x32xbf16>, vector<8x32xf32> -> vector<8x32xf32>
    %191 = arith.addf %188, %190 : vector<8x32xf32>
    %cst_119 = arith.constant dense<0.000000e+00> : vector<8xf32>
    %192 = vector.multi_reduction <add>, %191, %cst_119 [1] : vector<8x32xf32> to vector<8xf32>
    %193 = vector.shape_cast %192 : vector<8xf32> to vector<8x1xf32>
    %194 = arith.addf %157, %193 : vector<8x1xf32>
    %195 = arith.mulf %191, %191 : vector<8x32xf32>
    %cst_120 = arith.constant dense<0.000000e+00> : vector<8xf32>
    %196 = vector.multi_reduction <add>, %195, %cst_120 [1] : vector<8x32xf32> to vector<8xf32>
    %197 = vector.shape_cast %196 : vector<8xf32> to vector<8x1xf32>
    %198 = arith.addf %161, %197 : vector<8x1xf32>
    %c2_i32 = arith.constant 2 : i32
    %199 = arith.addi %28, %c2_i32 : i32
    %c0_121 = arith.constant 0 : index
    %c0_122 = arith.constant 0 : index
    %200 = arith.index_cast %199 : i32 to index
    %c0_123 = arith.constant 0 : index
    %201 = vector.load %arg6[%c0_121, %c0_122, %200, %c0_123] : memref<1x8x16x64xf32, #tpu.memory_space<vmem>>, vector<1x8x1x32xf32>
    %202 = vector.shape_cast %201 : vector<1x8x1x32xf32> to vector<8x32xf32>
    %203 = vector.shape_cast %191 : vector<8x32xf32> to vector<1x8x1x32xf32>
    tpu.vector_store %arg6[%c0_121, %c0_122, %200, %c0_123], %203 {strides = array<i32>} : memref<1x8x16x64xf32, #tpu.memory_space<vmem>>, vector<1x8x1x32xf32>,
    %cst_124 = arith.constant 0.000000e+00 : f32
    %204 = vector.broadcast %cst_124 : f32 to vector<8x32xf32>
    %205 = vector.extract_strided_slice %170 {offsets = [0, 0], sizes = [4, 32], strides = [1, 1]} : vector<4x34xbf16> to vector<4x32xbf16>
    %cst_125 = arith.constant dense<0.000000e+00> : vector<8x32xf32>
    %206 = tpu.matmul %16, %205, %cst_125 {dimension_numbers = #tpu.dot_dimension_numbers<[1], [0], [0], [1], [0, 0, 1, 1], [], []>} : vector<8x4xbf16>, vector<4x32xbf16>, vector<8x32xf32> -> vector<8x32xf32>
    %207 = arith.addf %204, %206 : vector<8x32xf32>
    %208 = vector.extract_strided_slice %170 {offsets = [0, 1], sizes = [4, 32], strides = [1, 1]} : vector<4x34xbf16> to vector<4x32xbf16>
    %cst_126 = arith.constant dense<0.000000e+00> : vector<8x32xf32>
    %209 = tpu.matmul %18, %208, %cst_126 {dimension_numbers = #tpu.dot_dimension_numbers<[1], [0], [0], [1], [0, 0, 1, 1], [], []>} : vector<8x4xbf16>, vector<4x32xbf16>, vector<8x32xf32> -> vector<8x32xf32>
    %210 = arith.addf %207, %209 : vector<8x32xf32>
    %211 = vector.extract_strided_slice %170 {offsets = [0, 2], sizes = [4, 32], strides = [1, 1]} : vector<4x34xbf16> to vector<4x32xbf16>
    %cst_127 = arith.constant dense<0.000000e+00> : vector<8x32xf32>
    %212 = tpu.matmul %20, %211, %cst_127 {dimension_numbers = #tpu.dot_dimension_numbers<[1], [0], [0], [1], [0, 0, 1, 1], [], []>} : vector<8x4xbf16>, vector<4x32xbf16>, vector<8x32xf32> -> vector<8x32xf32>
    %213 = arith.addf %210, %212 : vector<8x32xf32>
    %214 = vector.extract_strided_slice %172 {offsets = [0, 0], sizes = [4, 32], strides = [1, 1]} : vector<4x34xbf16> to vector<4x32xbf16>
    %cst_128 = arith.constant dense<0.000000e+00> : vector<8x32xf32>
    %215 = tpu.matmul %22, %214, %cst_128 {dimension_numbers = #tpu.dot_dimension_numbers<[1], [0], [0], [1], [0, 0, 1, 1], [], []>} : vector<8x4xbf16>, vector<4x32xbf16>, vector<8x32xf32> -> vector<8x32xf32>
    %216 = arith.addf %213, %215 : vector<8x32xf32>
    %217 = vector.extract_strided_slice %172 {offsets = [0, 1], sizes = [4, 32], strides = [1, 1]} : vector<4x34xbf16> to vector<4x32xbf16>
    %cst_129 = arith.constant dense<0.000000e+00> : vector<8x32xf32>
    %218 = tpu.matmul %24, %217, %cst_129 {dimension_numbers = #tpu.dot_dimension_numbers<[1], [0], [0], [1], [0, 0, 1, 1], [], []>} : vector<8x4xbf16>, vector<4x32xbf16>, vector<8x32xf32> -> vector<8x32xf32>
    %219 = arith.addf %216, %218 : vector<8x32xf32>
    %220 = vector.extract_strided_slice %172 {offsets = [0, 2], sizes = [4, 32], strides = [1, 1]} : vector<4x34xbf16> to vector<4x32xbf16>
    %cst_130 = arith.constant dense<0.000000e+00> : vector<8x32xf32>
    %221 = tpu.matmul %26, %220, %cst_130 {dimension_numbers = #tpu.dot_dimension_numbers<[1], [0], [0], [1], [0, 0, 1, 1], [], []>} : vector<8x4xbf16>, vector<4x32xbf16>, vector<8x32xf32> -> vector<8x32xf32>
    %222 = arith.addf %219, %221 : vector<8x32xf32>
    %cst_131 = arith.constant dense<0.000000e+00> : vector<8xf32>
    %223 = vector.multi_reduction <add>, %222, %cst_131 [1] : vector<8x32xf32> to vector<8xf32>
    %224 = vector.shape_cast %223 : vector<8xf32> to vector<8x1xf32>
    %225 = arith.addf %194, %224 : vector<8x1xf32>
    %226 = arith.mulf %222, %222 : vector<8x32xf32>
    %cst_132 = arith.constant dense<0.000000e+00> : vector<8xf32>
    %227 = vector.multi_reduction <add>, %226, %cst_132 [1] : vector<8x32xf32> to vector<8xf32>
    %228 = vector.shape_cast %227 : vector<8xf32> to vector<8x1xf32>
    %229 = arith.addf %198, %228 : vector<8x1xf32>
    %c2_i32_133 = arith.constant 2 : i32
    %230 = arith.addi %28, %c2_i32_133 : i32
    %c0_134 = arith.constant 0 : index
    %c0_135 = arith.constant 0 : index
    %231 = arith.index_cast %230 : i32 to index
    %c32_136 = arith.constant 32 : index
    %232 = vector.load %arg6[%c0_134, %c0_135, %231, %c32_136] : memref<1x8x16x64xf32, #tpu.memory_space<vmem>>, vector<1x8x1x32xf32>
    %233 = vector.shape_cast %232 : vector<1x8x1x32xf32> to vector<8x32xf32>
    %234 = vector.shape_cast %222 : vector<8x32xf32> to vector<1x8x1x32xf32>
    tpu.vector_store %arg6[%c0_134, %c0_135, %231, %c32_136], %234 {strides = array<i32>} : memref<1x8x16x64xf32, #tpu.memory_space<vmem>>, vector<1x8x1x32xf32>,
    %c0_137 = arith.constant 0 : index
    %c0_138 = arith.constant 0 : index
    %c3_139 = arith.constant 3 : index
    %c0_140 = arith.constant 0 : index
    %235 = vector.load %arg2[%c0_137, %c0_138, %c3_139, %c0_140] : memref<1x4x10x34xbf16, #tpu.memory_space<vmem>>, vector<1x4x1x34xbf16>
    %236 = vector.shape_cast %235 : vector<1x4x1x34xbf16> to vector<4x34xbf16>
    %c0_141 = arith.constant 0 : index
    %c0_142 = arith.constant 0 : index
    %c4_143 = arith.constant 4 : index
    %c0_144 = arith.constant 0 : index
    %237 = vector.load %arg2[%c0_141, %c0_142, %c4_143, %c0_144] : memref<1x4x10x34xbf16, #tpu.memory_space<vmem>>, vector<1x4x1x34xbf16>
    %238 = vector.shape_cast %237 : vector<1x4x1x34xbf16> to vector<4x34xbf16>
    %c0_145 = arith.constant 0 : index
    %c0_146 = arith.constant 0 : index
    %c5_147 = arith.constant 5 : index
    %c0_148 = arith.constant 0 : index
    %239 = vector.load %arg2[%c0_145, %c0_146, %c5_147, %c0_148] : memref<1x4x10x34xbf16, #tpu.memory_space<vmem>>, vector<1x4x1x34xbf16>
    %240 = vector.shape_cast %239 : vector<1x4x1x34xbf16> to vector<4x34xbf16>
    %cst_149 = arith.constant 0.000000e+00 : f32
    %241 = vector.broadcast %cst_149 : f32 to vector<8x32xf32>
    %242 = vector.extract_strided_slice %236 {offsets = [0, 0], sizes = [4, 32], strides = [1, 1]} : vector<4x34xbf16> to vector<4x32xbf16>
    %cst_150 = arith.constant dense<0.000000e+00> : vector<8x32xf32>
    %243 = tpu.matmul %4, %242, %cst_150 {dimension_numbers = #tpu.dot_dimension_numbers<[1], [0], [0], [1], [0, 0, 1, 1], [], []>} : vector<8x4xbf16>, vector<4x32xbf16>, vector<8x32xf32> -> vector<8x32xf32>
    %244 = arith.addf %241, %243 : vector<8x32xf32>
    %245 = vector.extract_strided_slice %236 {offsets = [0, 1], sizes = [4, 32], strides = [1, 1]} : vector<4x34xbf16> to vector<4x32xbf16>
    %cst_151 = arith.constant dense<0.000000e+00> : vector<8x32xf32>
    %246 = tpu.matmul %6, %245, %cst_151 {dimension_numbers = #tpu.dot_dimension_numbers<[1], [0], [0], [1], [0, 0, 1, 1], [], []>} : vector<8x4xbf16>, vector<4x32xbf16>, vector<8x32xf32> -> vector<8x32xf32>
    %247 = arith.addf %244, %246 : vector<8x32xf32>
    %248 = vector.extract_strided_slice %236 {offsets = [0, 2], sizes = [4, 32], strides = [1, 1]} : vector<4x34xbf16> to vector<4x32xbf16>
    %cst_152 = arith.constant dense<0.000000e+00> : vector<8x32xf32>
    %249 = tpu.matmul %8, %248, %cst_152 {dimension_numbers = #tpu.dot_dimension_numbers<[1], [0], [0], [1], [0, 0, 1, 1], [], []>} : vector<8x4xbf16>, vector<4x32xbf16>, vector<8x32xf32> -> vector<8x32xf32>
    %250 = arith.addf %247, %249 : vector<8x32xf32>
    %251 = vector.extract_strided_slice %238 {offsets = [0, 0], sizes = [4, 32], strides = [1, 1]} : vector<4x34xbf16> to vector<4x32xbf16>
    %cst_153 = arith.constant dense<0.000000e+00> : vector<8x32xf32>
    %252 = tpu.matmul %10, %251, %cst_153 {dimension_numbers = #tpu.dot_dimension_numbers<[1], [0], [0], [1], [0, 0, 1, 1], [], []>} : vector<8x4xbf16>, vector<4x32xbf16>, vector<8x32xf32> -> vector<8x32xf32>
    %253 = arith.addf %250, %252 : vector<8x32xf32>
    %254 = vector.extract_strided_slice %238 {offsets = [0, 1], sizes = [4, 32], strides = [1, 1]} : vector<4x34xbf16> to vector<4x32xbf16>
    %cst_154 = arith.constant dense<0.000000e+00> : vector<8x32xf32>
    %255 = tpu.matmul %12, %254, %cst_154 {dimension_numbers = #tpu.dot_dimension_numbers<[1], [0], [0], [1], [0, 0, 1, 1], [], []>} : vector<8x4xbf16>, vector<4x32xbf16>, vector<8x32xf32> -> vector<8x32xf32>
    %256 = arith.addf %253, %255 : vector<8x32xf32>
    %257 = vector.extract_strided_slice %238 {offsets = [0, 2], sizes = [4, 32], strides = [1, 1]} : vector<4x34xbf16> to vector<4x32xbf16>
    %cst_155 = arith.constant dense<0.000000e+00> : vector<8x32xf32>
    %258 = tpu.matmul %14, %257, %cst_155 {dimension_numbers = #tpu.dot_dimension_numbers<[1], [0], [0], [1], [0, 0, 1, 1], [], []>} : vector<8x4xbf16>, vector<4x32xbf16>, vector<8x32xf32> -> vector<8x32xf32>
    %259 = arith.addf %256, %258 : vector<8x32xf32>
    %cst_156 = arith.constant dense<0.000000e+00> : vector<8xf32>
    %260 = vector.multi_reduction <add>, %259, %cst_156 [1] : vector<8x32xf32> to vector<8xf32>
    %261 = vector.shape_cast %260 : vector<8xf32> to vector<8x1xf32>
    %262 = arith.addf %225, %261 : vector<8x1xf32>
    %263 = arith.mulf %259, %259 : vector<8x32xf32>
    %cst_157 = arith.constant dense<0.000000e+00> : vector<8xf32>
    %264 = vector.multi_reduction <add>, %263, %cst_157 [1] : vector<8x32xf32> to vector<8xf32>
    %265 = vector.shape_cast %264 : vector<8xf32> to vector<8x1xf32>
    %266 = arith.addf %229, %265 : vector<8x1xf32>
    %c3_i32 = arith.constant 3 : i32
    %267 = arith.addi %28, %c3_i32 : i32
    %c0_158 = arith.constant 0 : index
    %c0_159 = arith.constant 0 : index
    %268 = arith.index_cast %267 : i32 to index
    %c0_160 = arith.constant 0 : index
    %269 = vector.load %arg6[%c0_158, %c0_159, %268, %c0_160] : memref<1x8x16x64xf32, #tpu.memory_space<vmem>>, vector<1x8x1x32xf32>
    %270 = vector.shape_cast %269 : vector<1x8x1x32xf32> to vector<8x32xf32>
    %271 = vector.shape_cast %259 : vector<8x32xf32> to vector<1x8x1x32xf32>
    tpu.vector_store %arg6[%c0_158, %c0_159, %268, %c0_160], %271 {strides = array<i32>} : memref<1x8x16x64xf32, #tpu.memory_space<vmem>>, vector<1x8x1x32xf32>,
    %cst_161 = arith.constant 0.000000e+00 : f32
    %272 = vector.broadcast %cst_161 : f32 to vector<8x32xf32>
    %273 = vector.extract_strided_slice %238 {offsets = [0, 0], sizes = [4, 32], strides = [1, 1]} : vector<4x34xbf16> to vector<4x32xbf16>
    %cst_162 = arith.constant dense<0.000000e+00> : vector<8x32xf32>
    %274 = tpu.matmul %16, %273, %cst_162 {dimension_numbers = #tpu.dot_dimension_numbers<[1], [0], [0], [1], [0, 0, 1, 1], [], []>} : vector<8x4xbf16>, vector<4x32xbf16>, vector<8x32xf32> -> vector<8x32xf32>
    %275 = arith.addf %272, %274 : vector<8x32xf32>
    %276 = vector.extract_strided_slice %238 {offsets = [0, 1], sizes = [4, 32], strides = [1, 1]} : vector<4x34xbf16> to vector<4x32xbf16>
    %cst_163 = arith.constant dense<0.000000e+00> : vector<8x32xf32>
    %277 = tpu.matmul %18, %276, %cst_163 {dimension_numbers = #tpu.dot_dimension_numbers<[1], [0], [0], [1], [0, 0, 1, 1], [], []>} : vector<8x4xbf16>, vector<4x32xbf16>, vector<8x32xf32> -> vector<8x32xf32>
    %278 = arith.addf %275, %277 : vector<8x32xf32>
    %279 = vector.extract_strided_slice %238 {offsets = [0, 2], sizes = [4, 32], strides = [1, 1]} : vector<4x34xbf16> to vector<4x32xbf16>
    %cst_164 = arith.constant dense<0.000000e+00> : vector<8x32xf32>
    %280 = tpu.matmul %20, %279, %cst_164 {dimension_numbers = #tpu.dot_dimension_numbers<[1], [0], [0], [1], [0, 0, 1, 1], [], []>} : vector<8x4xbf16>, vector<4x32xbf16>, vector<8x32xf32> -> vector<8x32xf32>
    %281 = arith.addf %278, %280 : vector<8x32xf32>
    %282 = vector.extract_strided_slice %240 {offsets = [0, 0], sizes = [4, 32], strides = [1, 1]} : vector<4x34xbf16> to vector<4x32xbf16>
    %cst_165 = arith.constant dense<0.000000e+00> : vector<8x32xf32>
    %283 = tpu.matmul %22, %282, %cst_165 {dimension_numbers = #tpu.dot_dimension_numbers<[1], [0], [0], [1], [0, 0, 1, 1], [], []>} : vector<8x4xbf16>, vector<4x32xbf16>, vector<8x32xf32> -> vector<8x32xf32>
    %284 = arith.addf %281, %283 : vector<8x32xf32>
    %285 = vector.extract_strided_slice %240 {offsets = [0, 1], sizes = [4, 32], strides = [1, 1]} : vector<4x34xbf16> to vector<4x32xbf16>
    %cst_166 = arith.constant dense<0.000000e+00> : vector<8x32xf32>
    %286 = tpu.matmul %24, %285, %cst_166 {dimension_numbers = #tpu.dot_dimension_numbers<[1], [0], [0], [1], [0, 0, 1, 1], [], []>} : vector<8x4xbf16>, vector<4x32xbf16>, vector<8x32xf32> -> vector<8x32xf32>
    %287 = arith.addf %284, %286 : vector<8x32xf32>
    %288 = vector.extract_strided_slice %240 {offsets = [0, 2], sizes = [4, 32], strides = [1, 1]} : vector<4x34xbf16> to vector<4x32xbf16>
    %cst_167 = arith.constant dense<0.000000e+00> : vector<8x32xf32>
    %289 = tpu.matmul %26, %288, %cst_167 {dimension_numbers = #tpu.dot_dimension_numbers<[1], [0], [0], [1], [0, 0, 1, 1], [], []>} : vector<8x4xbf16>, vector<4x32xbf16>, vector<8x32xf32> -> vector<8x32xf32>
    %290 = arith.addf %287, %289 : vector<8x32xf32>
    %cst_168 = arith.constant dense<0.000000e+00> : vector<8xf32>
    %291 = vector.multi_reduction <add>, %290, %cst_168 [1] : vector<8x32xf32> to vector<8xf32>
    %292 = vector.shape_cast %291 : vector<8xf32> to vector<8x1xf32>
    %293 = arith.addf %262, %292 : vector<8x1xf32>
    %294 = arith.mulf %290, %290 : vector<8x32xf32>
    %cst_169 = arith.constant dense<0.000000e+00> : vector<8xf32>
    %295 = vector.multi_reduction <add>, %294, %cst_169 [1] : vector<8x32xf32> to vector<8xf32>
    %296 = vector.shape_cast %295 : vector<8xf32> to vector<8x1xf32>
    %297 = arith.addf %266, %296 : vector<8x1xf32>
    %c3_i32_170 = arith.constant 3 : i32
    %298 = arith.addi %28, %c3_i32_170 : i32
    %c0_171 = arith.constant 0 : index
    %c0_172 = arith.constant 0 : index
    %299 = arith.index_cast %298 : i32 to index
    %c32_173 = arith.constant 32 : index
    %300 = vector.load %arg6[%c0_171, %c0_172, %299, %c32_173] : memref<1x8x16x64xf32, #tpu.memory_space<vmem>>, vector<1x8x1x32xf32>
    %301 = vector.shape_cast %300 : vector<1x8x1x32xf32> to vector<8x32xf32>
    %302 = vector.shape_cast %290 : vector<8x32xf32> to vector<1x8x1x32xf32>
    tpu.vector_store %arg6[%c0_171, %c0_172, %299, %c32_173], %302 {strides = array<i32>} : memref<1x8x16x64xf32, #tpu.memory_space<vmem>>, vector<1x8x1x32xf32>,
    %c0_174 = arith.constant 0 : index
    %c0_175 = arith.constant 0 : index
    %c4_176 = arith.constant 4 : index
    %c0_177 = arith.constant 0 : index
    %303 = vector.load %arg2[%c0_174, %c0_175, %c4_176, %c0_177] : memref<1x4x10x34xbf16, #tpu.memory_space<vmem>>, vector<1x4x1x34xbf16>
    %304 = vector.shape_cast %303 : vector<1x4x1x34xbf16> to vector<4x34xbf16>
    %c0_178 = arith.constant 0 : index
    %c0_179 = arith.constant 0 : index
    %c5_180 = arith.constant 5 : index
    %c0_181 = arith.constant 0 : index
    %305 = vector.load %arg2[%c0_178, %c0_179, %c5_180, %c0_181] : memref<1x4x10x34xbf16, #tpu.memory_space<vmem>>, vector<1x4x1x34xbf16>
    %306 = vector.shape_cast %305 : vector<1x4x1x34xbf16> to vector<4x34xbf16>
    %c0_182 = arith.constant 0 : index
    %c0_183 = arith.constant 0 : index
    %c6_184 = arith.constant 6 : index
    %c0_185 = arith.constant 0 : index
    %307 = vector.load %arg2[%c0_182, %c0_183, %c6_184, %c0_185] : memref<1x4x10x34xbf16, #tpu.memory_space<vmem>>, vector<1x4x1x34xbf16>
    %308 = vector.shape_cast %307 : vector<1x4x1x34xbf16> to vector<4x34xbf16>
    %cst_186 = arith.constant 0.000000e+00 : f32
    %309 = vector.broadcast %cst_186 : f32 to vector<8x32xf32>
    %310 = vector.extract_strided_slice %304 {offsets = [0, 0], sizes = [4, 32], strides = [1, 1]} : vector<4x34xbf16> to vector<4x32xbf16>
    %cst_187 = arith.constant dense<0.000000e+00> : vector<8x32xf32>
    %311 = tpu.matmul %4, %310, %cst_187 {dimension_numbers = #tpu.dot_dimension_numbers<[1], [0], [0], [1], [0, 0, 1, 1], [], []>} : vector<8x4xbf16>, vector<4x32xbf16>, vector<8x32xf32> -> vector<8x32xf32>
    %312 = arith.addf %309, %311 : vector<8x32xf32>
    %313 = vector.extract_strided_slice %304 {offsets = [0, 1], sizes = [4, 32], strides = [1, 1]} : vector<4x34xbf16> to vector<4x32xbf16>
    %cst_188 = arith.constant dense<0.000000e+00> : vector<8x32xf32>
    %314 = tpu.matmul %6, %313, %cst_188 {dimension_numbers = #tpu.dot_dimension_numbers<[1], [0], [0], [1], [0, 0, 1, 1], [], []>} : vector<8x4xbf16>, vector<4x32xbf16>, vector<8x32xf32> -> vector<8x32xf32>
    %315 = arith.addf %312, %314 : vector<8x32xf32>
    %316 = vector.extract_strided_slice %304 {offsets = [0, 2], sizes = [4, 32], strides = [1, 1]} : vector<4x34xbf16> to vector<4x32xbf16>
    %cst_189 = arith.constant dense<0.000000e+00> : vector<8x32xf32>
    %317 = tpu.matmul %8, %316, %cst_189 {dimension_numbers = #tpu.dot_dimension_numbers<[1], [0], [0], [1], [0, 0, 1, 1], [], []>} : vector<8x4xbf16>, vector<4x32xbf16>, vector<8x32xf32> -> vector<8x32xf32>
    %318 = arith.addf %315, %317 : vector<8x32xf32>
    %319 = vector.extract_strided_slice %306 {offsets = [0, 0], sizes = [4, 32], strides = [1, 1]} : vector<4x34xbf16> to vector<4x32xbf16>
    %cst_190 = arith.constant dense<0.000000e+00> : vector<8x32xf32>
    %320 = tpu.matmul %10, %319, %cst_190 {dimension_numbers = #tpu.dot_dimension_numbers<[1], [0], [0], [1], [0, 0, 1, 1], [], []>} : vector<8x4xbf16>, vector<4x32xbf16>, vector<8x32xf32> -> vector<8x32xf32>
    %321 = arith.addf %318, %320 : vector<8x32xf32>
    %322 = vector.extract_strided_slice %306 {offsets = [0, 1], sizes = [4, 32], strides = [1, 1]} : vector<4x34xbf16> to vector<4x32xbf16>
    %cst_191 = arith.constant dense<0.000000e+00> : vector<8x32xf32>
    %323 = tpu.matmul %12, %322, %cst_191 {dimension_numbers = #tpu.dot_dimension_numbers<[1], [0], [0], [1], [0, 0, 1, 1], [], []>} : vector<8x4xbf16>, vector<4x32xbf16>, vector<8x32xf32> -> vector<8x32xf32>
    %324 = arith.addf %321, %323 : vector<8x32xf32>
    %325 = vector.extract_strided_slice %306 {offsets = [0, 2], sizes = [4, 32], strides = [1, 1]} : vector<4x34xbf16> to vector<4x32xbf16>
    %cst_192 = arith.constant dense<0.000000e+00> : vector<8x32xf32>
    %326 = tpu.matmul %14, %325, %cst_192 {dimension_numbers = #tpu.dot_dimension_numbers<[1], [0], [0], [1], [0, 0, 1, 1], [], []>} : vector<8x4xbf16>, vector<4x32xbf16>, vector<8x32xf32> -> vector<8x32xf32>
    %327 = arith.addf %324, %326 : vector<8x32xf32>
    %cst_193 = arith.constant dense<0.000000e+00> : vector<8xf32>
    %328 = vector.multi_reduction <add>, %327, %cst_193 [1] : vector<8x32xf32> to vector<8xf32>
    %329 = vector.shape_cast %328 : vector<8xf32> to vector<8x1xf32>
    %330 = arith.addf %293, %329 : vector<8x1xf32>
    %331 = arith.mulf %327, %327 : vector<8x32xf32>
    %cst_194 = arith.constant dense<0.000000e+00> : vector<8xf32>
    %332 = vector.multi_reduction <add>, %331, %cst_194 [1] : vector<8x32xf32> to vector<8xf32>
    %333 = vector.shape_cast %332 : vector<8xf32> to vector<8x1xf32>
    %334 = arith.addf %297, %333 : vector<8x1xf32>
    %c4_i32 = arith.constant 4 : i32
    %335 = arith.addi %28, %c4_i32 : i32
    %c0_195 = arith.constant 0 : index
    %c0_196 = arith.constant 0 : index
    %336 = arith.index_cast %335 : i32 to index
    %c0_197 = arith.constant 0 : index
    %337 = vector.load %arg6[%c0_195, %c0_196, %336, %c0_197] : memref<1x8x16x64xf32, #tpu.memory_space<vmem>>, vector<1x8x1x32xf32>
    %338 = vector.shape_cast %337 : vector<1x8x1x32xf32> to vector<8x32xf32>
    %339 = vector.shape_cast %327 : vector<8x32xf32> to vector<1x8x1x32xf32>
    tpu.vector_store %arg6[%c0_195, %c0_196, %336, %c0_197], %339 {strides = array<i32>} : memref<1x8x16x64xf32, #tpu.memory_space<vmem>>, vector<1x8x1x32xf32>,
    %cst_198 = arith.constant 0.000000e+00 : f32
    %340 = vector.broadcast %cst_198 : f32 to vector<8x32xf32>
    %341 = vector.extract_strided_slice %306 {offsets = [0, 0], sizes = [4, 32], strides = [1, 1]} : vector<4x34xbf16> to vector<4x32xbf16>
    %cst_199 = arith.constant dense<0.000000e+00> : vector<8x32xf32>
    %342 = tpu.matmul %16, %341, %cst_199 {dimension_numbers = #tpu.dot_dimension_numbers<[1], [0], [0], [1], [0, 0, 1, 1], [], []>} : vector<8x4xbf16>, vector<4x32xbf16>, vector<8x32xf32> -> vector<8x32xf32>
    %343 = arith.addf %340, %342 : vector<8x32xf32>
    %344 = vector.extract_strided_slice %306 {offsets = [0, 1], sizes = [4, 32], strides = [1, 1]} : vector<4x34xbf16> to vector<4x32xbf16>
    %cst_200 = arith.constant dense<0.000000e+00> : vector<8x32xf32>
    %345 = tpu.matmul %18, %344, %cst_200 {dimension_numbers = #tpu.dot_dimension_numbers<[1], [0], [0], [1], [0, 0, 1, 1], [], []>} : vector<8x4xbf16>, vector<4x32xbf16>, vector<8x32xf32> -> vector<8x32xf32>
    %346 = arith.addf %343, %345 : vector<8x32xf32>
    %347 = vector.extract_strided_slice %306 {offsets = [0, 2], sizes = [4, 32], strides = [1, 1]} : vector<4x34xbf16> to vector<4x32xbf16>
    %cst_201 = arith.constant dense<0.000000e+00> : vector<8x32xf32>
    %348 = tpu.matmul %20, %347, %cst_201 {dimension_numbers = #tpu.dot_dimension_numbers<[1], [0], [0], [1], [0, 0, 1, 1], [], []>} : vector<8x4xbf16>, vector<4x32xbf16>, vector<8x32xf32> -> vector<8x32xf32>
    %349 = arith.addf %346, %348 : vector<8x32xf32>
    %350 = vector.extract_strided_slice %308 {offsets = [0, 0], sizes = [4, 32], strides = [1, 1]} : vector<4x34xbf16> to vector<4x32xbf16>
    %cst_202 = arith.constant dense<0.000000e+00> : vector<8x32xf32>
    %351 = tpu.matmul %22, %350, %cst_202 {dimension_numbers = #tpu.dot_dimension_numbers<[1], [0], [0], [1], [0, 0, 1, 1], [], []>} : vector<8x4xbf16>, vector<4x32xbf16>, vector<8x32xf32> -> vector<8x32xf32>
    %352 = arith.addf %349, %351 : vector<8x32xf32>
    %353 = vector.extract_strided_slice %308 {offsets = [0, 1], sizes = [4, 32], strides = [1, 1]} : vector<4x34xbf16> to vector<4x32xbf16>
    %cst_203 = arith.constant dense<0.000000e+00> : vector<8x32xf32>
    %354 = tpu.matmul %24, %353, %cst_203 {dimension_numbers = #tpu.dot_dimension_numbers<[1], [0], [0], [1], [0, 0, 1, 1], [], []>} : vector<8x4xbf16>, vector<4x32xbf16>, vector<8x32xf32> -> vector<8x32xf32>
    %355 = arith.addf %352, %354 : vector<8x32xf32>
    %356 = vector.extract_strided_slice %308 {offsets = [0, 2], sizes = [4, 32], strides = [1, 1]} : vector<4x34xbf16> to vector<4x32xbf16>
    %cst_204 = arith.constant dense<0.000000e+00> : vector<8x32xf32>
    %357 = tpu.matmul %26, %356, %cst_204 {dimension_numbers = #tpu.dot_dimension_numbers<[1], [0], [0], [1], [0, 0, 1, 1], [], []>} : vector<8x4xbf16>, vector<4x32xbf16>, vector<8x32xf32> -> vector<8x32xf32>
    %358 = arith.addf %355, %357 : vector<8x32xf32>
    %cst_205 = arith.constant dense<0.000000e+00> : vector<8xf32>
    %359 = vector.multi_reduction <add>, %358, %cst_205 [1] : vector<8x32xf32> to vector<8xf32>
    %360 = vector.shape_cast %359 : vector<8xf32> to vector<8x1xf32>
    %361 = arith.addf %330, %360 : vector<8x1xf32>
    %362 = arith.mulf %358, %358 : vector<8x32xf32>
    %cst_206 = arith.constant dense<0.000000e+00> : vector<8xf32>
    %363 = vector.multi_reduction <add>, %362, %cst_206 [1] : vector<8x32xf32> to vector<8xf32>
    %364 = vector.shape_cast %363 : vector<8xf32> to vector<8x1xf32>
    %365 = arith.addf %334, %364 : vector<8x1xf32>
    %c4_i32_207 = arith.constant 4 : i32
    %366 = arith.addi %28, %c4_i32_207 : i32
    %c0_208 = arith.constant 0 : index
    %c0_209 = arith.constant 0 : index
    %367 = arith.index_cast %366 : i32 to index
    %c32_210 = arith.constant 32 : index
    %368 = vector.load %arg6[%c0_208, %c0_209, %367, %c32_210] : memref<1x8x16x64xf32, #tpu.memory_space<vmem>>, vector<1x8x1x32xf32>
    %369 = vector.shape_cast %368 : vector<1x8x1x32xf32> to vector<8x32xf32>
    %370 = vector.shape_cast %358 : vector<8x32xf32> to vector<1x8x1x32xf32>
    tpu.vector_store %arg6[%c0_208, %c0_209, %367, %c32_210], %370 {strides = array<i32>} : memref<1x8x16x64xf32, #tpu.memory_space<vmem>>, vector<1x8x1x32xf32>,
    %c0_211 = arith.constant 0 : index
    %c0_212 = arith.constant 0 : index
    %c5_213 = arith.constant 5 : index
    %c0_214 = arith.constant 0 : index
    %371 = vector.load %arg2[%c0_211, %c0_212, %c5_213, %c0_214] : memref<1x4x10x34xbf16, #tpu.memory_space<vmem>>, vector<1x4x1x34xbf16>
    %372 = vector.shape_cast %371 : vector<1x4x1x34xbf16> to vector<4x34xbf16>
    %c0_215 = arith.constant 0 : index
    %c0_216 = arith.constant 0 : index
    %c6_217 = arith.constant 6 : index
    %c0_218 = arith.constant 0 : index
    %373 = vector.load %arg2[%c0_215, %c0_216, %c6_217, %c0_218] : memref<1x4x10x34xbf16, #tpu.memory_space<vmem>>, vector<1x4x1x34xbf16>
    %374 = vector.shape_cast %373 : vector<1x4x1x34xbf16> to vector<4x34xbf16>
    %c0_219 = arith.constant 0 : index
    %c0_220 = arith.constant 0 : index
    %c7_221 = arith.constant 7 : index
    %c0_222 = arith.constant 0 : index
    %375 = vector.load %arg2[%c0_219, %c0_220, %c7_221, %c0_222] : memref<1x4x10x34xbf16, #tpu.memory_space<vmem>>, vector<1x4x1x34xbf16>
    %376 = vector.shape_cast %375 : vector<1x4x1x34xbf16> to vector<4x34xbf16>
    %cst_223 = arith.constant 0.000000e+00 : f32
    %377 = vector.broadcast %cst_223 : f32 to vector<8x32xf32>
    %378 = vector.extract_strided_slice %372 {offsets = [0, 0], sizes = [4, 32], strides = [1, 1]} : vector<4x34xbf16> to vector<4x32xbf16>
    %cst_224 = arith.constant dense<0.000000e+00> : vector<8x32xf32>
    %379 = tpu.matmul %4, %378, %cst_224 {dimension_numbers = #tpu.dot_dimension_numbers<[1], [0], [0], [1], [0, 0, 1, 1], [], []>} : vector<8x4xbf16>, vector<4x32xbf16>, vector<8x32xf32> -> vector<8x32xf32>
    %380 = arith.addf %377, %379 : vector<8x32xf32>
    %381 = vector.extract_strided_slice %372 {offsets = [0, 1], sizes = [4, 32], strides = [1, 1]} : vector<4x34xbf16> to vector<4x32xbf16>
    %cst_225 = arith.constant dense<0.000000e+00> : vector<8x32xf32>
    %382 = tpu.matmul %6, %381, %cst_225 {dimension_numbers = #tpu.dot_dimension_numbers<[1], [0], [0], [1], [0, 0, 1, 1], [], []>} : vector<8x4xbf16>, vector<4x32xbf16>, vector<8x32xf32> -> vector<8x32xf32>
    %383 = arith.addf %380, %382 : vector<8x32xf32>
    %384 = vector.extract_strided_slice %372 {offsets = [0, 2], sizes = [4, 32], strides = [1, 1]} : vector<4x34xbf16> to vector<4x32xbf16>
    %cst_226 = arith.constant dense<0.000000e+00> : vector<8x32xf32>
    %385 = tpu.matmul %8, %384, %cst_226 {dimension_numbers = #tpu.dot_dimension_numbers<[1], [0], [0], [1], [0, 0, 1, 1], [], []>} : vector<8x4xbf16>, vector<4x32xbf16>, vector<8x32xf32> -> vector<8x32xf32>
    %386 = arith.addf %383, %385 : vector<8x32xf32>
    %387 = vector.extract_strided_slice %374 {offsets = [0, 0], sizes = [4, 32], strides = [1, 1]} : vector<4x34xbf16> to vector<4x32xbf16>
    %cst_227 = arith.constant dense<0.000000e+00> : vector<8x32xf32>
    %388 = tpu.matmul %10, %387, %cst_227 {dimension_numbers = #tpu.dot_dimension_numbers<[1], [0], [0], [1], [0, 0, 1, 1], [], []>} : vector<8x4xbf16>, vector<4x32xbf16>, vector<8x32xf32> -> vector<8x32xf32>
    %389 = arith.addf %386, %388 : vector<8x32xf32>
    %390 = vector.extract_strided_slice %374 {offsets = [0, 1], sizes = [4, 32], strides = [1, 1]} : vector<4x34xbf16> to vector<4x32xbf16>
    %cst_228 = arith.constant dense<0.000000e+00> : vector<8x32xf32>
    %391 = tpu.matmul %12, %390, %cst_228 {dimension_numbers = #tpu.dot_dimension_numbers<[1], [0], [0], [1], [0, 0, 1, 1], [], []>} : vector<8x4xbf16>, vector<4x32xbf16>, vector<8x32xf32> -> vector<8x32xf32>
    %392 = arith.addf %389, %391 : vector<8x32xf32>
    %393 = vector.extract_strided_slice %374 {offsets = [0, 2], sizes = [4, 32], strides = [1, 1]} : vector<4x34xbf16> to vector<4x32xbf16>
    %cst_229 = arith.constant dense<0.000000e+00> : vector<8x32xf32>
    %394 = tpu.matmul %14, %393, %cst_229 {dimension_numbers = #tpu.dot_dimension_numbers<[1], [0], [0], [1], [0, 0, 1, 1], [], []>} : vector<8x4xbf16>, vector<4x32xbf16>, vector<8x32xf32> -> vector<8x32xf32>
    %395 = arith.addf %392, %394 : vector<8x32xf32>
    %cst_230 = arith.constant dense<0.000000e+00> : vector<8xf32>
    %396 = vector.multi_reduction <add>, %395, %cst_230 [1] : vector<8x32xf32> to vector<8xf32>
    %397 = vector.shape_cast %396 : vector<8xf32> to vector<8x1xf32>
    %398 = arith.addf %361, %397 : vector<8x1xf32>
    %399 = arith.mulf %395, %395 : vector<8x32xf32>
    %cst_231 = arith.constant dense<0.000000e+00> : vector<8xf32>
    %400 = vector.multi_reduction <add>, %399, %cst_231 [1] : vector<8x32xf32> to vector<8xf32>
    %401 = vector.shape_cast %400 : vector<8xf32> to vector<8x1xf32>
    %402 = arith.addf %365, %401 : vector<8x1xf32>
    %c5_i32 = arith.constant 5 : i32
    %403 = arith.addi %28, %c5_i32 : i32
    %c0_232 = arith.constant 0 : index
    %c0_233 = arith.constant 0 : index
    %404 = arith.index_cast %403 : i32 to index
    %c0_234 = arith.constant 0 : index
    %405 = vector.load %arg6[%c0_232, %c0_233, %404, %c0_234] : memref<1x8x16x64xf32, #tpu.memory_space<vmem>>, vector<1x8x1x32xf32>
    %406 = vector.shape_cast %405 : vector<1x8x1x32xf32> to vector<8x32xf32>
    %407 = vector.shape_cast %395 : vector<8x32xf32> to vector<1x8x1x32xf32>
    tpu.vector_store %arg6[%c0_232, %c0_233, %404, %c0_234], %407 {strides = array<i32>} : memref<1x8x16x64xf32, #tpu.memory_space<vmem>>, vector<1x8x1x32xf32>,
    %cst_235 = arith.constant 0.000000e+00 : f32
    %408 = vector.broadcast %cst_235 : f32 to vector<8x32xf32>
    %409 = vector.extract_strided_slice %374 {offsets = [0, 0], sizes = [4, 32], strides = [1, 1]} : vector<4x34xbf16> to vector<4x32xbf16>
    %cst_236 = arith.constant dense<0.000000e+00> : vector<8x32xf32>
    %410 = tpu.matmul %16, %409, %cst_236 {dimension_numbers = #tpu.dot_dimension_numbers<[1], [0], [0], [1], [0, 0, 1, 1], [], []>} : vector<8x4xbf16>, vector<4x32xbf16>, vector<8x32xf32> -> vector<8x32xf32>
    %411 = arith.addf %408, %410 : vector<8x32xf32>
    %412 = vector.extract_strided_slice %374 {offsets = [0, 1], sizes = [4, 32], strides = [1, 1]} : vector<4x34xbf16> to vector<4x32xbf16>
    %cst_237 = arith.constant dense<0.000000e+00> : vector<8x32xf32>
    %413 = tpu.matmul %18, %412, %cst_237 {dimension_numbers = #tpu.dot_dimension_numbers<[1], [0], [0], [1], [0, 0, 1, 1], [], []>} : vector<8x4xbf16>, vector<4x32xbf16>, vector<8x32xf32> -> vector<8x32xf32>
    %414 = arith.addf %411, %413 : vector<8x32xf32>
    %415 = vector.extract_strided_slice %374 {offsets = [0, 2], sizes = [4, 32], strides = [1, 1]} : vector<4x34xbf16> to vector<4x32xbf16>
    %cst_238 = arith.constant dense<0.000000e+00> : vector<8x32xf32>
    %416 = tpu.matmul %20, %415, %cst_238 {dimension_numbers = #tpu.dot_dimension_numbers<[1], [0], [0], [1], [0, 0, 1, 1], [], []>} : vector<8x4xbf16>, vector<4x32xbf16>, vector<8x32xf32> -> vector<8x32xf32>
    %417 = arith.addf %414, %416 : vector<8x32xf32>
    %418 = vector.extract_strided_slice %376 {offsets = [0, 0], sizes = [4, 32], strides = [1, 1]} : vector<4x34xbf16> to vector<4x32xbf16>
    %cst_239 = arith.constant dense<0.000000e+00> : vector<8x32xf32>
    %419 = tpu.matmul %22, %418, %cst_239 {dimension_numbers = #tpu.dot_dimension_numbers<[1], [0], [0], [1], [0, 0, 1, 1], [], []>} : vector<8x4xbf16>, vector<4x32xbf16>, vector<8x32xf32> -> vector<8x32xf32>
    %420 = arith.addf %417, %419 : vector<8x32xf32>
    %421 = vector.extract_strided_slice %376 {offsets = [0, 1], sizes = [4, 32], strides = [1, 1]} : vector<4x34xbf16> to vector<4x32xbf16>
    %cst_240 = arith.constant dense<0.000000e+00> : vector<8x32xf32>
    %422 = tpu.matmul %24, %421, %cst_240 {dimension_numbers = #tpu.dot_dimension_numbers<[1], [0], [0], [1], [0, 0, 1, 1], [], []>} : vector<8x4xbf16>, vector<4x32xbf16>, vector<8x32xf32> -> vector<8x32xf32>
    %423 = arith.addf %420, %422 : vector<8x32xf32>
    %424 = vector.extract_strided_slice %376 {offsets = [0, 2], sizes = [4, 32], strides = [1, 1]} : vector<4x34xbf16> to vector<4x32xbf16>
    %cst_241 = arith.constant dense<0.000000e+00> : vector<8x32xf32>
    %425 = tpu.matmul %26, %424, %cst_241 {dimension_numbers = #tpu.dot_dimension_numbers<[1], [0], [0], [1], [0, 0, 1, 1], [], []>} : vector<8x4xbf16>, vector<4x32xbf16>, vector<8x32xf32> -> vector<8x32xf32>
    %426 = arith.addf %423, %425 : vector<8x32xf32>
    %cst_242 = arith.constant dense<0.000000e+00> : vector<8xf32>
    %427 = vector.multi_reduction <add>, %426, %cst_242 [1] : vector<8x32xf32> to vector<8xf32>
    %428 = vector.shape_cast %427 : vector<8xf32> to vector<8x1xf32>
    %429 = arith.addf %398, %428 : vector<8x1xf32>
    %430 = arith.mulf %426, %426 : vector<8x32xf32>
    %cst_243 = arith.constant dense<0.000000e+00> : vector<8xf32>
    %431 = vector.multi_reduction <add>, %430, %cst_243 [1] : vector<8x32xf32> to vector<8xf32>
    %432 = vector.shape_cast %431 : vector<8xf32> to vector<8x1xf32>
    %433 = arith.addf %402, %432 : vector<8x1xf32>
    %c5_i32_244 = arith.constant 5 : i32
    %434 = arith.addi %28, %c5_i32_244 : i32
    %c0_245 = arith.constant 0 : index
    %c0_246 = arith.constant 0 : index
    %435 = arith.index_cast %434 : i32 to index
    %c32_247 = arith.constant 32 : index
    %436 = vector.load %arg6[%c0_245, %c0_246, %435, %c32_247] : memref<1x8x16x64xf32, #tpu.memory_space<vmem>>, vector<1x8x1x32xf32>
    %437 = vector.shape_cast %436 : vector<1x8x1x32xf32> to vector<8x32xf32>
    %438 = vector.shape_cast %426 : vector<8x32xf32> to vector<1x8x1x32xf32>
    tpu.vector_store %arg6[%c0_245, %c0_246, %435, %c32_247], %438 {strides = array<i32>} : memref<1x8x16x64xf32, #tpu.memory_space<vmem>>, vector<1x8x1x32xf32>,
    %c0_248 = arith.constant 0 : index
    %c0_249 = arith.constant 0 : index
    %c6_250 = arith.constant 6 : index
    %c0_251 = arith.constant 0 : index
    %439 = vector.load %arg2[%c0_248, %c0_249, %c6_250, %c0_251] : memref<1x4x10x34xbf16, #tpu.memory_space<vmem>>, vector<1x4x1x34xbf16>
    %440 = vector.shape_cast %439 : vector<1x4x1x34xbf16> to vector<4x34xbf16>
    %c0_252 = arith.constant 0 : index
    %c0_253 = arith.constant 0 : index
    %c7_254 = arith.constant 7 : index
    %c0_255 = arith.constant 0 : index
    %441 = vector.load %arg2[%c0_252, %c0_253, %c7_254, %c0_255] : memref<1x4x10x34xbf16, #tpu.memory_space<vmem>>, vector<1x4x1x34xbf16>
    %442 = vector.shape_cast %441 : vector<1x4x1x34xbf16> to vector<4x34xbf16>
    %c0_256 = arith.constant 0 : index
    %c0_257 = arith.constant 0 : index
    %c8_258 = arith.constant 8 : index
    %c0_259 = arith.constant 0 : index
    %443 = vector.load %arg2[%c0_256, %c0_257, %c8_258, %c0_259] : memref<1x4x10x34xbf16, #tpu.memory_space<vmem>>, vector<1x4x1x34xbf16>
    %444 = vector.shape_cast %443 : vector<1x4x1x34xbf16> to vector<4x34xbf16>
    %cst_260 = arith.constant 0.000000e+00 : f32
    %445 = vector.broadcast %cst_260 : f32 to vector<8x32xf32>
    %446 = vector.extract_strided_slice %440 {offsets = [0, 0], sizes = [4, 32], strides = [1, 1]} : vector<4x34xbf16> to vector<4x32xbf16>
    %cst_261 = arith.constant dense<0.000000e+00> : vector<8x32xf32>
    %447 = tpu.matmul %4, %446, %cst_261 {dimension_numbers = #tpu.dot_dimension_numbers<[1], [0], [0], [1], [0, 0, 1, 1], [], []>} : vector<8x4xbf16>, vector<4x32xbf16>, vector<8x32xf32> -> vector<8x32xf32>
    %448 = arith.addf %445, %447 : vector<8x32xf32>
    %449 = vector.extract_strided_slice %440 {offsets = [0, 1], sizes = [4, 32], strides = [1, 1]} : vector<4x34xbf16> to vector<4x32xbf16>
    %cst_262 = arith.constant dense<0.000000e+00> : vector<8x32xf32>
    %450 = tpu.matmul %6, %449, %cst_262 {dimension_numbers = #tpu.dot_dimension_numbers<[1], [0], [0], [1], [0, 0, 1, 1], [], []>} : vector<8x4xbf16>, vector<4x32xbf16>, vector<8x32xf32> -> vector<8x32xf32>
    %451 = arith.addf %448, %450 : vector<8x32xf32>
    %452 = vector.extract_strided_slice %440 {offsets = [0, 2], sizes = [4, 32], strides = [1, 1]} : vector<4x34xbf16> to vector<4x32xbf16>
    %cst_263 = arith.constant dense<0.000000e+00> : vector<8x32xf32>
    %453 = tpu.matmul %8, %452, %cst_263 {dimension_numbers = #tpu.dot_dimension_numbers<[1], [0], [0], [1], [0, 0, 1, 1], [], []>} : vector<8x4xbf16>, vector<4x32xbf16>, vector<8x32xf32> -> vector<8x32xf32>
    %454 = arith.addf %451, %453 : vector<8x32xf32>
    %455 = vector.extract_strided_slice %442 {offsets = [0, 0], sizes = [4, 32], strides = [1, 1]} : vector<4x34xbf16> to vector<4x32xbf16>
    %cst_264 = arith.constant dense<0.000000e+00> : vector<8x32xf32>
    %456 = tpu.matmul %10, %455, %cst_264 {dimension_numbers = #tpu.dot_dimension_numbers<[1], [0], [0], [1], [0, 0, 1, 1], [], []>} : vector<8x4xbf16>, vector<4x32xbf16>, vector<8x32xf32> -> vector<8x32xf32>
    %457 = arith.addf %454, %456 : vector<8x32xf32>
    %458 = vector.extract_strided_slice %442 {offsets = [0, 1], sizes = [4, 32], strides = [1, 1]} : vector<4x34xbf16> to vector<4x32xbf16>
    %cst_265 = arith.constant dense<0.000000e+00> : vector<8x32xf32>
    %459 = tpu.matmul %12, %458, %cst_265 {dimension_numbers = #tpu.dot_dimension_numbers<[1], [0], [0], [1], [0, 0, 1, 1], [], []>} : vector<8x4xbf16>, vector<4x32xbf16>, vector<8x32xf32> -> vector<8x32xf32>
    %460 = arith.addf %457, %459 : vector<8x32xf32>
    %461 = vector.extract_strided_slice %442 {offsets = [0, 2], sizes = [4, 32], strides = [1, 1]} : vector<4x34xbf16> to vector<4x32xbf16>
    %cst_266 = arith.constant dense<0.000000e+00> : vector<8x32xf32>
    %462 = tpu.matmul %14, %461, %cst_266 {dimension_numbers = #tpu.dot_dimension_numbers<[1], [0], [0], [1], [0, 0, 1, 1], [], []>} : vector<8x4xbf16>, vector<4x32xbf16>, vector<8x32xf32> -> vector<8x32xf32>
    %463 = arith.addf %460, %462 : vector<8x32xf32>
    %cst_267 = arith.constant dense<0.000000e+00> : vector<8xf32>
    %464 = vector.multi_reduction <add>, %463, %cst_267 [1] : vector<8x32xf32> to vector<8xf32>
    %465 = vector.shape_cast %464 : vector<8xf32> to vector<8x1xf32>
    %466 = arith.addf %429, %465 : vector<8x1xf32>
    %467 = arith.mulf %463, %463 : vector<8x32xf32>
    %cst_268 = arith.constant dense<0.000000e+00> : vector<8xf32>
    %468 = vector.multi_reduction <add>, %467, %cst_268 [1] : vector<8x32xf32> to vector<8xf32>
    %469 = vector.shape_cast %468 : vector<8xf32> to vector<8x1xf32>
    %470 = arith.addf %433, %469 : vector<8x1xf32>
    %c6_i32 = arith.constant 6 : i32
    %471 = arith.addi %28, %c6_i32 : i32
    %c0_269 = arith.constant 0 : index
    %c0_270 = arith.constant 0 : index
    %472 = arith.index_cast %471 : i32 to index
    %c0_271 = arith.constant 0 : index
    %473 = vector.load %arg6[%c0_269, %c0_270, %472, %c0_271] : memref<1x8x16x64xf32, #tpu.memory_space<vmem>>, vector<1x8x1x32xf32>
    %474 = vector.shape_cast %473 : vector<1x8x1x32xf32> to vector<8x32xf32>
    %475 = vector.shape_cast %463 : vector<8x32xf32> to vector<1x8x1x32xf32>
    tpu.vector_store %arg6[%c0_269, %c0_270, %472, %c0_271], %475 {strides = array<i32>} : memref<1x8x16x64xf32, #tpu.memory_space<vmem>>, vector<1x8x1x32xf32>,
    %cst_272 = arith.constant 0.000000e+00 : f32
    %476 = vector.broadcast %cst_272 : f32 to vector<8x32xf32>
    %477 = vector.extract_strided_slice %442 {offsets = [0, 0], sizes = [4, 32], strides = [1, 1]} : vector<4x34xbf16> to vector<4x32xbf16>
    %cst_273 = arith.constant dense<0.000000e+00> : vector<8x32xf32>
    %478 = tpu.matmul %16, %477, %cst_273 {dimension_numbers = #tpu.dot_dimension_numbers<[1], [0], [0], [1], [0, 0, 1, 1], [], []>} : vector<8x4xbf16>, vector<4x32xbf16>, vector<8x32xf32> -> vector<8x32xf32>
    %479 = arith.addf %476, %478 : vector<8x32xf32>
    %480 = vector.extract_strided_slice %442 {offsets = [0, 1], sizes = [4, 32], strides = [1, 1]} : vector<4x34xbf16> to vector<4x32xbf16>
    %cst_274 = arith.constant dense<0.000000e+00> : vector<8x32xf32>
    %481 = tpu.matmul %18, %480, %cst_274 {dimension_numbers = #tpu.dot_dimension_numbers<[1], [0], [0], [1], [0, 0, 1, 1], [], []>} : vector<8x4xbf16>, vector<4x32xbf16>, vector<8x32xf32> -> vector<8x32xf32>
    %482 = arith.addf %479, %481 : vector<8x32xf32>
    %483 = vector.extract_strided_slice %442 {offsets = [0, 2], sizes = [4, 32], strides = [1, 1]} : vector<4x34xbf16> to vector<4x32xbf16>
    %cst_275 = arith.constant dense<0.000000e+00> : vector<8x32xf32>
    %484 = tpu.matmul %20, %483, %cst_275 {dimension_numbers = #tpu.dot_dimension_numbers<[1], [0], [0], [1], [0, 0, 1, 1], [], []>} : vector<8x4xbf16>, vector<4x32xbf16>, vector<8x32xf32> -> vector<8x32xf32>
    %485 = arith.addf %482, %484 : vector<8x32xf32>
    %486 = vector.extract_strided_slice %444 {offsets = [0, 0], sizes = [4, 32], strides = [1, 1]} : vector<4x34xbf16> to vector<4x32xbf16>
    %cst_276 = arith.constant dense<0.000000e+00> : vector<8x32xf32>
    %487 = tpu.matmul %22, %486, %cst_276 {dimension_numbers = #tpu.dot_dimension_numbers<[1], [0], [0], [1], [0, 0, 1, 1], [], []>} : vector<8x4xbf16>, vector<4x32xbf16>, vector<8x32xf32> -> vector<8x32xf32>
    %488 = arith.addf %485, %487 : vector<8x32xf32>
    %489 = vector.extract_strided_slice %444 {offsets = [0, 1], sizes = [4, 32], strides = [1, 1]} : vector<4x34xbf16> to vector<4x32xbf16>
    %cst_277 = arith.constant dense<0.000000e+00> : vector<8x32xf32>
    %490 = tpu.matmul %24, %489, %cst_277 {dimension_numbers = #tpu.dot_dimension_numbers<[1], [0], [0], [1], [0, 0, 1, 1], [], []>} : vector<8x4xbf16>, vector<4x32xbf16>, vector<8x32xf32> -> vector<8x32xf32>
    %491 = arith.addf %488, %490 : vector<8x32xf32>
    %492 = vector.extract_strided_slice %444 {offsets = [0, 2], sizes = [4, 32], strides = [1, 1]} : vector<4x34xbf16> to vector<4x32xbf16>
    %cst_278 = arith.constant dense<0.000000e+00> : vector<8x32xf32>
    %493 = tpu.matmul %26, %492, %cst_278 {dimension_numbers = #tpu.dot_dimension_numbers<[1], [0], [0], [1], [0, 0, 1, 1], [], []>} : vector<8x4xbf16>, vector<4x32xbf16>, vector<8x32xf32> -> vector<8x32xf32>
    %494 = arith.addf %491, %493 : vector<8x32xf32>
    %cst_279 = arith.constant dense<0.000000e+00> : vector<8xf32>
    %495 = vector.multi_reduction <add>, %494, %cst_279 [1] : vector<8x32xf32> to vector<8xf32>
    %496 = vector.shape_cast %495 : vector<8xf32> to vector<8x1xf32>
    %497 = arith.addf %466, %496 : vector<8x1xf32>
    %498 = arith.mulf %494, %494 : vector<8x32xf32>
    %cst_280 = arith.constant dense<0.000000e+00> : vector<8xf32>
    %499 = vector.multi_reduction <add>, %498, %cst_280 [1] : vector<8x32xf32> to vector<8xf32>
    %500 = vector.shape_cast %499 : vector<8xf32> to vector<8x1xf32>
    %501 = arith.addf %470, %500 : vector<8x1xf32>
    %c6_i32_281 = arith.constant 6 : i32
    %502 = arith.addi %28, %c6_i32_281 : i32
    %c0_282 = arith.constant 0 : index
    %c0_283 = arith.constant 0 : index
    %503 = arith.index_cast %502 : i32 to index
    %c32_284 = arith.constant 32 : index
    %504 = vector.load %arg6[%c0_282, %c0_283, %503, %c32_284] : memref<1x8x16x64xf32, #tpu.memory_space<vmem>>, vector<1x8x1x32xf32>
    %505 = vector.shape_cast %504 : vector<1x8x1x32xf32> to vector<8x32xf32>
    %506 = vector.shape_cast %494 : vector<8x32xf32> to vector<1x8x1x32xf32>
    tpu.vector_store %arg6[%c0_282, %c0_283, %503, %c32_284], %506 {strides = array<i32>} : memref<1x8x16x64xf32, #tpu.memory_space<vmem>>, vector<1x8x1x32xf32>,
    %c0_285 = arith.constant 0 : index
    %c0_286 = arith.constant 0 : index
    %c7_287 = arith.constant 7 : index
    %c0_288 = arith.constant 0 : index
    %507 = vector.load %arg2[%c0_285, %c0_286, %c7_287, %c0_288] : memref<1x4x10x34xbf16, #tpu.memory_space<vmem>>, vector<1x4x1x34xbf16>
    %508 = vector.shape_cast %507 : vector<1x4x1x34xbf16> to vector<4x34xbf16>
    %c0_289 = arith.constant 0 : index
    %c0_290 = arith.constant 0 : index
    %c8_291 = arith.constant 8 : index
    %c0_292 = arith.constant 0 : index
    %509 = vector.load %arg2[%c0_289, %c0_290, %c8_291, %c0_292] : memref<1x4x10x34xbf16, #tpu.memory_space<vmem>>, vector<1x4x1x34xbf16>
    %510 = vector.shape_cast %509 : vector<1x4x1x34xbf16> to vector<4x34xbf16>
    %c0_293 = arith.constant 0 : index
    %c0_294 = arith.constant 0 : index
    %c9_295 = arith.constant 9 : index
    %c0_296 = arith.constant 0 : index
    %511 = vector.load %arg2[%c0_293, %c0_294, %c9_295, %c0_296] : memref<1x4x10x34xbf16, #tpu.memory_space<vmem>>, vector<1x4x1x34xbf16>
    %512 = vector.shape_cast %511 : vector<1x4x1x34xbf16> to vector<4x34xbf16>
    %cst_297 = arith.constant 0.000000e+00 : f32
    %513 = vector.broadcast %cst_297 : f32 to vector<8x32xf32>
    %514 = vector.extract_strided_slice %508 {offsets = [0, 0], sizes = [4, 32], strides = [1, 1]} : vector<4x34xbf16> to vector<4x32xbf16>
    %cst_298 = arith.constant dense<0.000000e+00> : vector<8x32xf32>
    %515 = tpu.matmul %4, %514, %cst_298 {dimension_numbers = #tpu.dot_dimension_numbers<[1], [0], [0], [1], [0, 0, 1, 1], [], []>} : vector<8x4xbf16>, vector<4x32xbf16>, vector<8x32xf32> -> vector<8x32xf32>
    %516 = arith.addf %513, %515 : vector<8x32xf32>
    %517 = vector.extract_strided_slice %508 {offsets = [0, 1], sizes = [4, 32], strides = [1, 1]} : vector<4x34xbf16> to vector<4x32xbf16>
    %cst_299 = arith.constant dense<0.000000e+00> : vector<8x32xf32>
    %518 = tpu.matmul %6, %517, %cst_299 {dimension_numbers = #tpu.dot_dimension_numbers<[1], [0], [0], [1], [0, 0, 1, 1], [], []>} : vector<8x4xbf16>, vector<4x32xbf16>, vector<8x32xf32> -> vector<8x32xf32>
    %519 = arith.addf %516, %518 : vector<8x32xf32>
    %520 = vector.extract_strided_slice %508 {offsets = [0, 2], sizes = [4, 32], strides = [1, 1]} : vector<4x34xbf16> to vector<4x32xbf16>
    %cst_300 = arith.constant dense<0.000000e+00> : vector<8x32xf32>
    %521 = tpu.matmul %8, %520, %cst_300 {dimension_numbers = #tpu.dot_dimension_numbers<[1], [0], [0], [1], [0, 0, 1, 1], [], []>} : vector<8x4xbf16>, vector<4x32xbf16>, vector<8x32xf32> -> vector<8x32xf32>
    %522 = arith.addf %519, %521 : vector<8x32xf32>
    %523 = vector.extract_strided_slice %510 {offsets = [0, 0], sizes = [4, 32], strides = [1, 1]} : vector<4x34xbf16> to vector<4x32xbf16>
    %cst_301 = arith.constant dense<0.000000e+00> : vector<8x32xf32>
    %524 = tpu.matmul %10, %523, %cst_301 {dimension_numbers = #tpu.dot_dimension_numbers<[1], [0], [0], [1], [0, 0, 1, 1], [], []>} : vector<8x4xbf16>, vector<4x32xbf16>, vector<8x32xf32> -> vector<8x32xf32>
    %525 = arith.addf %522, %524 : vector<8x32xf32>
    %526 = vector.extract_strided_slice %510 {offsets = [0, 1], sizes = [4, 32], strides = [1, 1]} : vector<4x34xbf16> to vector<4x32xbf16>
    %cst_302 = arith.constant dense<0.000000e+00> : vector<8x32xf32>
    %527 = tpu.matmul %12, %526, %cst_302 {dimension_numbers = #tpu.dot_dimension_numbers<[1], [0], [0], [1], [0, 0, 1, 1], [], []>} : vector<8x4xbf16>, vector<4x32xbf16>, vector<8x32xf32> -> vector<8x32xf32>
    %528 = arith.addf %525, %527 : vector<8x32xf32>
    %529 = vector.extract_strided_slice %510 {offsets = [0, 2], sizes = [4, 32], strides = [1, 1]} : vector<4x34xbf16> to vector<4x32xbf16>
    %cst_303 = arith.constant dense<0.000000e+00> : vector<8x32xf32>
    %530 = tpu.matmul %14, %529, %cst_303 {dimension_numbers = #tpu.dot_dimension_numbers<[1], [0], [0], [1], [0, 0, 1, 1], [], []>} : vector<8x4xbf16>, vector<4x32xbf16>, vector<8x32xf32> -> vector<8x32xf32>
    %531 = arith.addf %528, %530 : vector<8x32xf32>
    %cst_304 = arith.constant dense<0.000000e+00> : vector<8xf32>
    %532 = vector.multi_reduction <add>, %531, %cst_304 [1] : vector<8x32xf32> to vector<8xf32>
    %533 = vector.shape_cast %532 : vector<8xf32> to vector<8x1xf32>
    %534 = arith.addf %497, %533 : vector<8x1xf32>
    %535 = arith.mulf %531, %531 : vector<8x32xf32>
    %cst_305 = arith.constant dense<0.000000e+00> : vector<8xf32>
    %536 = vector.multi_reduction <add>, %535, %cst_305 [1] : vector<8x32xf32> to vector<8xf32>
    %537 = vector.shape_cast %536 : vector<8xf32> to vector<8x1xf32>
    %538 = arith.addf %501, %537 : vector<8x1xf32>
    %c7_i32 = arith.constant 7 : i32
    %539 = arith.addi %28, %c7_i32 : i32
    %c0_306 = arith.constant 0 : index
    %c0_307 = arith.constant 0 : index
    %540 = arith.index_cast %539 : i32 to index
    %c0_308 = arith.constant 0 : index
    %541 = vector.load %arg6[%c0_306, %c0_307, %540, %c0_308] : memref<1x8x16x64xf32, #tpu.memory_space<vmem>>, vector<1x8x1x32xf32>
    %542 = vector.shape_cast %541 : vector<1x8x1x32xf32> to vector<8x32xf32>
    %543 = vector.shape_cast %531 : vector<8x32xf32> to vector<1x8x1x32xf32>
    tpu.vector_store %arg6[%c0_306, %c0_307, %540, %c0_308], %543 {strides = array<i32>} : memref<1x8x16x64xf32, #tpu.memory_space<vmem>>, vector<1x8x1x32xf32>,
    %cst_309 = arith.constant 0.000000e+00 : f32
    %544 = vector.broadcast %cst_309 : f32 to vector<8x32xf32>
    %545 = vector.extract_strided_slice %510 {offsets = [0, 0], sizes = [4, 32], strides = [1, 1]} : vector<4x34xbf16> to vector<4x32xbf16>
    %cst_310 = arith.constant dense<0.000000e+00> : vector<8x32xf32>
    %546 = tpu.matmul %16, %545, %cst_310 {dimension_numbers = #tpu.dot_dimension_numbers<[1], [0], [0], [1], [0, 0, 1, 1], [], []>} : vector<8x4xbf16>, vector<4x32xbf16>, vector<8x32xf32> -> vector<8x32xf32>
    %547 = arith.addf %544, %546 : vector<8x32xf32>
    %548 = vector.extract_strided_slice %510 {offsets = [0, 1], sizes = [4, 32], strides = [1, 1]} : vector<4x34xbf16> to vector<4x32xbf16>
    %cst_311 = arith.constant dense<0.000000e+00> : vector<8x32xf32>
    %549 = tpu.matmul %18, %548, %cst_311 {dimension_numbers = #tpu.dot_dimension_numbers<[1], [0], [0], [1], [0, 0, 1, 1], [], []>} : vector<8x4xbf16>, vector<4x32xbf16>, vector<8x32xf32> -> vector<8x32xf32>
    %550 = arith.addf %547, %549 : vector<8x32xf32>
    %551 = vector.extract_strided_slice %510 {offsets = [0, 2], sizes = [4, 32], strides = [1, 1]} : vector<4x34xbf16> to vector<4x32xbf16>
    %cst_312 = arith.constant dense<0.000000e+00> : vector<8x32xf32>
    %552 = tpu.matmul %20, %551, %cst_312 {dimension_numbers = #tpu.dot_dimension_numbers<[1], [0], [0], [1], [0, 0, 1, 1], [], []>} : vector<8x4xbf16>, vector<4x32xbf16>, vector<8x32xf32> -> vector<8x32xf32>
    %553 = arith.addf %550, %552 : vector<8x32xf32>
    %554 = vector.extract_strided_slice %512 {offsets = [0, 0], sizes = [4, 32], strides = [1, 1]} : vector<4x34xbf16> to vector<4x32xbf16>
    %cst_313 = arith.constant dense<0.000000e+00> : vector<8x32xf32>
    %555 = tpu.matmul %22, %554, %cst_313 {dimension_numbers = #tpu.dot_dimension_numbers<[1], [0], [0], [1], [0, 0, 1, 1], [], []>} : vector<8x4xbf16>, vector<4x32xbf16>, vector<8x32xf32> -> vector<8x32xf32>
    %556 = arith.addf %553, %555 : vector<8x32xf32>
    %557 = vector.extract_strided_slice %512 {offsets = [0, 1], sizes = [4, 32], strides = [1, 1]} : vector<4x34xbf16> to vector<4x32xbf16>
    %cst_314 = arith.constant dense<0.000000e+00> : vector<8x32xf32>
    %558 = tpu.matmul %24, %557, %cst_314 {dimension_numbers = #tpu.dot_dimension_numbers<[1], [0], [0], [1], [0, 0, 1, 1], [], []>} : vector<8x4xbf16>, vector<4x32xbf16>, vector<8x32xf32> -> vector<8x32xf32>
    %559 = arith.addf %556, %558 : vector<8x32xf32>
    %560 = vector.extract_strided_slice %512 {offsets = [0, 2], sizes = [4, 32], strides = [1, 1]} : vector<4x34xbf16> to vector<4x32xbf16>
    %cst_315 = arith.constant dense<0.000000e+00> : vector<8x32xf32>
    %561 = tpu.matmul %26, %560, %cst_315 {dimension_numbers = #tpu.dot_dimension_numbers<[1], [0], [0], [1], [0, 0, 1, 1], [], []>} : vector<8x4xbf16>, vector<4x32xbf16>, vector<8x32xf32> -> vector<8x32xf32>
    %562 = arith.addf %559, %561 : vector<8x32xf32>
    %cst_316 = arith.constant dense<0.000000e+00> : vector<8xf32>
    %563 = vector.multi_reduction <add>, %562, %cst_316 [1] : vector<8x32xf32> to vector<8xf32>
    %564 = vector.shape_cast %563 : vector<8xf32> to vector<8x1xf32>
    %565 = arith.addf %534, %564 : vector<8x1xf32>
    %566 = arith.mulf %562, %562 : vector<8x32xf32>
    %cst_317 = arith.constant dense<0.000000e+00> : vector<8xf32>
    %567 = vector.multi_reduction <add>, %566, %cst_317 [1] : vector<8x32xf32> to vector<8xf32>
    %568 = vector.shape_cast %567 : vector<8xf32> to vector<8x1xf32>
    %569 = arith.addf %538, %568 : vector<8x1xf32>
    %c7_i32_318 = arith.constant 7 : i32
    %570 = arith.addi %28, %c7_i32_318 : i32
    %c0_319 = arith.constant 0 : index
    %c0_320 = arith.constant 0 : index
    %571 = arith.index_cast %570 : i32 to index
    %c32_321 = arith.constant 32 : index
    %572 = vector.load %arg6[%c0_319, %c0_320, %571, %c32_321] : memref<1x8x16x64xf32, #tpu.memory_space<vmem>>, vector<1x8x1x32xf32>
    %573 = vector.shape_cast %572 : vector<1x8x1x32xf32> to vector<8x32xf32>
    %574 = vector.shape_cast %562 : vector<8x32xf32> to vector<1x8x1x32xf32>
    tpu.vector_store %arg6[%c0_319, %c0_320, %571, %c32_321], %574 {strides = array<i32>} : memref<1x8x16x64xf32, #tpu.memory_space<vmem>>, vector<1x8x1x32xf32>,
    %c0_322 = arith.constant 0 : index
    %c0_323 = arith.constant 0 : index
    %575 = vector.load %arg7[%c0_322, %c0_323] : memref<8x1xf32, #tpu.memory_space<vmem>>, vector<8x1xf32>
    %576 = arith.addf %575, %565 : vector<8x1xf32>
    %c0_324 = arith.constant 0 : index
    %c0_325 = arith.constant 0 : index
    %577 = vector.load %arg7[%c0_324, %c0_325] : memref<8x1xf32, #tpu.memory_space<vmem>>, vector<8x1xf32>
    tpu.vector_store %arg7[%c0_324, %c0_325], %576 {strides = array<i32>} : memref<8x1xf32, #tpu.memory_space<vmem>>, vector<8x1xf32>,
    %c0_326 = arith.constant 0 : index
    %c0_327 = arith.constant 0 : index
    %578 = vector.load %arg8[%c0_326, %c0_327] : memref<8x1xf32, #tpu.memory_space<vmem>>, vector<8x1xf32>
    %579 = arith.addf %578, %569 : vector<8x1xf32>
    %c0_328 = arith.constant 0 : index
    %c0_329 = arith.constant 0 : index
    %580 = vector.load %arg8[%c0_328, %c0_329] : memref<8x1xf32, #tpu.memory_space<vmem>>, vector<8x1xf32>
    tpu.vector_store %arg8[%c0_328, %c0_329], %579 {strides = array<i32>} : memref<8x1xf32, #tpu.memory_space<vmem>>, vector<8x1xf32>,
    %c1_i32_330 = arith.constant 1 : i32
    %581 = arith.cmpi eq, %arg1, %c1_i32_330 : i32
    %582 = arith.extui %581 : i1 to i32
    %c0_i32_331 = arith.constant 0 : i32
    %583 = arith.cmpi ne, %582, %c0_i32_331 : i32
    scf.if %583 {
      %c0_332 = arith.constant 0 : index
      %c0_333 = arith.constant 0 : index
      %584 = vector.load %arg7[%c0_332, %c0_333] : memref<8x1xf32, #tpu.memory_space<vmem>>, vector<8x1xf32>
      %cst_334 = arith.constant 9.765625E-4 : f32
      %585 = vector.broadcast %cst_334 : f32 to vector<8x1xf32>
      %586 = arith.mulf %584, %585 : vector<8x1xf32>
      %c0_335 = arith.constant 0 : index
      %c0_336 = arith.constant 0 : index
      %587 = vector.load %arg8[%c0_335, %c0_336] : memref<8x1xf32, #tpu.memory_space<vmem>>, vector<8x1xf32>
      %cst_337 = arith.constant 9.765625E-4 : f32
      %588 = vector.broadcast %cst_337 : f32 to vector<8x1xf32>
      %589 = arith.mulf %587, %588 : vector<8x1xf32>
      %590 = arith.mulf %586, %586 : vector<8x1xf32>
      %591 = arith.subf %589, %590 : vector<8x1xf32>
      %cst_338 = arith.constant 9.99999974E-6 : f32
      %592 = vector.broadcast %cst_338 : f32 to vector<8x1xf32>
      %593 = arith.addf %591, %592 : vector<8x1xf32>
      %594 = math.rsqrt %593 : vector<8x1xf32>
      %c0_339 = arith.constant 0 : index
      %c0_340 = arith.constant 0 : index
      %c0_341 = arith.constant 0 : index
      %595 = vector.load %arg4[%c0_339, %c0_340, %c0_341] : memref<1x8x1xf32, #tpu.memory_space<vmem>>, vector<1x8x1xf32>
      %596 = vector.shape_cast %595 : vector<1x8x1xf32> to vector<8x1xf32>
      %c0_342 = arith.constant 0 : index
      %c0_343 = arith.constant 0 : index
      %c0_344 = arith.constant 0 : index
      %597 = vector.load %arg5[%c0_342, %c0_343, %c0_344] : memref<1x8x1xf32, #tpu.memory_space<vmem>>, vector<1x8x1xf32>
      %598 = vector.shape_cast %597 : vector<1x8x1xf32> to vector<8x1xf32>
      %599 = arith.mulf %596, %594 : vector<8x1xf32>
      %600 = vector.shape_cast %599 : vector<8x1xf32> to vector<8x1x1xf32>
      %601 = arith.mulf %596, %586 : vector<8x1xf32>
      %602 = arith.mulf %601, %594 : vector<8x1xf32>
      %603 = arith.subf %598, %602 : vector<8x1xf32>
      %604 = vector.shape_cast %603 : vector<8x1xf32> to vector<8x1x1xf32>
      %c0_345 = arith.constant 0 : index
      %c0_346 = arith.constant 0 : index
      %c0_347 = arith.constant 0 : index
      %c0_348 = arith.constant 0 : index
      %605 = vector.load %arg6[%c0_345, %c0_346, %c0_347, %c0_348] : memref<1x8x16x64xf32, #tpu.memory_space<vmem>>, vector<1x8x16x64xf32>
      %606 = vector.shape_cast %605 : vector<1x8x16x64xf32> to vector<8x16x64xf32>
      %607 = vector.broadcast %600 : vector<8x1x1xf32> to vector<8x16x64xf32>
      %608 = arith.mulf %606, %607 : vector<8x16x64xf32>
      %609 = vector.broadcast %604 : vector<8x1x1xf32> to vector<8x16x64xf32>
      %610 = arith.addf %608, %609 : vector<8x16x64xf32>
      %cst_349 = arith.constant 0.000000e+00 : f32
      %611 = vector.broadcast %cst_349 : f32 to vector<8x16x64xf32>
      %612 = arith.maximumf %610, %611 : vector<8x16x64xf32>
      %c0_350 = arith.constant 0 : index
      %c0_351 = arith.constant 0 : index
      %c0_352 = arith.constant 0 : index
      %c0_353 = arith.constant 0 : index
      %613 = vector.load %arg6[%c0_350, %c0_351, %c0_352, %c0_353] : memref<1x8x16x64xf32, #tpu.memory_space<vmem>>, vector<1x8x16x64xf32>
      %614 = vector.shape_cast %613 : vector<1x8x16x64xf32> to vector<8x16x64xf32>
      %615 = vector.shape_cast %612 : vector<8x16x64xf32> to vector<1x8x16x64xf32>
      tpu.vector_store %arg6[%c0_350, %c0_351, %c0_352, %c0_353], %615 {strides = array<i32>} : memref<1x8x16x64xf32, #tpu.memory_space<vmem>>, vector<1x8x16x64xf32>,
    } else {
    }
    return
  }
  func.func @transform_0(%arg0: i32, %arg1: i32) -> (i32, i32, i32, i32) {
    %c2_i32 = arith.constant 2 : i32
    %0 = arith.muli %arg0, %c2_i32 : i32
    %1 = arith.addi %0, %arg1 : i32
    %c0_i32 = arith.constant 0 : i32
    %c0_i32_0 = arith.constant 0 : i32
    %c0_i32_1 = arith.constant 0 : i32
    %c0_i32_2 = arith.constant 0 : i32
    return %1, %c0_i32, %c0_i32_0, %c0_i32_1 : i32, i32, i32, i32
  }
  func.func @transform_1(%arg0: i32, %arg1: i32) -> (i32, i32, i32) {
    %c0_i32 = arith.constant 0 : i32
    %c0_i32_0 = arith.constant 0 : i32
    %c0_i32_1 = arith.constant 0 : i32
    %c0_i32_2 = arith.constant 0 : i32
    return %c0_i32, %c0_i32_0, %c0_i32_1 : i32, i32, i32
  }
  func.func @transform_2(%arg0: i32, %arg1: i32) -> (i32, i32, i32) {
    %c0_i32 = arith.constant 0 : i32
    %c0_i32_0 = arith.constant 0 : i32
    %c0_i32_1 = arith.constant 0 : i32
    return %arg0, %c0_i32, %c0_i32_0 : i32, i32, i32
  }
  func.func @transform_3(%arg0: i32, %arg1: i32) -> (i32, i32, i32) {
    %c0_i32 = arith.constant 0 : i32
    %c0_i32_0 = arith.constant 0 : i32
    %c0_i32_1 = arith.constant 0 : i32
    return %arg0, %c0_i32, %c0_i32_0 : i32, i32, i32
  }
  func.func @transform_4(%arg0: i32, %arg1: i32) -> (i32, i32, i32, i32) {
    %c0_i32 = arith.constant 0 : i32
    %c0_i32_0 = arith.constant 0 : i32
    %c0_i32_1 = arith.constant 0 : i32
    %c0_i32_2 = arith.constant 0 : i32
    return %arg0, %c0_i32, %c0_i32_0, %c0_i32_1 : i32, i32, i32, i32
  }
}

</mosaic_0001>

<bundles_post_ra>
// kernel: upsampling_forward.1
= control target key start
LH: loop header
LB: loop body
LE: loop exit
PB: predicated region body
PF: predicated region fallthrough
CT: control target
= control target key end

     0   :  { %s3952_s15 = smov 0   ;;  %s3954_s16 = smov 0   ;;  %s5439_s0 = inlined_call_operand.vmem [shape: bf16[4,4,10,34], index: 0, kind: input, shape index: {}]   ;;  %s5440_s1 = inlined_call_operand.vmem [shape: bf16[12,8,4], index: 1, kind: input, shape index: {}]   ;;  %s5441_s2 = inlined_call_operand.vmem [shape: f32[2,8,1], index: 2, kind: input, shape index: {}]   ;;  %s5442_s3 = inlined_call_operand.vmem [shape: f32[2,8,1], index: 3, kind: input, shape index: {}]   ;;  %s5443_s4 = inlined_call_operand.vmem [shape: f32[2,8,16,64], index: 4, kind: output, shape index: {}]  }
   0x1   :  { %s3956_s17 = smov 0   ;;  %s3958_s18 = smov 0  }
   0x2   :  { %s3960_s19 = smov 0  }
   0x3 LB: > { %s23_s20 = sadd.s32 1, %s3912_s17  ;;  %s26_s21 = sadd.s32 1, %s3916_s18  ;;  %s3920_s19 = sphi %s3960_s19, %s14_s19   ;;  %s3916_s18 = sphi %s3958_s18, %s5447_s18   ;;  %s3912_s17 = sphi %s3956_s17, %s5446_s17   ;;  %s3908_s16 = sphi %s3954_s16, %s5445_s16   ;;  %s3904_s15 = sphi %s3952_s15, %s5444_s15  }
   0x4   : > { %p24_p0 = scmp.ge.s32.totalorder %s23_s20, 2  ;;  %p3515_p1 = scmp.ge.s32.totalorder %s3920_s19, 1 }
   0x5   : > { %p200_p2 = scmp.lt.s32.totalorder %s3920_s19, 5 }
   0x6   : > { %s5449_s20 = smov (%p24_p0, %s23_s20), 0  ;;  %s5451_s21 = smov (!%p24_p0, %s26_s21), %s3916_s18 }
   0x7   : > { %p201_p3 = pnand %p3515_p1, %p200_p2  ;;  %p28_p4 = scmp.ge.s32.totalorder %s5451_s21, 2 }
   0x8   : > { %s3516_s22 = sshll.u32 (!%p201_p3), %s3908_s16, 1  ;;  %p245_p5 = scmp.lt.s32.totalorder (!%p201_p3), %s3908_s16, 1 }
   0x9   : > { %s5453_s21 = smov (%p28_p4, %s5451_s21), 0  ;;  %204 = sbr.rel (%p201_p3) target bundleno = 1292 (0x50c), region = 36 }
   0xa   : > { %s237_s23 = sadd.s32 (!%p201_p3), %s3904_s15, %s3516_s22  ;;  %p3523_p7 = scmp.ne.s32.totalorder (!%p201_p3), %s3904_s15, 0 }
   0xb   : > { %p238_p6 = scmp.lt.s32.totalorder (!%p201_p3), %s237_s23, 3 }
   0xe   : > { %s5455_s16 = smov (!%p245_p5, %s3908_s16), 1  ;;  %s5457_s23 = smov (!%p238_p6, %s237_s23), 3 }
   0xf   : > { %s3519_s24 = sshll.u32 %s5455_s16, 3  ;;  %s3819_s25 = sshll.u32 %s5455_s16, 7 }
  0x10   : > { %s3818_s26 = sshll.u32 %s5457_s23, 5  ;;  %s3988_s29 = scalar_lea.vmem %s5441_s2, %s3519_s24 }
  0x11   : > { %s3993_s6 = scalar_lea.vmem %s5439_s0, %s3818_s26  ;;  %s3998_s9 = scalar_lea.vmem %s5442_s3, %s3519_s24 }
  0x12   : > { %s4003_s12 = scalar_lea.vmem %s5443_s4, %s3819_s25  ;;  %262 = sbr.rel (%p3523_p7) target bundleno = 26 (0x1a), region = 40 }
  0x17   : > { %vm263_vm0 = vcmask 7168   ;;  %v3922_v0 = vmov 0.0  }
  0x18   : > { %264 = vst.msk [vmem:[#allocation2] sm:$0xff] %vm263_vm0, %v3922_v0 }
  0x19   : > { %265 = vst.msk [vmem:[#allocation3] sm:$0xff] %vm263_vm0, %v3922_v0 }
  0x1a PF: > { %v290_v1 = vld [vmem:[%s3993_s6] sm:$0x1]  ;;  %v291_v2 = vld [vmem:[%s3993_s6 + $0x8] sm:$0x1]  ;;  %v292_v3 = vld [vmem:[%s3993_s6 + $0x10] sm:$0x1] }
  0x1b   : > { %v293_v4 = vld [vmem:[%s3993_s6 + $0x18] sm:$0x1]  ;;  %v302_v5 = vunpack.c.l.b16 %v290_v1  ;;  %v303_v6 = vunpack.c.l.b16 %v291_v2  ;;  %v304_v7 = vunpack.c.l.b16 %v292_v3  ;;  %vm315_vm1 = vcmask 1041409   ;;  %v294_v9 = vld [vmem:[%s3993_s6] sm:$0x2]  ;;  %s3923_s13 = smov 127  }
  0x1c   : > { %v305_v8 = vunpack.c.l.b16 %v293_v4  ;;  %v295_v10 = vld [vmem:[%s3993_s6 + $0x8] sm:$0x2]  ;;  %v547_v14 = vunpack.c.l.b16 %v294_v9  ;;  %vm318_vm2 = vcmask 1042434   ;;  %vm321_vm3 = vcmask 1043459   ;;  %v296_v16 = vld [vmem:[%s3993_s6 + $0x10] sm:$0x2] }
  0x1d   : > { %v3536_v11 = vunpack.i.l.s16 %v302_v5  ;;  %v3537_v12 = vunpack.i.l.s16 %v303_v6  ;;  %v3538_v13 = vunpack.i.l.s16 %v304_v7  ;;  %v548_v17 = vunpack.c.l.b16 %v295_v10  ;;  %v297_v22 = vld [vmem:[%s3993_s6 + $0x18] sm:$0x2]  ;;  %v688_v27 = vld [vmem:[%s3993_s6] sm:$0x1]  ;;  %v689_v30 = vld [vmem:[%s3993_s6 + $0x8] sm:$0x1] }
  0x1e   : > { %v3539_v15 = vunpack.i.l.s16 %v305_v8  ;;  %v3549_v25 = vunpack.i.l.s16 %v547_v14  ;;  %v549_v33 = vunpack.c.l.b16 %v296_v16  ;;  %v550_v34 = vunpack.c.l.b16 %v297_v22  ;;  %v690_v35 = vld [vmem:[%s3993_s6 + $0x10] sm:$0x1]  ;;  %v691_v36 = vld [vmem:[%s3993_s6 + $0x18] sm:$0x1]  ;;  %v692_v41 = vld [vmem:[%s3993_s6] sm:$0x2] }
  0x1f   : > { %v388_v18 = vrot.slane %v3536_v11, 1  ;;  %v390_v19 = vrot.slane %v3538_v13, 7  ;;  %v314_v20 = vrot.slane %v3537_v12, 7  ;;  %v317_v21 = vrot.slane %v3538_v13, 6  ;;  %v693_v46 = vld [vmem:[%s3993_s6 + $0x8] sm:$0x2] }
  0x20   : > { %v392_v23 = vrot.slane %v3539_v15, 6  ;;  %v320_v24 = vrot.slane %v3539_v15, 5  ;;  %v3550_v26 = vunpack.i.l.s16 %v548_v17  ;;  %v559_v39 = vrot.slane %v3549_v25, 2  ;;  %v695_v63 = vld [vmem:[%s3993_s6 + $0x18] sm:$0x2]  ;;  %s3924_s14 = smov 126  }
  0x21   : > { %v389_v28 = vsel %vm315_vm1, %v3537_v12, %v388_v18  ;;  %v316_v29 = vsel %vm315_vm1, %v314_v20, %v3536_v11  ;;  %v700_v40 = vunpack.c.l.b16 %v688_v27  ;;  %v701_v45 = vunpack.c.l.b16 %v689_v30  ;;  %v694_v2 = vld [vmem:[%s3993_s6 + $0x10] sm:$0x2]  ;;  %v1043_v10 = vld [vmem:[%s3993_s6] sm:$0x2]  ;;  %v1044_v11 = vld [vmem:[%s3993_s6 + $0x8] sm:$0x2] }
  0x22   : > { %v391_v31 = vsel %vm318_vm2, %v390_v19, %v389_v28  ;;  %v319_v32 = vsel %vm318_vm2, %v317_v21, %v316_v29  ;;  %v560_v44 = vrot.slane %v3550_v26, 1  ;;  %v702_v47 = vunpack.c.l.b16 %v690_v35  ;;  %v1045_v14 = vld [vmem:[%s3993_s6 + $0x10] sm:$0x2]  ;;  %v1046_v15 = vld [vmem:[%s3993_s6 + $0x18] sm:$0x2]  ;;  %p3815_p8 = scmp.ne.s32.totalorder %s3904_s15, 1 }
  0x23   : > { %v393_v37 = vsel %vm321_vm3, %v392_v23, %v391_v31  ;;  %v322_v38 = vsel %vm321_vm3, %v320_v24, %v319_v32  ;;  %v703_v48 = vunpack.c.l.b16 %v691_v36  ;;  %v3556_v49 = vunpack.i.l.s16 %v700_v40 }
  0x24   : > { %v4025_v42 = vpack.c.b16 %v393_v37, %v393_v37  ;;  %v4027_v43 = vpack.c.b16 %v322_v38, %v322_v38  ;;  %v3551_v50 = vunpack.i.l.s16 %v549_v33  ;;  %v3552_v51 = vunpack.i.l.s16 %v550_v34 }
  0x25   : > { %v3557_v52 = vunpack.i.l.s16 %v701_v45  ;;  %v776_v53 = vunpack.c.l.b16 %v692_v41  ;;  %v3558_v54 = vunpack.i.l.s16 %v702_v47  ;;  %v3559_v55 = vunpack.i.l.s16 %v703_v48  ;;  %v4072_v41 = vld [vmem:[%s5440_s1] sm:$0xf] }
  0x26   : > { %415 = vrot.lane.b32.xlu1 %v4025_v42, %s3923_s13  ;;  %324 = vrot.lane.b32.xlu0 %v4027_v43, %s3923_s13  ;;  %v712_v56 = vrot.slane %v3556_v49, 1  ;;  %v777_v57 = vunpack.c.l.b16 %v693_v46  ;;  %v561_v58 = vsel %vm315_vm1, %v560_v44, %v559_v39  ;;  %v563_v62 = vrot.slane %v3552_v51, 7 }
  0x27   : > { %v714_v60 = vrot.slane %v3558_v54, 7  ;;  %v716_v61 = vrot.slane %v3559_v55, 6  ;;  %v562_v0 = vsel %vm318_vm2, %v3551_v50, %v561_v58  ;;  %v3563_v3 = vunpack.i.l.s16 %v776_v53  ;;  %v1047_v58 = vld [vmem:[%s3993_s6] sm:$0x4] }
  0x28   : > { %v713_v59 = vsel %vm315_vm1, %v3557_v52, %v712_v56  ;;  %v3564_v4 = vunpack.i.l.s16 %v777_v57  ;;  %v779_v7 = vunpack.c.l.b16 %v695_v63  ;;  %v564_v8 = vsel %vm321_vm3, %v563_v62, %v562_v0  ;;  %v4112_v57 = vld [vmem:[%s5440_s1 + $0xc] sm:$0xf]  ;;  %v1050_v63 = vld [vmem:[%s3993_s6 + $0x18] sm:$0x4] }
  0x29   : > { %v715_v1 = vsel %vm318_vm2, %v714_v60, %v713_v59  ;;  %v778_v9 = vunpack.c.l.b16 %v694_v2  ;;  %v788_v12 = vrot.slane %v3563_v3, 2  ;;  %v1055_v16 = vunpack.c.l.b16 %v1043_v10  ;;  %v1048_v59 = vld [vmem:[%s3993_s6 + $0x8] sm:$0x4]  ;;  %v1049_v60 = vld [vmem:[%s3993_s6 + $0x10] sm:$0x4] }
  0x2a   : > { %v717_v5 = vsel %vm321_vm3, %v716_v61, %v715_v1  ;;  %v789_v13 = vrot.slane %v3564_v4, 1  ;;  %v1056_v17 = vunpack.c.l.b16 %v1044_v11  ;;  %v1057_v18 = vunpack.c.l.b16 %v1045_v14 }
  0x2b   : > { %v4041_v6 = vpack.c.b16 %v717_v5, %v717_v5  ;;  %v3566_v19 = vunpack.i.l.s16 %v779_v7  ;;  %v1058_v20 = vunpack.c.l.b16 %v1046_v15  ;;  %v3593_v21 = vunpack.i.l.s16 %v1055_v16  ;;  %v1401_v15 = vld [vmem:[%s3993_s6 + $0x10] sm:$0x2] }
  0x2c   : > { %v3594_v22 = vunpack.i.l.s16 %v1056_v17  ;;  %v4054_v23 = vpack.c.b16 %v564_v8, %v564_v8  ;;  %v3565_v24 = vunpack.i.l.s16 %v778_v9  ;;  %v3595_v25 = vunpack.i.l.s16 %v1057_v18 }
  0x2d   : > { %753 = vrot.lane.b32.xlu2 %v4041_v6, %s3924_s14  ;;  %v790_v26 = vsel %vm315_vm1, %v789_v13, %v788_v12  ;;  %v1127_v27 = vrot.slane %v3593_v21, 3  ;;  %v924_v29 = vrot.slane %v3563_v3, 3  ;;  %v792_v31 = vrot.slane %v3566_v19, 7  ;;  %v1399_v12 = vld [vmem:[%s3993_s6] sm:$0x2] }
  0x2e   : > { %437 = vrot.lane.b32.xlu1 %v4025_v42, %s3924_s14  ;;  %366 = vrot.lane.b32.xlu0 %v4027_v43, %s3924_s14  ;;  %v1128_v28 = vrot.slane %v3594_v22, 2  ;;  %v1130_v30 = vrot.slane %v3595_v25, 1  ;;  %v925_v32 = vrot.slane %v3564_v4, 2  ;;  %v3596_v33 = vunpack.i.l.s16 %v1058_v20  ;;  %v1400_v13 = vld [vmem:[%s3993_s6 + $0x8] sm:$0x2] }
  0x2f   : > { %v791_v35 = vsel %vm318_vm2, %v3565_v24, %v790_v26  ;;  %vm330_vm4 = vcmask 1041408   ;;  %v927_v39 = vrot.slane %v3565_v24, 1  ;;  %vm326_vm5 = vcmask 31744  }
  0x30   : > { %v1129_v34 = vsel %vm315_vm1, %v1128_v28, %v1127_v27  ;;  %v351_v38 = vsel %vm330_vm4, %v4027_v43, 0  ;;  %v793_v44 = vsel %vm321_vm3, %v792_v31, %v791_v35  ;;  %v926_v45 = vsel %vm315_vm1, %v925_v32, %v924_v29  ;;  %v1403_v35 = vld [vmem:[%s3993_s6] sm:$0x4] }
  0x31   : > { %v1131_v36 = vsel %vm318_vm2, %v1130_v30, %v1129_v34  ;;  %360 = vmatpush.bf16.msra.mxu1 %v351_v38  ;;  %v4080_v43 = vpack.c.b16 %v793_v44, %v793_v44  ;;  %v928_v46 = vsel %vm318_vm2, %v927_v39, %v926_v45  ;;  %v1067_v47 = vrot.slane %v3593_v21, 2  ;;  %v1406_v44 = vld [vmem:[%s3993_s6 + $0x18] sm:$0x4] }
  0x32   : > { %v1132_v37 = vsel %vm321_vm3, %v3596_v33, %v1131_v36  ;;  %v1068_v48 = vrot.slane %v3594_v22, 1  ;;  %v929_v49 = vsel %vm321_vm3, %v3566_v19, %v928_v46  ;;  %v1071_v52 = vrot.slane %v3596_v33, 7  ;;  %v1402_v22 = vld [vmem:[%s3993_s6 + $0x18] sm:$0x2]  ;;  %v1404_v36 = vld [vmem:[%s3993_s6 + $0x8] sm:$0x4] }
  0x33   : > { %v4067_v40 = vpack.c.b16 %v1132_v37, %v1132_v37  ;;  %v4089_v51 = vpack.c.b16 %v929_v49, %v929_v49  ;;  %v399_v56 = vsel %vm330_vm4, %v4025_v42, 0  ;;  %v1267_v61 = vunpack.c.l.b16 %v1047_v58  ;;  %v1405_v37 = vld [vmem:[%s3993_s6 + $0x10] sm:$0x4] }
  0x34   : > { %3541 = vmatmul.msk.bf16.vlgmr.msra.gmra.mxu1 %vm326_vm5, %v4072_v41  ;;  %v1069_v50 = vsel %vm315_vm1, %v1068_v48, %v1067_v47  ;;  %408 = vmatpush.bf16.msra.mxu3 %v399_v56  ;;  %v1268_v62 = vunpack.c.l.b16 %v1048_v59  ;;  %v1269_v42 = vunpack.c.l.b16 %v1049_v60  ;;  %v1270_v0 = vunpack.c.l.b16 %v1050_v63  ;;  %v4171_v63 = vld [vmem:[%s5440_s1 + $0x4] sm:$0xf] }
  0x35   : > { %1151 = vrot.lane.b32.xlu2 %v4067_v40, %s3923_s13  ;;  %v1070_v53 = vsel %vm318_vm2, %v3595_v25, %v1069_v50  ;;  %v3615_v1 = vunpack.i.l.s16 %v1267_v61  ;;  %v1411_v16 = vunpack.c.l.b16 %v1399_v12  ;;  %v1412_v17 = vunpack.c.l.b16 %v1400_v13  ;;  %v4134_v25 = vld [vmem:[%s5440_s1 + $0x18] sm:$0xf] }
  0x36   : > { %586 = vrot.lane.b32.xlu0 %v4054_v23, %s3923_s13  ;;  %608 = vrot.lane.b32.xlu1 %v4054_v23, %s3924_s14  ;;  %v1072_v54 = vsel %vm321_vm3, %v1071_v52, %v1070_v53  ;;  %v3616_v2 = vunpack.i.l.s16 %v1268_v62  ;;  %v3617_v3 = vunpack.i.l.s16 %v1269_v42  ;;  %v3618_v4 = vunpack.i.l.s16 %v1270_v0 }
  0x37   : > { %v4097_v55 = vpack.c.b16 %v1072_v54, %v1072_v54  ;;  %3543 = vmatmul.msk.bf16.vlgmr.msra.gmra.mxu3 %vm326_vm5, %v4112_v57  ;;  %v1279_v5 = vrot.slane %v3615_v1, 4  ;;  %v1413_v19 = vunpack.c.l.b16 %v1401_v15  ;;  %v3630_v20 = vunpack.i.l.s16 %v1411_v16 }
  0x38   : > { %520 = vmatpush.bf16.msrb.mxu3 %v399_v56  ;;  %v1280_v7 = vrot.slane %v3616_v2, 3  ;;  %v1282_v8 = vrot.slane %v3617_v3, 2  ;;  %v1284_v10 = vrot.slane %v3618_v4, 1  ;;  %v3631_v21 = vunpack.i.l.s16 %v1412_v17  ;;  %v1756_v2 = vld [vmem:[%s3993_s6] sm:$0x4] }
  0x39   : > { %v3632_v24 = vunpack.i.l.s16 %v1413_v19  ;;  %v1414_v26 = vunpack.c.l.b16 %v1402_v22  ;;  %v1423_v27 = vrot.slane %v3630_v20, 3  ;;  %v1487_v38 = vunpack.c.l.b16 %v1403_v35  ;;  %v1757_v3 = vld [vmem:[%s3993_s6 + $0x8] sm:$0x4]  ;;  %v1758_v4 = vld [vmem:[%s3993_s6 + $0x10] sm:$0x4] }
  0x3a   : > { %v1281_v9 = vsel %vm315_vm1, %v1280_v7, %v1279_v5  ;;  %v1424_v28 = vrot.slane %v3631_v21, 2  ;;  %v1488_v39 = vunpack.c.l.b16 %v1404_v36  ;;  %v1489_v45 = vunpack.c.l.b16 %v1405_v37  ;;  %v1759_v5 = vld [vmem:[%s3993_s6 + $0x18] sm:$0x4]  ;;  %v4194_v19 = vld [vmem:[%s5440_s1 + $0x8] sm:$0xf] }
  0x3b   : > { %v1283_v11 = vsel %vm318_vm2, %v1282_v8, %v1281_v9  ;;  %v1426_v29 = vrot.slane %v3632_v24, 1  ;;  %v3633_v30 = vunpack.i.l.s16 %v1414_v26  ;;  %v1490_v46 = vunpack.c.l.b16 %v1406_v44  ;;  %v4199_v20 = vld [vmem:[%s5440_s1 + $0x14] sm:$0xf]  ;;  %v4215_v35 = vld [vmem:[%s5440_s1 + $0x10] sm:$0xf] }
  0x3c   : > { %v1285_v14 = vsel %vm321_vm3, %v1284_v10, %v1283_v11  ;;  %v1425_v31 = vsel %vm315_vm1, %v1424_v28, %v1423_v27  ;;  %v4151_v47 = vunpack.i.l.s16 %v1487_v38  ;;  %v4153_v48 = vunpack.i.l.s16 %v1488_v39  ;;  %v4224_v44 = vld [vmem:[%s5440_s1 + $0x2c] sm:$0xf] }
  0x3d   : > { %v4126_v18 = vpack.c.b16 %v1285_v14, %v1285_v14  ;;  %v1427_v32 = vsel %vm318_vm2, %v1426_v29, %v1425_v31  ;;  %v4157_v49 = vunpack.i.l.s16 %v1489_v45  ;;  %v4159_v50 = vunpack.i.l.s16 %v1490_v46 }
  0x3e   : > { %719 = vrot.lane.b32.xlu1 %v4041_v6, %s3923_s13  ;;  %812 = vrot.lane.b32.xlu0 %v4080_v43, %s3923_s13  ;;  %v1428_v33 = vsel %vm321_vm3, %v3633_v30, %v1427_v32  ;;  %v1499_v52 = vrot.slane %v4151_v47, 4  ;;  %v1500_v53 = vrot.slane %v4153_v48, 3  ;;  %v1768_v7 = vunpack.c.l.b16 %v1756_v2 }
  0x3f   : > { %v4141_v34 = vpack.c.b16 %v1428_v33, %v1428_v33  ;;  %v1502_v58 = vrot.slane %v4157_v49, 2  ;;  %v1504_v62 = vrot.slane %v4159_v50, 1  ;;  %v1769_v8 = vunpack.c.l.b16 %v1757_v3 }
  0x40   : > { %v1501_v61 = vsel %vm315_vm1, %v1500_v53, %v1499_v52  ;;  %v570_v11 = vsel %vm330_vm4, %v4054_v23, 0  ;;  %v1770_v12 = vunpack.c.l.b16 %v1758_v4  ;;  %v1771_v13 = vunpack.c.l.b16 %v1759_v5  ;;  %v2121_v4 = vld [vmem:[%s3993_s6 + $0x18] sm:$0x8] }
  0x41   : > { %1464 = vrot.lane.b32.xlu2 %v4141_v34, %s3924_s14  ;;  %v1503_v42 = vsel %vm318_vm2, %v1502_v58, %v1501_v61  ;;  %v3667_v16 = vunpack.i.l.s16 %v1768_v7  ;;  %v3668_v17 = vunpack.i.l.s16 %v1769_v8  ;;  %v738_v22 = vsel %vm330_vm4, %v4041_v6, 0  ;;  %v2119_v61 = vld [vmem:[%s3993_s6 + $0x8] sm:$0x8] }
  0x42   : > { %v1505_v0 = vsel %vm321_vm3, %v1504_v62, %v1503_v42  ;;  %v3669_v23 = vunpack.i.l.s16 %v1770_v12  ;;  %v3670_v21 = vunpack.i.l.s16 %v1771_v13  ;;  %v1636_v38 = vrot.slane %v4151_v47, 5 }
  0x43   : > { %v4175_v1 = vpack.c.b16 %v1505_v0, %v1505_v0  ;;  %v1780_v24 = vrot.slane %v3667_v16, 4  ;;  %v1781_v26 = vrot.slane %v3668_v17, 3  ;;  %v1637_v39 = vrot.slane %v4153_v48, 4  ;;  %v2120_v0 = vld [vmem:[%s3993_s6 + $0x10] sm:$0x8] }
  0x44   : > { %v1783_v27 = vrot.slane %v3669_v23, 2  ;;  %v1785_v28 = vrot.slane %v3670_v21, 1  ;;  %v1639_v45 = vrot.slane %v4157_v49, 3  ;;  %v1841_v46 = vrot.slane %v3667_v16, 5 }
  0x45   : > { %v1782_v29 = vsel %vm315_vm1, %v1781_v26, %v1780_v24  ;;  %v1842_v52 = vrot.slane %v3668_v17, 4  ;;  %v1638_v47 = vsel %vm315_vm1, %v1637_v39, %v1636_v38  ;;  %v1641_v48 = vrot.slane %v4159_v50, 2 }
  0x46   : > { %831 = vrot.lane.b32.xlu1 %v4080_v43, %s3924_s14  ;;  %948 = vrot.lane.b32.xlu0 %v4089_v51, %s3923_s13  ;;  %v1784_v30 = vsel %vm318_vm2, %v1783_v27, %v1782_v29  ;;  %v1844_v53 = vrot.slane %v3669_v23, 3  ;;  %v1846_v58 = vrot.slane %v3670_v21, 2  ;;  %v796_v50 = vsel %vm330_vm4, %v4080_v43, 0  ;;  %v2472_v27 = vld [vmem:[%s3993_s6] sm:$0x8] }
  0x47   : > { %3547 = vmatmul.msk.bf16.vlgmr.msrb.gmra.mxu3 %vm326_vm5, %v4134_v25  ;;  %v1786_v31 = vsel %vm321_vm3, %v1785_v28, %v1784_v30  ;;  %v2204_v5 = vunpack.c.l.b16 %v2119_v61  ;;  %v2205_v7 = vunpack.c.l.b16 %v2120_v0  ;;  %v2206_v43 = vunpack.c.l.b16 %v2121_v4  ;;  %v2473_v28 = vld [vmem:[%s3993_s6 + $0x8] sm:$0x8]  ;;  %v2474_v30 = vld [vmem:[%s3993_s6 + $0x10] sm:$0x8] }
  0x48   : > { %v4210_v33 = vpack.c.b16 %v1786_v31, %v1786_v31  ;;  %v2484_v31 = vunpack.c.l.b16 %v2472_v27  ;;  %v4321_v4 = vld [vmem:[%s5440_s1 + $0x28] sm:$0xf]  ;;  %v2476_v27 = vld [vmem:[%s3993_s6 + $0x4] sm:$0x1]  ;;  %vm459_vm6 = vcmask 261120   ;;  %vm485_vm7 = vcmask 253952  }
  0x49   : > { %1524 = vrot.lane.b32.xlu2 %v4175_v1, %s3923_s13  ;;  %v4257_v12 = vunpack.i.l.s16 %v2204_v5  ;;  %v4259_v13 = vunpack.i.l.s16 %v2205_v7  ;;  %v4271_v16 = vunpack.i.l.s16 %v2206_v43  ;;  %vm679_vm8 = vcmask 516352  }
  0x4a   : > { %vm3187_vm9 = vcmask 7168  }
  0x4b   : > { %v2216_v21 = vrot.slane %v4257_v12, 5  ;;  %v2220_v24 = vrot.slane %v4271_v16, 3 }
  0x4e   : > { %967 = vrot.lane.b32.xlu0 %v4089_v51, %s3924_s14  ;;  %1074 = vrot.lane.b32.xlu1 %v4097_v55, %s3923_s13 }
  0x51   : > { %1822 = vrot.lane.b32.xlu2 %v4210_v33, %s3924_s14 }
  0x56   : > { %1170 = vrot.lane.b32.xlu1 %v4067_v40, %s3924_s14  ;;  %1108 = vrot.lane.b32.xlu0 %v4097_v55, %s3924_s14 }
  0x5e   : > { %1304 = vrot.lane.b32.xlu1 %v4126_v18, %s3923_s13  ;;  %1430 = vrot.lane.b32.xlu0 %v4141_v34, %s3923_s13 }
  0x66   : > { %1323 = vrot.lane.b32.xlu1 %v4126_v18, %s3924_s14  ;;  %1543 = vrot.lane.b32.xlu0 %v4175_v1, %s3924_s14 }
  0x98   : > { %v416_v54 = vpop.permute.xlu1 %415  ;;  %v325_v56 = vpop.permute.xlu0 %324 }
  0x99   : > { %v332_v59 = vsel %vm330_vm4, %v325_v56, 0  ;;  %v421_v60 = vsel %vm330_vm4, %v416_v54, 0  ;;  %v1640_v54 = vsel %vm318_vm2, %v1639_v45, %v1638_v47  ;;  %v1843_v56 = vsel %vm315_vm1, %v1842_v52, %v1841_v46 }
  0x9a   : > { %341 = vmatpush.bf16.msra.mxu0 %v332_v59  ;;  %v1642_v49 = vsel %vm321_vm3, %v1641_v48, %v1640_v54  ;;  %v1845_v59 = vsel %vm318_vm2, %v1844_v53, %v1843_v56  ;;  %v3741_v52 = vunpack.i.l.s16 %v2484_v31  ;;  %v4301_v54 = vld [vmem:[%s5440_s1 + $0x20] sm:$0xf] }
  0x9b   : > { %v4243_v62 = vpack.c.b16 %v1642_v49, %v1642_v49  ;;  %v1847_v42 = vsel %vm321_vm3, %v1846_v58, %v1845_v59 }
  0x9c   : > { %v4247_v3 = vpack.c.b16 %v1847_v42, %v1847_v42  ;;  %v2496_v58 = vrot.slane %v3741_v52, 6  ;;  %v2557_v5 = vrot.slane %v3741_v52, 7 }
  0x9d   : > { %3540 = vmatmul.msk.bf16.vlgmr.msra.gmra.mxu0 %vm326_vm5, %v4171_v63  ;;  %1661 = vrot.lane.b32.xlu1 %v4243_v62, %s3923_s13 }
  0x9e   : > { %430 = vmatpush.bf16.msrb.mxu0 %v421_v60  ;;  %1680 = vrot.lane.b32.xlu0 %v4243_v62, %s3924_s14 }
  0x9f   : > { %1866 = vrot.lane.b32.xlu2 %v4247_v3, %s3923_s13 }
  0xa0   : > { %v438_v9 = vpop.permute.xlu1 %437  ;;  %v367_v10 = vpop.permute.xlu0 %366 }
  0xa1   : > { %v372_v14 = vsel %vm330_vm4, %v367_v10, 0  ;;  %v443_v15 = vsel %vm330_vm4, %v438_v9, 0  ;;  %v754_v9 = vpop.permute.xlu2 %753 }
  0xa2   : > { %381 = vmatpush.bf16.msra.mxu2 %v372_v14  ;;  %452 = vmatpush.bf16.msrb.mxu1 %v443_v15  ;;  %v4264_v14 = vld [vmem:[%s5440_s1 + $0x1c] sm:$0xf]  ;;  %v756_v23 = vsel %vm330_vm4, %v754_v9, 0 }
  0xa3   : > { %536 = vmatpush.bf16.msra.mxu0 %v443_v15  ;;  %v4269_v15 = vld [vmem:[%s5440_s1 + $0x24] sm:$0xf] }
  0xa5   : > { %3542 = vmatmul.msk.bf16.vlgmr.msra.gmra.mxu2 %vm326_vm5, %v4194_v19  ;;  %3545 = vmatmul.msk.bf16.vlgmr.msrb.gmra.mxu1 %vm326_vm5, %v4199_v20 }
  0xa6   : > { %504 = vmatpush.bf16.msrb.mxu2 %v421_v60  ;;  %579 = vmatpush.bf16.msra.mxu1 %v570_v11  ;;  %v2118_v60 = vld [vmem:[%s3993_s6] sm:$0x8] }
  0xa7   : > { %v2203_v2 = vunpack.c.l.b16 %v2118_v60  ;;  %1788 = vrot.lane.b32.xlu1 %v4210_v33, %s3923_s13 }
  0xa8   : > { %v587_v32 = vpop.permute.xlu0 %586  ;;  %v609_v6 = vpop.permute.xlu1 %608 }
  0xa9   : > { %v592_v36 = vsel %vm330_vm4, %v587_v32, 0  ;;  %v614_v37 = vsel %vm330_vm4, %v609_v6, 0  ;;  %v4252_v10 = vunpack.i.l.s16 %v2203_v2  ;;  %v2485_v32 = vunpack.c.l.b16 %v2473_v28  ;;  %v2479_v28 = vld [vmem:[%s3993_s6 + $0x1c] sm:$0x1] }
  0xaa   : > { %747 = vmatpush.bf16.msrb.mxu1 %v738_v22  ;;  %601 = vmatpush.bf16.msra.mxu2 %v592_v36  ;;  %v2218_v22 = vrot.slane %v4259_v13, 4  ;;  %v2475_v36 = vld [vmem:[%s3993_s6 + $0x18] sm:$0x8]  ;;  %v2701_v31 = vunpack.c.l.b16 %v2479_v28 }
  0xab   : > { %623 = vmatpush.bf16.msra.mxu3 %v614_v37  ;;  %v2215_v17 = vrot.slane %v4252_v10, 6  ;;  %v2486_v37 = vunpack.c.l.b16 %v2474_v30  ;;  %v2487_v46 = vunpack.c.l.b16 %v2475_v36  ;;  %v3742_v47 = vunpack.i.l.s16 %v2485_v32 }
  0xac   : > { %v2698_v30 = vunpack.c.l.b16 %v2476_v27  ;;  %v2832_v27 = vld [vmem:[%s3993_s6 + $0x18] sm:$0x8] }
  0xad   : > { %3544 = vmatmul.msk.bf16.vlgmr.msrb.gmra.mxu0 %vm326_vm5, %v4215_v35  ;;  %v2217_v26 = vsel %vm315_vm1, %v2216_v21, %v2215_v17  ;;  %v3743_v53 = vunpack.i.l.s16 %v2486_v37  ;;  %v3744_v56 = vunpack.i.l.s16 %v2487_v46  ;;  %v2497_v49 = vrot.slane %v3742_v47, 5  ;;  %v2477_v21 = vld [vmem:[%s3993_s6 + $0xc] sm:$0x1] }
  0xae   : > { %3555 = vmatmul.msk.bf16.vlgmr.msra.gmra.mxu3 %vm326_vm5, %v4224_v44  ;;  %v2219_v29 = vsel %vm318_vm2, %v2218_v22, %v2217_v26  ;;  %v2558_v7 = vrot.slane %v3742_v47, 6  ;;  %v3763_v36 = vunpack.i.l.s16 %v2698_v30  ;;  %v3766_v37 = vunpack.i.l.s16 %v2701_v31 }
  0xaf   : > { %805 = vmatpush.bf16.msrb.mxu3 %v796_v50  ;;  %v2221_v6 = vsel %vm321_vm3, %v2220_v24, %v2219_v29  ;;  %v2498_v60 = vsel %vm315_vm1, %v2497_v49, %v2496_v58  ;;  %v2501_v61 = vrot.slane %v3744_v56, 3  ;;  %1885 = vrot.lane.b32.xlu1 %v4247_v3, %s3924_s14  ;;  %v2560_v9 = vrot.slane %v3743_v53, 5 }
  0xb0   : > { %v720_v8 = vpop.permute.xlu1 %719  ;;  %v813_v39 = vpop.permute.xlu0 %812  ;;  %v4293_v45 = vpack.c.b16 %v2221_v6, %v2221_v6  ;;  %v2559_v43 = vsel %vm315_vm1, %v2558_v7, %v2557_v5  ;;  %v2699_v24 = vunpack.c.l.b16 %v2477_v21  ;;  %v2714_v47 = vrot.slane %v3766_v37, 5  ;;  %v1763_v7 = vld [vmem:[%s3993_s6 + $0x18] sm:$0x8] }
  0xb1   : > { %v722_v11 = vsel %vm330_vm4, %v720_v8, 0  ;;  %v815_v59 = vsel %vm330_vm4, %v813_v39, 0  ;;  %v932_v8 = vsel %vm330_vm4, %v4089_v51, 0  ;;  %v2561_v17 = vsel %vm318_vm2, %v2560_v9, %v2559_v43  ;;  %v2478_v51 = vld [vmem:[%s3993_s6 + $0x14] sm:$0x1] }
  0xb2   : > { %731 = vmatpush.bf16.msrb.mxu0 %v722_v11  ;;  %2259 = vrot.lane.b32.xlu2 %v4293_v45, %s3924_s14  ;;  %v2562_v11 = vrot.slane %v3744_v56, 4  ;;  %v2700_v29 = vunpack.c.l.b16 %v2478_v51  ;;  %v3764_v32 = vunpack.i.l.s16 %v2699_v24  ;;  %v1761_v56 = vld [vmem:[%s3993_s6 + $0x8] sm:$0x8]  ;;  %v2831_v24 = vld [vmem:[%s3993_s6 + $0x10] sm:$0x8] }
  0xb3   : > { %904 = vmatpush.bf16.msra.mxu3 %v796_v50  ;;  %v2499_v50 = vrot.slane %v3743_v53, 4  ;;  %v1760_v53 = vld [vmem:[%s3993_s6] sm:$0x8]  ;;  %v2830_v9 = vld [vmem:[%s3993_s6 + $0x8] sm:$0x8]  ;;  %v2843_v37 = vunpack.c.l.b16 %v2831_v24 }
  0xb4   : > { %v2563_v22 = vsel %vm321_vm3, %v2562_v11, %v2561_v17  ;;  %v3765_v6 = vunpack.i.l.s16 %v2700_v29  ;;  %v2353_v17 = vrot.slane %v4257_v12, 6  ;;  %v2357_v29 = vrot.slane %v4271_v16, 4 }
  0xb5   : > { %3546 = vmatmul.msk.bf16.vlgmr.msrb.gmra.mxu2 %vm326_vm5, %v4264_v14  ;;  %3553 = vmatmul.msk.bf16.vlgmr.msra.gmra.mxu1 %vm326_vm5, %v4269_v15  ;;  %v2500_v42 = vsel %vm318_vm2, %v2499_v50, %v2498_v60  ;;  %v4336_v26 = vpack.c.b16 %v2563_v22, %v2563_v22  ;;  %v1762_v50 = vld [vmem:[%s3993_s6 + $0x10] sm:$0x8]  ;;  %v1982_v60 = vunpack.c.l.b16 %v1760_v53  ;;  %v2842_v31 = vunpack.c.l.b16 %v2830_v9  ;;  %v2833_v9 = vld [vmem:[%s3993_s6 + $0x4] sm:$0x1] }
  0xb6   : > { %765 = vmatpush.bf16.msrb.mxu2 %v756_v23  ;;  %v2502_v0 = vsel %vm321_vm3, %v2501_v61, %v2500_v42  ;;  %v2712_v39 = vrot.slane %v3765_v6, 6  ;;  %v1983_v61 = vunpack.c.l.b16 %v1761_v56  ;;  %v2829_v42 = vld [vmem:[%s3993_s6] sm:$0x8]  ;;  %v3780_v56 = vunpack.i.l.s16 %v2843_v37 }
  0xb7   : > { %v4314_v2 = vpack.c.b16 %v2502_v0, %v2502_v0  ;;  %v2841_v43 = vunpack.c.l.b16 %v2829_v42  ;;  %v3689_v21 = vunpack.i.l.s16 %v1982_v60  ;;  %v2835_v42 = vld [vmem:[%s3993_s6 + $0x14] sm:$0x1] }
  0xb8   : > { %v832_v38 = vpop.permute.xlu1 %831  ;;  %v949_v23 = vpop.permute.xlu0 %948  ;;  %v3690_v22 = vunpack.i.l.s16 %v1983_v61 }
  0xb9   : > { %v4296_v48 = vsel %vm330_vm4, %v832_v38, 0  ;;  %v2710_v38 = vrot.slane %v3764_v32, 7  ;;  %v951_v46 = vsel %vm330_vm4, %v949_v23, 0  ;;  %v1985_v23 = vunpack.c.l.b16 %v1763_v7 }
  0xba   : > { %843 = vmatpush.bf16.msra.mxu1 %v4296_v48  ;;  %2504 = vrot.lane.b32.xlu2 %v4314_v2, %s3923_s13  ;;  %v1994_v6 = vrot.slane %v3689_v21, 6  ;;  %v2856_v7 = vrot.slane %v3780_v56, 5 }
  0xbb   : > { %v2711_v52 = vsel %vm315_vm1, %v2710_v38, %v3763_v36  ;;  %v3692_v30 = vunpack.i.l.s16 %v1985_v23  ;;  %v2844_v38 = vunpack.c.l.b16 %v2832_v27 }
  0xbc   : > { %v2713_v58 = vsel %vm318_vm2, %v2712_v39, %v2711_v52  ;;  %v3778_v52 = vunpack.i.l.s16 %v2841_v43  ;;  %v2836_v43 = vld [vmem:[%s3993_s6 + $0x1c] sm:$0x1] }
  0xbd   : > { %3548 = vmatmul.msk.bf16.vlgmr.msra.gmra.mxu0 %vm326_vm5, %v4301_v54  ;;  %v2715_v0 = vsel %vm321_vm3, %v2714_v47, %v2713_v58  ;;  %v1999_v36 = vrot.slane %v3692_v30, 3  ;;  %v3779_v47 = vunpack.i.l.s16 %v2842_v31  ;;  %v3781_v58 = vunpack.i.l.s16 %v2844_v38 }
  0xbe   : > { %3567 = vmatmul.msk.bf16.vlgmr.msrb.gmra.mxu3 %vm326_vm5, %v4112_v57  ;;  %824 = vmatpush.bf16.msra.mxu0 %v815_v59  ;;  %v4360_v11 = vpack.c.b16 %v2715_v0, %v2715_v0  ;;  %v2853_v60 = vrot.slane %v3778_v52, 7  ;;  %v2921_v23 = vunpack.c.l.b16 %v2836_v43 }
  0xbf   : > { %v2854_v61 = vrot.slane %v3779_v47, 6 }
  0xc0   : > { %v968_v49 = vpop.permute.xlu0 %967  ;;  %v3788_v27 = vunpack.i.l.s16 %v2921_v23 }
  0xc1   : > { %v970_v5 = vsel %vm330_vm4, %v968_v49, 0  ;;  %v2834_v49 = vld [vmem:[%s3993_s6 + $0xc] sm:$0x1] }
  0xc2   : > { %2601 = vrot.lane.b32.xlu2 %v4336_v26, %s3924_s14  ;;  %979 = vmatpush.bf16.msrb.mxu3 %v970_v5  ;;  %v1075_v5 = vpop.permute.xlu1 %1074 }
  0xc5   : > { %3554 = vmatmul.msk.bf16.vlgmr.msra.gmra.mxu2 %vm326_vm5, %v4321_v4  ;;  %3561 = vmatmul.msk.bf16.vlgmr.msrb.gmra.mxu1 %vm326_vm5, %v4072_v41 }
  0xc6   : > { %891 = vmatpush.bf16.msra.mxu2 %v815_v59  ;;  %941 = vmatpush.bf16.msrb.mxu1 %v932_v8  ;;  %v1093_v59 = vsel %vm330_vm4, %v4097_v55, 0  ;;  %v1984_v8 = vunpack.c.l.b16 %v1762_v50  ;;  %v2352_v55 = vrot.slane %v4252_v10, 7  ;;  %v1995_v10 = vrot.slane %v3690_v22, 5 }
  0xc8   : > { %v3691_v51 = vunpack.i.l.s16 %v1984_v8  ;;  %v2354_v28 = vsel %vm315_vm1, %v2353_v17, %v2352_v55  ;;  %v1996_v16 = vsel %vm315_vm1, %v1995_v10, %v1994_v6  ;;  %v2858_v8 = vrot.slane %v3781_v58, 4  ;;  %v2114_v6 = vld [vmem:[%s3993_s6] sm:$0x4]  ;;  %v2115_v10 = vld [vmem:[%s3993_s6 + $0x8] sm:$0x4] }
  0xc9   : > { %v2919_v55 = vunpack.c.l.b16 %v2834_v49  ;;  %v2855_v17 = vsel %vm315_vm1, %v2854_v61, %v2853_v60  ;;  %v2127_v37 = vunpack.c.l.b16 %v2115_v10  ;;  %v1109_v49 = vpop.permute.xlu0 %1108  ;;  %v410_v10 = vpop.f32.mrf.mxu3 }
  0xca   : > { %v1997_v12 = vrot.slane %v3691_v51, 4  ;;  %2734 = vrot.lane.b32.xlu2 %v4360_v11, %s3923_s13  ;;  %v1171_v60 = vpop.permute.xlu1 %1170  ;;  %v1111_v43 = vsel %vm330_vm4, %v1109_v49, 0 }
  0xcb   : > { %v3786_v21 = vunpack.i.l.s16 %v2919_v55  ;;  %v3705_v58 = vunpack.i.l.s16 %v2127_v37 }
  0xcc   : > { %v1998_v53 = vsel %vm318_vm2, %v1997_v12, %v1996_v16  ;;  %v2117_v16 = vld [vmem:[%s3993_s6 + $0x18] sm:$0x4] }
  0xcd   : > { %3560 = vmatmul.msk.bf16.vlgmr.msrb.gmra.mxu0 %vm326_vm5, %v4171_v63  ;;  %v2000_v50 = vsel %vm321_vm3, %v1999_v36, %v1998_v53  ;;  %v2930_v30 = vrot.slane %v3786_v21, 7  ;;  %v2126_v36 = vunpack.c.l.b16 %v2114_v6  ;;  %v2129_v53 = vunpack.c.l.b16 %v2117_v16 }
  0xce   : > { %3580 = vmatmul.msk.bf16.vlgmr.msra.gmra.mxu3 %vm326_vm5, %v4134_v25  ;;  %917 = vmatpush.bf16.msrb.mxu0 %v4296_v48  ;;  %v2355_v48 = vrot.slane %v4259_v13, 5  ;;  %v4386_v0 = vpack.c.b16 %v2000_v50, %v2000_v50  ;;  %v1135_v6 = vsel %vm330_vm4, %v4067_v40, 0 }
  0xcf   : > { %v3704_v56 = vunpack.i.l.s16 %v2126_v36  ;;  %v3707_v61 = vunpack.i.l.s16 %v2129_v53  ;;  %1144 = vmatpush.bf16.msra.mxu3 %v1135_v6  ;;  %v1449_v36 = vsel %vm330_vm4, %v4141_v34, 0 }
  0xd0   : > { %v2356_v32 = vsel %vm318_vm2, %v2355_v48, %v2354_v28  ;;  %2019 = vrot.lane.b32.xlu1 %v4386_v0, %s3923_s13  ;;  %v2857_v48 = vsel %vm318_vm2, %v2856_v7, %v2855_v17  ;;  %v1077_v28 = vsel %vm330_vm4, %v1075_v5, 0  ;;  %v2139_v5 = vrot.slane %v3705_v58, 4 }
  0xd1   : > { %v2358_v13 = vsel %vm321_vm3, %v2357_v29, %v2356_v32  ;;  %v2859_v22 = vsel %vm321_vm3, %v2858_v8, %v2857_v48  ;;  %v2934_v32 = vrot.slane %v3788_v27, 5  ;;  %v2143_v17 = vrot.slane %v3707_v61, 2  ;;  %v1431_v37 = vpop.permute.xlu0 %1430 }
  0xd2   : > { %v4373_v39 = vpack.c.b16 %v2358_v13, %v2358_v13  ;;  %v4396_v29 = vpack.c.b16 %v2859_v22, %v2859_v22  ;;  %v2116_v13 = vld [vmem:[%s3993_s6 + $0x10] sm:$0x4]  ;;  %v3070_v22 = vrot.slane %v3788_v27, 6  ;;  %v1152_v27 = vpop.permute.xlu2 %1151  ;;  %v1305_v40 = vpop.permute.xlu1 %1304  ;;  %v1433_v16 = vsel %vm330_vm4, %v1431_v37, 0  ;;  %s3535_s6 = sshll.u32 %s3904_s15, 3 }
  0xd3   : > { %v2128_v52 = vunpack.c.l.b16 %v2116_v13  ;;  %v1307_v13 = vsel %vm330_vm4, %v1305_v40, 0 }
  0xd4   : > { %2377 = vrot.lane.b32.xlu0 %v4373_v39, %s3923_s13  ;;  %2895 = vrot.lane.b32.xlu2 %v4396_v29, %s3924_s14 }
  0xd5   : > { %3562 = vmatmul.msk.bf16.vlgmr.msrb.gmra.mxu2 %vm326_vm5, %v4194_v19  ;;  %3569 = vmatmul.msk.bf16.vlgmr.msra.gmra.mxu1 %vm326_vm5, %v4199_v20  ;;  %v3706_v50 = vunpack.i.l.s16 %v2128_v52 }
  0xd6   : > { %960 = vmatpush.bf16.msrb.mxu2 %v951_v46  ;;  %1102 = vmatpush.bf16.msra.mxu1 %v1093_v59  ;;  %v2918_v46 = vunpack.c.l.b16 %v2833_v9  ;;  %v2920_v59 = vunpack.c.l.b16 %v2835_v42  ;;  %v2138_v42 = vrot.slane %v3704_v56, 5 }
  0xd7   : > { %v2141_v8 = vrot.slane %v3706_v50, 3 }
  0xd8   : > { %v3785_v51 = vunpack.i.l.s16 %v2918_v46  ;;  %v3787_v24 = vunpack.i.l.s16 %v2920_v59  ;;  %2038 = vrot.lane.b32.xlu1 %v4386_v0, %s3924_s14  ;;  %v2140_v55 = vsel %vm315_vm1, %v2139_v5, %v2138_v42  ;;  %v1173_v59 = vsel %vm330_vm4, %v1171_v60, 0 }
  0xd9   : > { %v2142_v23 = vsel %vm318_vm2, %v2141_v8, %v2140_v55  ;;  %v1544_v52 = vpop.permute.xlu0 %1543 }
  0xda   : > { %v2932_v31 = vrot.slane %v3787_v24, 6  ;;  %v2931_v12 = vsel %vm315_vm1, %v2930_v30, %v3785_v51  ;;  %v3066_v9 = vrot.slane %v3785_v51, 1  ;;  %v3068_v46 = vrot.slane %v3787_v24, 7  ;;  %v1465_v34 = vpop.permute.xlu2 %1464  ;;  %v1324_v58 = vpop.permute.xlu1 %1323 }
  0xdb   : > { %v2144_v51 = vsel %vm321_vm3, %v2143_v17, %v2142_v23  ;;  %v1467_v53 = vsel %vm330_vm4, %v1465_v34, 0  ;;  %v1546_v56 = vsel %vm330_vm4, %v1544_v52, 0  ;;  %v1326_v49 = vsel %vm330_vm4, %v1324_v58, 0 }
  0xdc   : > { %v2933_v38 = vsel %vm318_vm2, %v2932_v31, %v2931_v12  ;;  %2538 = vrot.lane.b32.xlu0 %v4314_v2, %s3924_s14  ;;  %v3067_v48 = vsel %vm315_vm1, %v3786_v21, %v3066_v9  ;;  %v4430_v24 = vpack.c.b16 %v2144_v51, %v2144_v51  ;;  %v1154_v31 = vsel %vm330_vm4, %v1152_v27, 0 }
  0xdd   : > { %3568 = vmatmul.msk.bf16.vlgmr.msra.gmra.mxu0 %vm326_vm5, %v4215_v35  ;;  %v2935_v47 = vsel %vm321_vm3, %v2934_v32, %v2933_v38  ;;  %v1288_v32 = vsel %vm330_vm4, %v4126_v18, 0  ;;  %v362_v18 = vpop.f32.mrf.mxu1  ;;  %v412_v38 = vpop.f32.mrf.mxu3  ;;  %v1645_v9 = vsel %vm330_vm4, %v4243_v62, 0 }
  0xde   : > { %3584 = vmatmul.msk.bf16.vlgmr.msrb.gmra.mxu3 %vm326_vm5, %v4224_v44  ;;  %1086 = vmatpush.bf16.msra.mxu0 %v1077_v28  ;;  %v4415_v7 = vpack.c.b16 %v2935_v47, %v2935_v47  ;;  %v3069_v28 = vsel %vm318_vm2, %v3068_v46, %v3067_v48 }
  0xdf   : > { %v3071_v21 = vsel %vm321_vm3, %v3070_v22, %v3069_v28  ;;  %1243 = vmatpush.bf16.msrb.mxu3 %v1135_v6 }
  0xe0   : > { %2954 = vrot.lane.b32.xlu2 %v4415_v7, %s3923_s13  ;;  %2180 = vrot.lane.b32.xlu1 %v4430_v24, %s3924_s14  ;;  %v4437_v30 = vpack.c.b16 %v3071_v21, %v3071_v21 }
  0xe2   : > { %v1525_v50 = vpop.permute.xlu2 %1524 }
  0xe3   : > { %v1527_v42 = vsel %vm330_vm4, %v1525_v50, 0 }
  0xe4   : > { %2582 = vrot.lane.b32.xlu0 %v4336_v26, %s3923_s13 }
  0xe5   : > { %3579 = vmatmul.msk.bf16.vlgmr.msra.gmra.mxu2 %vm326_vm5, %v4264_v14  ;;  %3582 = vmatmul.msk.bf16.vlgmr.msrb.gmra.mxu1 %vm326_vm5, %v4269_v15  ;;  %v364_v12 = vpop.f32.mrf.mxu1  ;;  %v4482_v47 = vpop.f32.mrf.mxu3 }
  0xe6   : > { %1120 = vmatpush.bf16.msra.mxu2 %v1111_v43  ;;  %1182 = vmatpush.bf16.msrb.mxu1 %v1173_v59 }
  0xe8   : > { %3090 = vrot.lane.b32.xlu2 %v4437_v30, %s3923_s13  ;;  %2146 = vrot.lane.b32.xlu1 %v4430_v24, %s3923_s13 }
  0xea   : > { %v1823_v58 = vpop.permute.xlu2 %1822 }
  0xec   : > { %2753 = vrot.lane.b32.xlu0 %v4360_v11, %s3924_s14 }
  0xed   : > { %3581 = vmatmul.msk.bf16.vlgmr.msrb.gmra.mxu0 %vm326_vm5, %v4301_v54  ;;  %v524_v61 = vpop.f32.mrf.mxu3 }
  0xee   : > { %1163 = vmatpush.bf16.msrb.mxu0 %v1154_v31  ;;  %3600 = vmatmul.msk.bf16.vlgmr.msra.gmra.mxu3 %vm326_vm5, %v4112_v57 }
  0xef   : > { %1335 = vmatpush.bf16.msra.mxu3 %v1326_v49 }
  0xf0   : > { %2240 = vrot.lane.b32.xlu1 %v4293_v45, %s3923_s13 }
  0xf4   : > { %2861 = vrot.lane.b32.xlu0 %v4396_v29, %s3923_s13  ;;  %s4506_s13 = scalar_lea.vmem %s4003_s12, %s3535_s6 }
  0xf5   : > { %3583 = vmatmul.msk.bf16.vlgmr.msrb.gmra.mxu2 %vm326_vm5, %v4321_v4  ;;  %3598 = vmatmul.msk.bf16.vlgmr.msra.gmra.mxu1 %vm326_vm5, %v4072_v41 }
  0xf6   : > { %1230 = vmatpush.bf16.msrb.mxu2 %v1154_v31  ;;  %1297 = vmatpush.bf16.msra.mxu1 %v1288_v32 }
  0xf8   : > { %2396 = vrot.lane.b32.xlu1 %v4373_v39, %s3924_s14 }
  0xfc   : > { %2973 = vrot.lane.b32.xlu0 %v4415_v7, %s3924_s14 }
  0xfd   : > { %3597 = vmatmul.msk.bf16.vlgmr.msra.gmra.mxu0 %vm326_vm5, %v4171_v63 }
  0xfe   : > { %1256 = vmatpush.bf16.msra.mxu0 %v1173_v59  ;;  %3613 = vmatmul.msk.bf16.vlgmr.msrb.gmra.mxu3 %vm326_vm5, %v4134_v25 }
 0x104   : > { %3109 = vrot.lane.b32.xlu0 %v4437_v30, %s3924_s14  ;;  %s3925_s14 = smov 32  }
 0x105   : > { %3599 = vmatmul.msk.bf16.vlgmr.msra.gmra.mxu2 %vm326_vm5, %v4194_v19  ;;  %3602 = vmatmul.msk.bf16.vlgmr.msrb.gmra.mxu1 %vm326_vm5, %v4199_v20 }
 0x106   : > { %1316 = vmatpush.bf16.msra.mxu2 %v1307_v13  ;;  %1458 = vmatpush.bf16.msrb.mxu1 %v1449_v36 }
 0x10d   : > { %3601 = vmatmul.msk.bf16.vlgmr.msrb.gmra.mxu0 %vm326_vm5, %v4215_v35 }
 0x10e   : > { %1442 = vmatpush.bf16.msrb.mxu0 %v1433_v16  ;;  %3621 = vmatmul.msk.bf16.vlgmr.msra.gmra.mxu3 %vm326_vm5, %v4224_v44 }
 0x10f   : > { %v1662_v62 = vpop.permute.xlu1 %1661 }
 0x110   : > { %v1664_v40 = vsel %vm330_vm4, %v1662_v62, 0 }
 0x115   : > { %3612 = vmatmul.msk.bf16.vlgmr.msrb.gmra.mxu2 %vm326_vm5, %v4264_v14  ;;  %3619 = vmatmul.msk.bf16.vlgmr.msra.gmra.mxu1 %vm326_vm5, %v4269_v15 }
 0x116   : > { %1476 = vmatpush.bf16.msrb.mxu2 %v1467_v53  ;;  %1555 = vmatpush.bf16.msra.mxu1 %v1546_v56 }
 0x119   : > { %v1789_v38 = vpop.permute.xlu1 %1788 }
 0x11a   : > { %v343_v60 = vpop.f32.mrf.mxu0 }
 0x11b   : > { %v363_v43 = vadd.f32 %v362_v18, %v343_v60 }
 0x11d   : > { %3614 = vmatmul.msk.bf16.vlgmr.msra.gmra.mxu0 %vm326_vm5, %v4301_v54 }
 0x11e   : > { %1536 = vmatpush.bf16.msra.mxu0 %v1527_v42 }
 0x121   : > { %v1886_v50 = vpop.permute.xlu1 %1885 }
 0x122   : > { %v345_v5 = vpop.f32.mrf.mxu0  ;;  %v454_v8 = vpop.f32.mrf.mxu1 }
 0x125   : > { %3620 = vmatmul.msk.bf16.vlgmr.msra.gmra.mxu2 %vm326_vm5, %v4321_v4  ;;  %3635 = vmatmul.msk.bf16.vlgmr.msrb.gmra.mxu1 %vm326_vm5, %v4072_v41 }
 0x126   : > { %1603 = vmatpush.bf16.msra.mxu2 %v1527_v42  ;;  %1654 = vmatpush.bf16.msrb.mxu1 %v1645_v9  ;;  %v1888_v9 = vsel %vm330_vm4, %v1886_v50, 0 }
 0x128   : > { %v383_v55 = vpop.f32.mrf.mxu2 }
 0x129   : > { %v387_v17 = vadd.f32 %v383_v55, %v363_v43  ;;  %v1825_v43 = vsel %vm330_vm4, %v1823_v58, 0 }
 0x12a   : > { %v432_v46 = vpop.f32.mrf.mxu0  ;;  %v456_v59 = vpop.f32.mrf.mxu1 }
 0x12b   : > { %v414_v23 = vadd.f32 %v410_v10, %v387_v17  ;;  %v1807_v10 = vsel %vm330_vm4, %v4210_v33, 0  ;;  %v1508_v33 = vsel %vm330_vm4, %v4175_v1, 0  ;;  %v1791_v1 = vsel %vm330_vm4, %v1789_v38, 0  ;;  %v1867_v17 = vpop.permute.xlu2 %1866 }
 0x12c   : > { %1517 = vmatpush.bf16.msrb.mxu3 %v1508_v33 }
 0x12d   : > { %v436_v48 = vadd.f32 %v432_v46, %v414_v23  ;;  %3634 = vmatmul.msk.bf16.vlgmr.msrb.gmra.mxu0 %vm326_vm5, %v4171_v63 }
 0x12e   : > { %1629 = vmatpush.bf16.msrb.mxu0 %v1546_v56 }
 0x12f   : > { %v458_v41 = vadd.f32 %v454_v8, %v436_v48  ;;  %3641 = vmatmul.msk.bf16.vlgmr.msrb.gmra.mxu3 %vm326_vm5, %v4112_v57 }
 0x130   : > { %v385_v22 = vpop.f32.mrf.mxu2  ;;  %1616 = vmatpush.bf16.msra.mxu3 %v1508_v33 }
 0x131   : > { %v4508_v51 = vpop.f32.mrf.mxu3  ;;  %v460_v28 = vsel %vm459_vm6, %v458_v41, 0.0  ;;  %486 = vst.msk [vmem:[%s4506_s13] sm:$0x1] %vm485_vm7, %v458_v41  ;;  %v471_v21 = vrot.slane %v458_v41, 2  ;;  %v470_v27 = vrot.slane %v458_v41, 1  ;;  %v472_v6 = vrot.slane %v458_v41, 3 }
 0x132   : > { %v434_v31 = vpop.f32.mrf.mxu0  ;;  %461 = vadd.xlane.f32.xlu2 %v460_v28  ;;  %v581_v32 = vpop.f32.mrf.mxu1  ;;  %v474_v18 = vrot.slane %v458_v41, 5  ;;  %v473_v12 = vrot.slane %v458_v41, 4  ;;  %v476_v13 = vrot.slane %v458_v41, 7  ;;  %v464_v36 = vmul.f32 %v458_v41, %v458_v41 }
 0x133   : > { %488 = vst.msk [vmem:[%s4506_s13 + $0x20] sm:$0x1] %vm485_vm7, %v471_v21  ;;  %v475_v37 = vrot.slane %v458_v41, 6  ;;  %v1869_v41 = vsel %vm330_vm4, %v1867_v17, 0 }
 0x134   : > { %487 = vst.msk [vmem:[%s4506_s13 + $0x10] sm:$0x1] %vm485_vm7, %v470_v27  ;;  %v465_v52 = vsel %vm459_vm6, %v464_v36, 0.0 }
 0x135   : > { %3636 = vmatmul.msk.bf16.vlgmr.msrb.gmra.mxu2 %vm326_vm5, %v4194_v19  ;;  %3643 = vmatmul.msk.bf16.vlgmr.msra.gmra.mxu1 %vm326_vm5, %v4199_v20  ;;  %489 = vst.msk [vmem:[%s4506_s13 + $0x30] sm:$0x1] %vm485_vm7, %v472_v6 }
 0x136   : > { %1673 = vmatpush.bf16.msrb.mxu2 %v1664_v40  ;;  %1816 = vmatpush.bf16.msra.mxu1 %v1807_v10  ;;  %491 = vst.msk [vmem:[%s4506_s13 + $0x50] sm:$0x1] %vm485_vm7, %v474_v18  ;;  %v2003_v10 = vsel %vm330_vm4, %v4386_v0, 0 }
 0x137   : > { %490 = vst.msk [vmem:[%s4506_s13 + $0x40] sm:$0x1] %vm485_vm7, %v473_v12  ;;  %v4575_v12 = vld [vmem:[%s5440_s1] sm:$0xf] }
 0x138   : > { %v506_v16 = vpop.f32.mrf.mxu2  ;;  %493 = vst.msk [vmem:[%s4506_s13 + $0x70] sm:$0x1] %vm485_vm7, %v476_v13 }
 0x139   : > { %v627_v34 = vpop.f32.mrf.mxu3  ;;  %492 = vst.msk [vmem:[%s4506_s13 + $0x60] sm:$0x1] %vm485_vm7, %v475_v37  ;;  %v523_v49 = vadd.f32 %v4482_v47, %v506_v16 }
 0x13a   : > { %v538_v53 = vpop.f32.mrf.mxu0  ;;  %466 = vadd.xlane.f32.xlu2 %v465_v52  ;;  %v583_v56 = vpop.f32.mrf.mxu1 }
 0x13b   : > { %v542_v8 = vadd.f32 %v538_v53, %v523_v49 }
 0x13d   : > { %3642 = vmatmul.msk.bf16.vlgmr.msra.gmra.mxu0 %vm326_vm5, %v4215_v35  ;;  %v585_v57 = vadd.f32 %v581_v32, %v542_v8  ;;  %v1681_v32 = vpop.permute.xlu0 %1680 }
 0x13e   : > { %1800 = vmatpush.bf16.msra.mxu0 %v1791_v1  ;;  %v1683_v40 = vsel %vm330_vm4, %v1681_v32, 0 }
 0x13f   : > { %3654 = vmatmul.msk.bf16.vlgmr.msra.gmra.mxu3 %vm326_vm5, %v4134_v25 }
 0x140   : > { %v508_v60 = vpop.f32.mrf.mxu2  ;;  %1692 = vmatpush.bf16.msrb.mxu3 %v1683_v40 }
 0x141   : > { %v807_v61 = vpop.f32.mrf.mxu3 }
 0x142   : > { %v540_v42 = vpop.f32.mrf.mxu0  ;;  %v749_v5 = vpop.f32.mrf.mxu1 }
 0x143   : > { %v2020_v62 = vpop.permute.xlu1 %2019 }
 0x145   : > { %3653 = vmatmul.msk.bf16.vlgmr.msra.gmra.mxu2 %vm326_vm5, %v4264_v14  ;;  %3656 = vmatmul.msk.bf16.vlgmr.msrb.gmra.mxu1 %vm326_vm5, %v4269_v15 }
 0x146   : > { %1834 = vmatpush.bf16.msra.mxu2 %v1825_v43  ;;  %1897 = vmatpush.bf16.msrb.mxu1 %v1888_v9 }
 0x148   : > { %v603_v47 = vpop.f32.mrf.mxu2 }
 0x149   : > { %v809_v55 = vpop.f32.mrf.mxu3  ;;  %v607_v46 = vadd.f32 %v603_v47, %v585_v57  ;;  %v1850_v57 = vsel %vm330_vm4, %v4247_v3, 0  ;;  %v2260_v3 = vpop.permute.xlu2 %2259 }
 0x14a   : > { %v733_v59 = vpop.f32.mrf.mxu0  ;;  %v751_v23 = vpop.f32.mrf.mxu1  ;;  %1859 = vmatpush.bf16.msra.mxu3 %v1850_v57 }
 0x14b   : > { %v4552_v48 = vadd.f32 %v4508_v51, %v607_v46  ;;  %v750_v13 = vadd.f32 %v749_v5, %v733_v59  ;;  %v2039_v37 = vpop.permute.xlu1 %2038 }
 0x14c   : > { %v2041_v17 = vsel %vm330_vm4, %v2039_v37, 0 }
 0x14d   : > { %3655 = vmatmul.msk.bf16.vlgmr.msrb.gmra.mxu0 %vm326_vm5, %v4301_v54  ;;  %v630_v22 = vsel %vm459_vm6, %v4552_v48, 0.0  ;;  %v647_v28 = vperm.slane %v4552_v48, 0  ;;  %v634_v21 = vmul.f32 %v4552_v48, %v4552_v48  ;;  %v641_v31 = vrot.slane %v4552_v48, 2 }
 0x14e   : > { %1878 = vmatpush.bf16.msrb.mxu0 %v1869_v41  ;;  %631 = vadd.xlane.f32.xlu2 %v630_v22  ;;  %v642_v16 = vrot.slane %v4552_v48, 3  ;;  %v640_v60 = vrot.slane %v4552_v48, 1  ;;  %v643_v5 = vrot.slane %v4552_v48, 4  ;;  %v644_v47 = vrot.slane %v4552_v48, 5 }
 0x14f   : > { %655 = vrot.lane.b32.xlu1 %v647_v28, %s3925_s14  ;;  %v635_v25 = vsel %vm459_vm6, %v634_v21, 0.0  ;;  %v649_v36 = vperm.slane %v641_v31, 0  ;;  %3658 = vmatmul.msk.bf16.vlgmr.msrb.gmra.mxu3 %vm326_vm5, %v4224_v44 }
 0x150   : > { %v605_v51 = vpop.f32.mrf.mxu2  ;;  %636 = vadd.xlane.f32.xlu0 %v635_v25  ;;  %v650_v56 = vperm.slane %v642_v16, 0  ;;  %v648_v8 = vperm.slane %v640_v60, 0  ;;  %v651_v43 = vperm.slane %v643_v5, 0  ;;  %1958 = vmatpush.bf16.msrb.mxu3 %v1850_v57  ;;  %v646_v25 = vrot.slane %v4552_v48, 7 }
 0x151   : > { %v4564_v27 = vpop.f32.mrf.mxu3 }
 0x152   : > { %v735_v6 = vpop.f32.mrf.mxu0  ;;  %v845_v18 = vpop.f32.mrf.mxu1 }
 0x153   : > { %v2181_v49 = vpop.permute.xlu1 %2180 }
 0x154   : > { %v2183_v40 = vsel %vm330_vm4, %v2181_v49, 0 }
 0x155   : > { %3657 = vmatmul.msk.bf16.vlgmr.msrb.gmra.mxu2 %vm326_vm5, %v4321_v4  ;;  %3672 = vmatmul.msk.bf16.vlgmr.msra.gmra.mxu1 %vm326_vm5, %v4575_v12 }
 0x156   : > { %1945 = vmatpush.bf16.msrb.mxu2 %v1869_v41  ;;  %2012 = vmatpush.bf16.msra.mxu1 %v2003_v10  ;;  %v652_v41 = vperm.slane %v644_v47, 0  ;;  %v2262_v10 = vsel %vm330_vm4, %v2260_v3, 0 }
 0x157   : > { %659 = vrot.lane.b32.xlu1 %v649_v36, %s3925_s14 }
 0x158   : > { %v767_v0 = vpop.f32.mrf.mxu2 }
 0x159   : > { %v908_v33 = vpop.f32.mrf.mxu3  ;;  %v771_v38 = vadd.f32 %v767_v0, %v750_v13  ;;  %v4632_v13 = vpop.permute.xlu2 %2504 }
 0x15a   : > { %v826_v34 = vpop.f32.mrf.mxu0  ;;  %v847_v52 = vpop.f32.mrf.mxu1 }
 0x15b   : > { %v811_v53 = vadd.f32 %v807_v61, %v771_v38  ;;  %v2165_v61 = vsel %vm330_vm4, %v4430_v24, 0 }
 0x15d   : > { %3671 = vmatmul.msk.bf16.vlgmr.msra.gmra.mxu0 %vm326_vm5, %v4171_v63  ;;  %v830_v1 = vadd.f32 %v826_v34, %v811_v53  ;;  %v4660_v53 = vld [vmem:[%s5440_s1 + $0x18] sm:$0xf] }
 0x15e   : > { %1971 = vmatpush.bf16.msra.mxu0 %v1888_v9  ;;  %v2022_v9 = vsel %vm330_vm4, %v2020_v62, 0  ;;  %v4613_v62 = vld [vmem:[%s5440_s1 + $0xc] sm:$0xf] }
 0x15f   : > { %661 = vrot.lane.b32.xlu1 %v650_v56, %s3925_s14  ;;  %v4586_v58 = vadd.f32 %v845_v18, %v830_v1  ;;  %3674 = vmatmul.msk.bf16.vlgmr.msra.gmra.mxu3 %vm326_vm5, %v4613_v62  ;;  %v654_v18 = vperm.slane %v646_v25, 0  ;;  %v2378_v1 = vpop.permute.xlu0 %2377 }
 0x160   : > { %v769_v50 = vpop.f32.mrf.mxu2  ;;  %2050 = vmatpush.bf16.msra.mxu3 %v2041_v17 }
 0x161   : > { %v4589_v42 = vpop.f32.mrf.mxu3  ;;  %3571 = vst.msk [vmem:[%s4506_s13 + $0x1] sm:$0x1] %vm485_vm7, %v4586_v58  ;;  %v862_v32 = vrot.slane %v4586_v58, 2  ;;  %v864_v6 = vrot.slane %v4586_v58, 4  ;;  %v865_v37 = vrot.slane %v4586_v58, 5  ;;  %v867_v0 = vrot.slane %v4586_v58, 7  ;;  %v4668_v50 = vpop.permute.xlu2 %2601 }
 0x162   : > { %v828_v44 = vpop.f32.mrf.mxu0  ;;  %v943_v63 = vpop.f32.mrf.mxu1  ;;  %v854_v25 = vmul.f32 %v4586_v58, %v4586_v58 }
 0x163   : > { %3573 = vst.msk [vmem:[%s4506_s13 + $0x21] sm:$0x1] %vm485_vm7, %v862_v32  ;;  %v2361_v44 = vsel %vm330_vm4, %v4373_v39, 0 }
 0x164   : > { %3575 = vst.msk [vmem:[%s4506_s13 + $0x41] sm:$0x1] %vm485_vm7, %v864_v6  ;;  %v855_v6 = vsel %vm459_vm6, %v854_v25, 0.0 }
 0x165   : > { %3673 = vmatmul.msk.bf16.vlgmr.msra.gmra.mxu2 %vm326_vm5, %v4194_v19  ;;  %3676 = vmatmul.msk.bf16.vlgmr.msrb.gmra.mxu1 %vm326_vm5, %v4199_v20  ;;  %v645_v19 = vrot.slane %v4552_v48, 6  ;;  %v2147_v20 = vpop.permute.xlu1 %2146  ;;  %v863_v48 = vrot.slane %v4586_v58, 3  ;;  %3576 = vst.msk [vmem:[%s4506_s13 + $0x51] sm:$0x1] %vm485_vm7, %v865_v37  ;;  %v4735_v37 = vld [vmem:[%s5440_s1 + $0x10] sm:$0xf] }
 0x166   : > { %657 = vrot.lane.b32.xlu2 %v648_v8, %s3925_s14  ;;  %2174 = vmatpush.bf16.msrb.mxu1 %v2165_v61  ;;  %v2149_v23 = vsel %vm330_vm4, %v2147_v20, 0  ;;  %3578 = vst.msk [vmem:[%s4506_s13 + $0x71] sm:$0x1] %vm485_vm7, %v867_v0  ;;  %v850_v0 = vsel %vm459_vm6, %v4586_v58, 0.0 }
 0x167   : > { %663 = vrot.lane.b32.xlu1 %v651_v43, %s3925_s14  ;;  %2031 = vmatpush.bf16.msra.mxu2 %v2022_v9  ;;  %v653_v28 = vperm.slane %v645_v19, 0  ;;  %3574 = vst.msk [vmem:[%s4506_s13 + $0x31] sm:$0x1] %vm485_vm7, %v863_v48  ;;  %v2539_v61 = vpop.permute.xlu0 %2538 }
 0x168   : > { %v893_v24 = vpop.f32.mrf.mxu2 }
 0x169   : > { %v983_v55 = vpop.f32.mrf.mxu3  ;;  %v907_v22 = vadd.f32 %v4564_v27, %v893_v24  ;;  %v861_v27 = vrot.slane %v4586_v58, 1  ;;  %v4676_v9 = vpop.permute.xlu2 %2734 }
 0x16a   : > { %v919_v46 = vpop.f32.mrf.mxu0  ;;  %v945_v59 = vpop.f32.mrf.mxu1  ;;  %v4689_v55 = vld [vmem:[%s5440_s1 + $0x4] sm:$0xf] }
 0x16b   : > { %v923_v51 = vadd.f32 %v919_v46, %v907_v22  ;;  %3572 = vst.msk [vmem:[%s4506_s13 + $0x11] sm:$0x1] %vm485_vm7, %v861_v27 }
 0x16d   : > { %3675 = vmatmul.msk.bf16.vlgmr.msrb.gmra.mxu0 %vm326_vm5, %v4215_v35  ;;  %v866_v35 = vrot.slane %v4586_v58, 6  ;;  %v947_v36 = vadd.f32 %v943_v63, %v923_v51  ;;  %v2241_v33 = vpop.permute.xlu1 %2240  ;;  %v4709_v51 = vld [vmem:[%s5440_s1 + $0x8] sm:$0xf]  ;;  %v4754_v58 = vld [vmem:[%s5440_s1 + $0x24] sm:$0xf] }
 0x16e   : > { %665 = vrot.lane.b32.xlu2 %v652_v41, %s3925_s14  ;;  %2158 = vmatpush.bf16.msrb.mxu0 %v2149_v23  ;;  %v2243_v52 = vsel %vm330_vm4, %v2241_v33, 0 }
 0x16f   : > { %667 = vrot.lane.b32.xlu1 %v653_v28, %s3925_s14  ;;  %3577 = vst.msk [vmem:[%s4506_s13 + $0x61] sm:$0x1] %vm485_vm7, %v866_v35  ;;  %3687 = vmatmul.msk.bf16.vlgmr.msrb.gmra.mxu3 %vm326_vm5, %v4660_v53  ;;  %v2583_v3 = vpop.permute.xlu0 %2582  ;;  %v2380_v28 = vsel %vm330_vm4, %v2378_v1, 0 }
 0x170   : > { %v895_v21 = vpop.f32.mrf.mxu2 }
 0x171   : > { %v1146_v49 = vpop.f32.mrf.mxu3  ;;  %v4699_v22 = vpop.permute.xlu2 %2895  ;;  %v2523_v21 = vsel %vm330_vm4, %v4314_v2, 0  ;;  %v2224_v2 = vsel %vm330_vm4, %v4293_v45, 0  ;;  %v2507_v45 = vsel %vm330_vm4, %v4632_v13, 0  ;;  %v2541_v13 = vsel %vm330_vm4, %v2539_v61, 0 }
 0x172   : > { %v921_v31 = vpop.f32.mrf.mxu0  ;;  %v1104_v38 = vpop.f32.mrf.mxu1  ;;  %2233 = vmatpush.bf16.msrb.mxu3 %v2224_v2 }
 0x173   : > { %v4716_v31 = vld [vmem:[%s5440_s1 + $0x14] sm:$0xf] }
 0x175   : > { %3686 = vmatmul.msk.bf16.vlgmr.msrb.gmra.mxu2 %vm326_vm5, %v4264_v14  ;;  %3693 = vmatmul.msk.bf16.vlgmr.msra.gmra.mxu1 %vm326_vm5, %v4269_v15  ;;  %v2397_v27 = vpop.permute.xlu1 %2396 }
 0x176   : > { %2271 = vmatpush.bf16.msra.mxu1 %v2262_v10  ;;  %669 = vrot.lane.b32.xlu2 %v654_v18, %s3925_s14  ;;  %v2399_v18 = vsel %vm330_vm4, %v2397_v27, 0 }
 0x177   : > { %2192 = vmatpush.bf16.msrb.mxu2 %v2183_v40 }
 0x178   : > { %v962_v14 = vpop.f32.mrf.mxu2 }
 0x179   : > { %v966_v15 = vadd.f32 %v962_v14, %v947_v36  ;;  %v1148_v63 = vpop.f32.mrf.mxu3  ;;  %v4730_v36 = vpop.permute.xlu2 %2954 }
 0x17a   : > { %v1088_v16 = vpop.f32.mrf.mxu0 }
 0x17b   : > { %v4654_v34 = vadd.f32 %v4589_v42, %v966_v15  ;;  %v1106_v42 = vpop.f32.mrf.mxu1 }
 0x17c   : > { %v2585_v42 = vsel %vm330_vm4, %v2583_v3, 0 }
 0x17d   : > { %3688 = vmatmul.msk.bf16.vlgmr.msra.gmra.mxu0 %vm326_vm5, %v4301_v54  ;;  %v986_v56 = vsel %vm459_vm6, %v4654_v34, 0.0  ;;  %v1105_v54 = vadd.f32 %v1104_v38, %v1088_v16  ;;  %v997_v24 = vrot.slane %v4654_v34, 2  ;;  %v2604_v16 = vsel %vm330_vm4, %v4668_v50, 0 }
 0x17e   : > { %987 = vadd.xlane.f32.xlu0 %v986_v56  ;;  %2252 = vmatpush.bf16.msra.mxu0 %v2243_v52 }
 0x17f   : > { %v1005_v17 = vperm.slane %v997_v24, 0 }
 0x180   : > { %v964_v60 = vpop.f32.mrf.mxu2 }
 0x181   : > { %v1245_v20 = vpop.f32.mrf.mxu3 }
 0x182   : > { %v1090_v5 = vpop.f32.mrf.mxu0 }
 0x183   : > { %v1184_v57 = vpop.f32.mrf.mxu1  ;;  %v996_v5 = vrot.slane %v4654_v34, 1 }
 0x185   : > { %3694 = vmatmul.msk.bf16.vlgmr.msra.gmra.mxu2 %vm326_vm5, %v4321_v4  ;;  %3709 = vmatmul.msk.bf16.vlgmr.msrb.gmra.mxu1 %vm326_vm5, %v4575_v12  ;;  %v4682_v4 = vld [vmem:[%s5440_s1 + $0x2c] sm:$0xf] }
 0x186   : > { %2370 = vmatpush.bf16.msrb.mxu1 %v2361_v44  ;;  %2319 = vmatpush.bf16.msra.mxu2 %v2243_v52  ;;  %v4747_v52 = vld [vmem:[%s5440_s1 + $0x1c] sm:$0xf]  ;;  %v4769_v44 = vld [vmem:[%s5440_s1 + $0x20] sm:$0xf] }
 0x187   : > { %3695 = vmatmul.msk.bf16.vlgmr.msra.gmra.mxu3 %vm326_vm5, %v4682_v4 }
 0x188   : > { %v1122_v8 = vpop.f32.mrf.mxu2  ;;  %2332 = vmatpush.bf16.msra.mxu3 %v2224_v2 }
 0x189   : > { %v1126_v43 = vadd.f32 %v1122_v8, %v1105_v54  ;;  %v1247_v32 = vpop.f32.mrf.mxu3  ;;  %v1004_v8 = vperm.slane %v996_v5, 0 }
 0x18a   : > { %v1165_v39 = vpop.f32.mrf.mxu0 }
 0x18b   : > { %v1150_v47 = vadd.f32 %v1146_v49, %v1126_v43  ;;  %v1186_v23 = vpop.f32.mrf.mxu1  ;;  %v4760_v49 = vpop.permute.xlu2 %3090 }
 0x18d   : > { %3708 = vmatmul.msk.bf16.vlgmr.msrb.gmra.mxu0 %vm326_vm5, %v4689_v55  ;;  %v1169_v19 = vadd.f32 %v1165_v39, %v1150_v47 }
 0x18e   : > { %2345 = vmatpush.bf16.msrb.mxu0 %v2262_v10  ;;  %v4724_v10 = vpop.permute.xlu0 %2753 }
 0x18f   : > { %v4693_v46 = vadd.f32 %v1184_v57, %v1169_v19  ;;  %v999_v19 = vrot.slane %v4654_v34, 4 }
 0x190   : > { %v1124_v59 = vpop.f32.mrf.mxu2 }
 0x191   : > { %3604 = vst.msk [vmem:[%s4506_s13 + $0x2] sm:$0x1] %vm485_vm7, %v4693_v46  ;;  %v1337_v14 = vpop.f32.mrf.mxu3  ;;  %v1200_v24 = vrot.slane %v4693_v46, 1  ;;  %v1202_v39 = vrot.slane %v4693_v46, 3  ;;  %v1206_v47 = vrot.slane %v4693_v46, 7  ;;  %v1003_v59 = vperm.slane %v4654_v34, 0 }
 0x192   : > { %1015 = vrot.lane.b32.xlu0 %v1005_v17, %s3925_s14  ;;  %v1167_v41 = vpop.f32.mrf.mxu0  ;;  %v1205_v17 = vrot.slane %v4693_v46, 6  ;;  %v1201_v23 = vrot.slane %v4693_v46, 2  ;;  %v1189_v32 = vsel %vm459_vm6, %v4693_v46, 0.0 }
 0x193   : > { %v1299_v40 = vpop.f32.mrf.mxu1  ;;  %3605 = vst.msk [vmem:[%s4506_s13 + $0x12] sm:$0x1] %vm485_vm7, %v1200_v24  ;;  %v1203_v41 = vrot.slane %v4693_v46, 4 }
 0x194   : > { %3607 = vst.msk [vmem:[%s4506_s13 + $0x32] sm:$0x1] %vm485_vm7, %v1202_v39 }
 0x195   : > { %3710 = vmatmul.msk.bf16.vlgmr.msrb.gmra.mxu2 %vm326_vm5, %v4709_v51  ;;  %3717 = vmatmul.msk.bf16.vlgmr.msra.gmra.mxu1 %vm326_vm5, %v4716_v31  ;;  %3611 = vst.msk [vmem:[%s4506_s13 + $0x72] sm:$0x1] %vm485_vm7, %v1206_v47 }
 0x196   : > { %2532 = vmatpush.bf16.msra.mxu1 %v2523_v21  ;;  %2389 = vmatpush.bf16.msrb.mxu2 %v2380_v28  ;;  %v4758_v56 = vpop.permute.xlu0 %2861  ;;  %v1204_v28 = vrot.slane %v4693_v46, 5  ;;  %v1007_v21 = vperm.slane %v999_v19, 0  ;;  %3610 = vst.msk [vmem:[%s4506_s13 + $0x62] sm:$0x1] %vm485_vm7, %v1205_v17 }
 0x197   : > { %3715 = vmatmul.msk.bf16.vlgmr.msrb.gmra.mxu3 %vm326_vm5, %v4613_v62  ;;  %3606 = vst.msk [vmem:[%s4506_s13 + $0x22] sm:$0x1] %vm485_vm7, %v1201_v23 }
 0x198   : > { %v1232_v35 = vpop.f32.mrf.mxu2  ;;  %2408 = vmatpush.bf16.msrb.mxu3 %v2399_v18  ;;  %3608 = vst.msk [vmem:[%s4506_s13 + $0x42] sm:$0x1] %vm485_vm7, %v1203_v41  ;;  %v2957_v41 = vsel %vm330_vm4, %v4730_v36, 0 }
 0x199   : > { %856 = vadd.xlane.f32.xlu1 %v855_v6  ;;  %v1339_v1 = vpop.f32.mrf.mxu3  ;;  %v1246_v60 = vadd.f32 %v1245_v20, %v1232_v35  ;;  %v4784_v20 = vld [vmem:[%s5440_s1 + $0x28] sm:$0xf]  ;;  %3609 = vst.msk [vmem:[%s4506_s13 + $0x52] sm:$0x1] %vm485_vm7, %v1204_v28  ;;  %v1001_v6 = vrot.slane %v4654_v34, 6 }
 0x19a   : > { %v1258_v48 = vpop.f32.mrf.mxu0 }
 0x19b   : > { %v1301_v15 = vpop.f32.mrf.mxu1  ;;  %v1262_v54 = vadd.f32 %v1258_v48, %v1246_v60  ;;  %v1009_v18 = vperm.slane %v1001_v6, 0 }
 0x19c   : > { %v2737_v15 = vsel %vm330_vm4, %v4676_v9, 0  ;;  %v2864_v9 = vsel %vm330_vm4, %v4758_v56, 0 }
 0x19d   : > { %3716 = vmatmul.msk.bf16.vlgmr.msra.gmra.mxu0 %vm326_vm5, %v4735_v37  ;;  %v1303_v57 = vadd.f32 %v1299_v40, %v1262_v54 }
 0x19e   : > { %2516 = vmatpush.bf16.msra.mxu0 %v2507_v45  ;;  %v4773_v61 = vpop.permute.xlu0 %2973 }
 0x19f   : > { %851 = vadd.xlane.f32.xlu2 %v850_v0 }
 0x1a0   : > { %v1234_v33 = vpop.f32.mrf.mxu2 }
 0x1a2   : > { %v1260_v38 = vpop.f32.mrf.mxu0 }
 0x1a3   : > { %v2566_v38 = vsel %vm330_vm4, %v4336_v26, 0 }
 0x1a5   : > { %3727 = vmatmul.msk.bf16.vlgmr.msra.gmra.mxu2 %vm326_vm5, %v4747_v52  ;;  %3730 = vmatmul.msk.bf16.vlgmr.msrb.gmra.mxu1 %vm326_vm5, %v4754_v58  ;;  %v462_v63 = vpop.xlane.xlu2 %461 }
 0x1a6   : > { %2613 = vmatpush.bf16.msrb.mxu1 %v2604_v16  ;;  %2550 = vmatpush.bf16.msra.mxu2 %v2541_v13  ;;  %v4803_v2 = vpop.permute.xlu0 %3109  ;;  %v2756_v13 = vsel %vm330_vm4, %v4724_v10, 0  ;;  %v1460_v10 = vpop.f32.mrf.mxu1 }
 0x1a7   : > { %3728 = vmatmul.msk.bf16.vlgmr.msra.gmra.mxu3 %vm326_vm5, %v4660_v53 }
 0x1a8   : > { %v1318_v50 = vpop.f32.mrf.mxu2  ;;  %2575 = vmatpush.bf16.msra.mxu3 %v2566_v38 }
 0x1a9   : > { %v1322_v3 = vadd.f32 %v1318_v50, %v1303_v57 }
 0x1aa   : > { %v1444_v50 = vpop.f32.mrf.mxu0 }
 0x1ab   : > { %v4807_v27 = vadd.f32 %v1337_v14, %v1322_v3  ;;  %v1461_v56 = vadd.f32 %v1460_v10, %v1444_v50  ;;  %v998_v50 = vrot.slane %v4654_v34, 3 }
 0x1ad   : > { %3729 = vmatmul.msk.bf16.vlgmr.msrb.gmra.mxu0 %vm326_vm5, %v4769_v44  ;;  %v467_v25 = vpop.xlane.xlu2 %466  ;;  %v1346_v35 = vmul.f32 %v4807_v27, %v4807_v27  ;;  %v1352_v60 = vrot.slane %v4807_v27, 1  ;;  %v1354_v47 = vrot.slane %v4807_v27, 3  ;;  %v1358_v36 = vrot.slane %v4807_v27, 7 }
 0x1ae   : > { %2594 = vmatpush.bf16.msrb.mxu0 %v2585_v42  ;;  %v1462_v57 = vpop.f32.mrf.mxu1 }
 0x1af   : > { %v1347_v45 = vsel %vm459_vm6, %v1346_v35, 0.0  ;;  %v1360_v54 = vperm.slane %v1352_v60, 0  ;;  %v1362_v3 = vperm.slane %v1354_v47, 0  ;;  %v1006_v60 = vperm.slane %v998_v50, 0 }
 0x1b0   : > { %v1320_v43 = vpop.f32.mrf.mxu2  ;;  %v1359_v47 = vperm.slane %v4807_v27, 0 }
 0x1b1   : > { %v2898_v43 = vsel %vm330_vm4, %v4699_v22, 0  ;;  %v990_v22 = vmul.f32 %v4654_v34, %v4654_v34 }
 0x1b2   : > { %1013 = vrot.lane.b32.xlu1 %v1004_v8, %s3925_s14  ;;  %v1446_v8 = vpop.f32.mrf.mxu0  ;;  %v1519_v39 = vpop.f32.mrf.mxu3 }
 0x1b5   : > { %3731 = vmatmul.msk.bf16.vlgmr.msrb.gmra.mxu2 %vm326_vm5, %v4784_v20  ;;  %3746 = vmatmul.msk.bf16.vlgmr.msra.gmra.mxu1 %vm326_vm5, %v4575_v12 }
 0x1b6   : > { %2661 = vmatpush.bf16.msrb.mxu2 %v2585_v42 }
 0x1b7   : > { %1011 = vrot.lane.b32.xlu2 %v1003_v59, %s3925_s14  ;;  %3732 = vmatmul.msk.bf16.vlgmr.msrb.gmra.mxu3 %vm326_vm5, %v4682_v4 }
 0x1b8   : > { %2674 = vmatpush.bf16.msrb.mxu3 %v2566_v38  ;;  %v1478_v26 = vpop.f32.mrf.mxu2  ;;  %v2976_v38 = vsel %vm330_vm4, %v4773_v61, 0 }
 0x1b9   : > { %v1482_v24 = vadd.f32 %v1478_v26, %v1461_v56  ;;  %v1000_v56 = vrot.slane %v4654_v34, 5 }
 0x1ba   : > { %1019 = vrot.lane.b32.xlu1 %v1007_v21, %s3925_s14  ;;  %v1538_v23 = vpop.f32.mrf.mxu0  ;;  %v1521_v21 = vpop.f32.mrf.mxu3 }
 0x1bb   : > { %v1523_v59 = vadd.f32 %v1519_v39, %v1482_v24 }
 0x1bc   : > { %1190 = vadd.xlane.f32.xlu0 %v1189_v32  ;;  %v1557_v32 = vpop.f32.mrf.mxu1 }
 0x1bd   : > { %3745 = vmatmul.msk.bf16.vlgmr.msra.gmra.mxu0 %vm326_vm5, %v4689_v55  ;;  %v1542_v28 = vadd.f32 %v1538_v23, %v1523_v59 }
 0x1be   : > { %2687 = vmatpush.bf16.msra.mxu0 %v2604_v16 }
 0x1c1   : > { %v656_v40 = vpop.permute.xlu1 %655  ;;  %v632_v48 = vpop.xlane.xlu2 %631 }
 0x1c2   : > { %680 = vst.msk [vmem:[%s4506_s13] sm:$0x1] %vm679_vm8, %v656_v40  ;;  %v4826_v0 = vadd.f32 %v632_v48, %v462_v63  ;;  %1023 = vrot.lane.b32.xlu1 %v1009_v18, %s3925_s14  ;;  %v1480_v63 = vpop.f32.mrf.mxu2  ;;  %v4878_v18 = vadd.f32 %v1557_v32, %v1542_v28  ;;  %v1540_v40 = vpop.f32.mrf.mxu0  ;;  %v1366_v48 = vperm.slane %v1358_v36, 0 }
 0x1c3   : > { %v637_v14 = vpop.xlane.xlu0 %636 }
 0x1c4   : > { %v4829_v33 = vadd.f32 %v637_v14, %v467_v25  ;;  %1348 = vadd.xlane.f32.xlu0 %v1347_v45  ;;  %v991_v25 = vsel %vm459_vm6, %v990_v22, 0.0  ;;  %3645 = vst.msk [vmem:[%s4506_s13 + $0x3] sm:$0x1] %vm485_vm7, %v4878_v18  ;;  %v1618_v45 = vpop.f32.mrf.mxu3  ;;  %v1559_v14 = vpop.f32.mrf.mxu1  ;;  %v1577_v63 = vrot.slane %v4878_v18, 5  ;;  %v1579_v8 = vrot.slane %v4878_v18, 7 }
 0x1c5   : > { %3747 = vmatmul.msk.bf16.vlgmr.msra.gmra.mxu2 %vm326_vm5, %v4709_v51  ;;  %3750 = vmatmul.msk.bf16.vlgmr.msrb.gmra.mxu1 %vm326_vm5, %v4716_v31  ;;  %v1576_v24 = vrot.slane %v4878_v18, 4  ;;  %v1578_v39 = vrot.slane %v4878_v18, 6  ;;  %v1193_v14 = vmul.f32 %v4693_v46, %v4693_v46 }
 0x1c6   : > { %2746 = vmatpush.bf16.msra.mxu2 %v2737_v15  ;;  %3650 = vst.msk [vmem:[%s4506_s13 + $0x53] sm:$0x1] %vm485_vm7, %v1577_v63 }
 0x1c7   : > { %3748 = vmatmul.msk.bf16.vlgmr.msra.gmra.mxu3 %vm326_vm5, %v4613_v62  ;;  %3652 = vst.msk [vmem:[%s4506_s13 + $0x73] sm:$0x1] %vm485_vm7, %v1579_v8 }
 0x1c8   : > { %2765 = vmatpush.bf16.msra.mxu3 %v2756_v13  ;;  %v1342_v13 = vsel %vm459_vm6, %v4807_v27, 0.0  ;;  %3649 = vst.msk [vmem:[%s4506_s13 + $0x43] sm:$0x1] %vm485_vm7, %v1576_v24 }
 0x1c9   : > { %v660_v16 = vpop.permute.xlu1 %659  ;;  %v658_v1 = vpop.permute.xlu2 %657  ;;  %3651 = vst.msk [vmem:[%s4506_s13 + $0x63] sm:$0x1] %vm485_vm7, %v1578_v39 }
 0x1ca   : > { %682 = vst.msk [vmem:[%s4506_s13 + $0x20] sm:$0x1] %vm679_vm8, %v660_v16  ;;  %v4876_v6 = vpop.f32.mrf.mxu2  ;;  %v2718_v16 = vsel %vm330_vm4, %v4360_v11, 0  ;;  %v2938_v11 = vsel %vm330_vm4, %v4415_v7, 0  ;;  %v3112_v7 = vsel %vm330_vm4, %v4803_v2, 0  ;;  %v1008_v2 = vperm.slane %v1000_v56, 0 }
 0x1cb   : > { %681 = vst.msk [vmem:[%s4506_s13 + $0x10] sm:$0x1] %vm679_vm8, %v658_v1  ;;  %v1631_v1 = vpop.f32.mrf.mxu0  ;;  %2727 = vmatpush.bf16.msra.mxu1 %v2718_v16  ;;  %v1194_v16 = vsel %vm459_vm6, %v1193_v14, 0.0 }
 0x1cc   : > { %v1620_v26 = vpop.f32.mrf.mxu3  ;;  %v1656_v61 = vpop.f32.mrf.mxu1 }
 0x1cd   : > { %3749 = vmatmul.msk.bf16.vlgmr.msrb.gmra.mxu0 %vm326_vm5, %v4735_v37 }
 0x1ce   : > { %2873 = vmatpush.bf16.msrb.mxu0 %v2864_v9  ;;  %v2880_v9 = vsel %vm330_vm4, %v4396_v29, 0  ;;  %v3093_v29 = vsel %vm330_vm4, %v4760_v49, 0  ;;  %v1574_v49 = vrot.slane %v4878_v18, 2 }
 0x1cf   : > { %2889 = vmatpush.bf16.msrb.mxu1 %v2880_v9 }
 0x1d0   : > { %3647 = vst.msk [vmem:[%s4506_s13 + $0x23] sm:$0x1] %vm485_vm7, %v1574_v49 }
 0x1d1   : > { %v662_v42 = vpop.permute.xlu1 %661  ;;  %v666_v5 = vpop.permute.xlu2 %665 }
 0x1d2   : > { %683 = vst.msk [vmem:[%s4506_s13 + $0x30] sm:$0x1] %vm679_vm8, %v662_v42  ;;  %v1607_v15 = vpop.f32.mrf.mxu2 }
 0x1d3   : > { %685 = vst.msk [vmem:[%s4506_s13 + $0x50] sm:$0x1] %vm679_vm8, %v666_v5 }
 0x1d4   : > { %v1694_v42 = vpop.f32.mrf.mxu3  ;;  %v1658_v5 = vpop.f32.mrf.mxu1 }
 0x1d5   : > { %3760 = vmatmul.msk.bf16.vlgmr.msrb.gmra.mxu2 %vm326_vm5, %v4747_v52  ;;  %3767 = vmatmul.msk.bf16.vlgmr.msra.gmra.mxu1 %vm326_vm5, %v4754_v58 }
 0x1d6   : > { %2907 = vmatpush.bf16.msrb.mxu2 %v2898_v43  ;;  %2985 = vmatpush.bf16.msra.mxu1 %v2976_v38  ;;  %v1575_v43 = vrot.slane %v4878_v18, 3 }
 0x1d7   : > { %3761 = vmatmul.msk.bf16.vlgmr.msrb.gmra.mxu3 %vm326_vm5, %v4660_v53 }
 0x1d8   : > { %1369 = vrot.lane.b32.xlu0 %v1360_v54, %s3925_s14  ;;  %2947 = vmatpush.bf16.msrb.mxu3 %v2938_v11  ;;  %3648 = vst.msk [vmem:[%s4506_s13 + $0x33] sm:$0x1] %vm485_vm7, %v1575_v43 }
 0x1d9   : > { %v664_v19 = vpop.permute.xlu1 %663  ;;  %v670_v17 = vpop.permute.xlu2 %669 }
 0x1da   : > { %684 = vst.msk [vmem:[%s4506_s13 + $0x40] sm:$0x1] %vm679_vm8, %v664_v19  ;;  %v1675_v10 = vpop.f32.mrf.mxu2  ;;  %v1619_v19 = vadd.f32 %v1618_v45, %v4876_v6 }
 0x1db   : > { %687 = vst.msk [vmem:[%s4506_s13 + $0x70] sm:$0x1] %vm679_vm8, %v670_v17 }
 0x1dc   : > { %v1696_v57 = vpop.f32.mrf.mxu3  ;;  %v1635_v59 = vadd.f32 %v1631_v1, %v1619_v19 }
 0x1dd   : > { %3762 = vmatmul.msk.bf16.vlgmr.msra.gmra.mxu0 %vm326_vm5, %v4769_v44 }
 0x1de   : > { %2966 = vmatpush.bf16.msra.mxu0 %v2957_v41 }
 0x1e0   : > { %1373 = vrot.lane.b32.xlu0 %v1362_v3, %s3925_s14  ;;  %992 = vadd.xlane.f32.xlu2 %v991_v25  ;;  %v1660_v3 = vadd.f32 %v1656_v61, %v1635_v59 }
 0x1e1   : > { %v668_v35 = vpop.permute.xlu1 %667 }
 0x1e2   : > { %686 = vst.msk [vmem:[%s4506_s13 + $0x60] sm:$0x1] %vm679_vm8, %v668_v35  ;;  %v1679_v28 = vadd.f32 %v1675_v10, %v1660_v3 }
 0x1e4   : > { %v4965_v25 = vadd.f32 %v1694_v42, %v1679_v28 }
 0x1e5   : > { %3768 = vmatmul.msk.bf16.vlgmr.msra.gmra.mxu2 %vm326_vm5, %v4784_v20  ;;  %3783 = vmatmul.msk.bf16.vlgmr.msrb.gmra.mxu1 %vm326_vm5, %v4575_v12 }
 0x1e6   : > { %3033 = vmatpush.bf16.msra.mxu2 %v2957_v41  ;;  %v1716_v45 = vperm.slane %v4965_v25, 0  ;;  %v1710_v1 = vrot.slane %v4965_v25, 2  ;;  %v1703_v46 = vmul.f32 %v4965_v25, %v4965_v25  ;;  %v1713_v5 = vrot.slane %v4965_v25, 5 }
 0x1e7   : > { %3769 = vmatmul.msk.bf16.vlgmr.msra.gmra.mxu3 %vm326_vm5, %v4682_v4  ;;  %v1715_v8 = vrot.slane %v4965_v25, 7 }
 0x1e8   : > { %1381 = vrot.lane.b32.xlu0 %v1366_v48, %s3925_s14  ;;  %3046 = vmatpush.bf16.msra.mxu3 %v2938_v11  ;;  %v1718_v10 = vperm.slane %v1710_v1, 0  ;;  %v1721_v56 = vperm.slane %v1713_v5, 0 }
 0x1e9   : > { %v1723_v57 = vperm.slane %v1715_v8, 0 }
 0x1ec   : > { %1343 = vadd.xlane.f32.xlu1 %v1342_v13 }
 0x1ed   : > { %3782 = vmatmul.msk.bf16.vlgmr.msrb.gmra.mxu0 %vm326_vm5, %v4689_v55  ;;  %v1633_v55 = vpop.f32.mrf.mxu0 }
 0x1ee   : > { %3059 = vmatpush.bf16.msrb.mxu0 %v2976_v38  ;;  %v1704_v55 = vsel %vm459_vm6, %v1703_v46, 0.0 }
 0x1f1   : > { %v988_v54 = vpop.xlane.xlu0 %987 }
 0x1f5   : > { %3784 = vmatmul.msk.bf16.vlgmr.msrb.gmra.mxu2 %vm326_vm5, %v4709_v51  ;;  %v1677_v51 = vpop.f32.mrf.mxu2  ;;  %3791 = vmatmul.msk.bf16.vlgmr.msra.gmra.mxu1 %vm326_vm5, %v4716_v31  ;;  %v1802_v31 = vpop.f32.mrf.mxu0 }
 0x1f6   : > { %3102 = vmatpush.bf16.msrb.mxu2 %v3093_v29 }
 0x1f7   : > { %3789 = vmatmul.msk.bf16.vlgmr.msrb.gmra.mxu3 %vm326_vm5, %v4613_v62  ;;  %v1573_v62 = vrot.slane %v4878_v18, 1 }
 0x1f8   : > { %1017 = vrot.lane.b32.xlu2 %v1006_v60, %s3925_s14  ;;  %3121 = vmatpush.bf16.msrb.mxu3 %v3112_v7 }
 0x1f9   : > { %3646 = vst.msk [vmem:[%s4506_s13 + $0x13] sm:$0x1] %vm485_vm7, %v1573_v62 }
 0x1fd   : > { %3790 = vmatmul.msk.bf16.vlgmr.msra.gmra.mxu0 %vm326_vm5, %v4735_v37  ;;  %v1002_v37 = vrot.slane %v4654_v34, 7  ;;  %v1357_v34 = vrot.slane %v4807_v27, 6  ;;  %v1804_v35 = vpop.f32.mrf.mxu0  ;;  %v1836_v40 = vpop.f32.mrf.mxu2 }
 0x1ff   : > { %v1010_v12 = vperm.slane %v1002_v37, 0  ;;  %v1365_v22 = vperm.slane %v1357_v34, 0 }
 0x200   : > { %1021 = vrot.lane.b32.xlu2 %v1008_v2, %s3925_s14  ;;  %v1353_v2 = vrot.slane %v4807_v27, 2 }
 0x202   : > { %v1361_v37 = vperm.slane %v1353_v2, 0 }
 0x204   : > { %v1016_v17 = vpop.permute.xlu0 %1015 }
 0x205   : > { %1367 = vrot.lane.b32.xlu1 %v1359_v47, %s3925_s14  ;;  %3587 = vst.msk [vmem:[%s4506_s13 + $0x21] sm:$0x1] %vm679_vm8, %v1016_v17  ;;  %3801 = vmatmul.msk.bf16.vlgmr.msra.gmra.mxu2 %vm326_vm5, %v4747_v52  ;;  %v1562_v52 = vsel %vm459_vm6, %v4878_v18, 0.0  ;;  %v1838_v26 = vpop.f32.mrf.mxu2  ;;  %v1880_v11 = vpop.f32.mrf.mxu0  ;;  %v1711_v17 = vrot.slane %v4965_v25, 3 }
 0x207   : > { %3802 = vmatmul.msk.bf16.vlgmr.msra.gmra.mxu3 %vm326_vm5, %v4660_v53 }
 0x208   : > { %1025 = vrot.lane.b32.xlu2 %v1010_v12, %s3925_s14  ;;  %v1355_v12 = vrot.slane %v4807_v27, 4 }
 0x20c   : > { %v857_v23 = vpop.xlane.xlu1 %856 }
 0x20d   : > { %v4955_v41 = vadd.f32 %v857_v23, %v4829_v33  ;;  %1379 = vrot.lane.b32.xlu1 %v1365_v22, %s3925_s14  ;;  %3803 = vmatmul.msk.bf16.vlgmr.msrb.gmra.mxu0 %vm326_vm5, %v4769_v44  ;;  %v1699_v44 = vsel %vm459_vm6, %v4965_v25, 0.0  ;;  %v1947_v7 = vpop.f32.mrf.mxu2  ;;  %v1882_v51 = vpop.f32.mrf.mxu0  ;;  %v1719_v22 = vperm.slane %v1711_v17, 0  ;;  %v1363_v23 = vperm.slane %v1355_v12, 0 }
 0x20e   : > { %v1709_v51 = vrot.slane %v4965_v25, 1  ;;  %v1714_v12 = vrot.slane %v4965_v25, 6 }
 0x212   : > { %1563 = vadd.xlane.f32.xlu0 %v1562_v52  ;;  %v852_v53 = vpop.xlane.xlu2 %851 }
 0x213   : > { %v853_v21 = vadd.f32 %v852_v53, %v4826_v0  ;;  %v1818_v0 = vpop.f32.mrf.mxu1 }
 0x214   : > { %v1819_v36 = vadd.f32 %v1818_v0, %v1802_v31 }
 0x215   : > { %v989_v33 = vadd.f32 %v988_v54, %v853_v21  ;;  %3805 = vmatmul.msk.bf16.vlgmr.msrb.gmra.mxu2 %vm326_vm5, %v4784_v20  ;;  %v1861_v20 = vpop.f32.mrf.mxu3  ;;  %v1949_v43 = vpop.f32.mrf.mxu2  ;;  %v1356_v21 = vrot.slane %v4807_v27, 5 }
 0x216   : > { %v1840_v15 = vadd.f32 %v1836_v40, %v1819_v36  ;;  %v1973_v24 = vpop.f32.mrf.mxu0  ;;  %v1712_v43 = vrot.slane %v4965_v25, 4 }
 0x217   : > { %3806 = vmatmul.msk.bf16.vlgmr.msrb.gmra.mxu3 %vm326_vm5, %v4682_v4  ;;  %v1364_v35 = vperm.slane %v1356_v21, 0 }
 0x218   : > { %v1865_v9 = vadd.f32 %v1861_v20, %v1840_v15 }
 0x21a   : > { %1700 = vadd.xlane.f32.xlu0 %v1699_v44  ;;  %v1012_v32 = vpop.permute.xlu2 %1011  ;;  %v1884_v29 = vadd.f32 %v1880_v11, %v1865_v9 }
 0x21b   : > { %3585 = vst.msk [vmem:[%s4506_s13 + $0x1] sm:$0x1] %vm679_vm8, %v1012_v32  ;;  %v1820_v4 = vpop.f32.mrf.mxu1 }
 0x21d   : > { %v1863_v61 = vpop.f32.mrf.mxu3  ;;  %v2033_v47 = vpop.f32.mrf.mxu2 }
 0x21e   : > { %v1975_v59 = vpop.f32.mrf.mxu0 }
 0x223   : > { %v1899_v60 = vpop.f32.mrf.mxu1 }
 0x224   : > { %v1014_v6 = vpop.permute.xlu1 %1013  ;;  %v4993_v42 = vadd.f32 %v1899_v60, %v1884_v29 }
 0x225   : > { %3586 = vst.msk [vmem:[%s4506_s13 + $0x11] sm:$0x1] %vm679_vm8, %v1014_v6  ;;  %v1960_v54 = vpop.f32.mrf.mxu3  ;;  %v2035_v52 = vpop.f32.mrf.mxu2 }
 0x226   : > { %3678 = vst.msk [vmem:[%s4506_s13 + $0x4] sm:$0x1] %vm485_vm7, %v4993_v42  ;;  %v1916_v32 = vrot.slane %v4993_v42, 2  ;;  %v1920_v31 = vrot.slane %v4993_v42, 6  ;;  %v1917_v6 = vrot.slane %v4993_v42, 3  ;;  %v1915_v0 = vrot.slane %v4993_v42, 1  ;;  %v2160_v8 = vpop.f32.mrf.mxu0 }
 0x227   : > { %v1961_v27 = vadd.f32 %v1960_v54, %v1947_v7  ;;  %v1919_v40 = vrot.slane %v4993_v42, 5 }
 0x228   : > { %3680 = vst.msk [vmem:[%s4506_s13 + $0x24] sm:$0x1] %vm485_vm7, %v1916_v32 }
 0x229   : > { %3684 = vst.msk [vmem:[%s4506_s13 + $0x64] sm:$0x1] %vm485_vm7, %v1920_v31 }
 0x22a   : > { %3681 = vst.msk [vmem:[%s4506_s13 + $0x34] sm:$0x1] %vm485_vm7, %v1917_v6 }
 0x22b   : > { %v1901_v49 = vpop.f32.mrf.mxu1  ;;  %3679 = vst.msk [vmem:[%s4506_s13 + $0x14] sm:$0x1] %vm485_vm7, %v1915_v0 }
 0x22c   : > { %v1020_v48 = vpop.permute.xlu1 %1019  ;;  %3683 = vst.msk [vmem:[%s4506_s13 + $0x54] sm:$0x1] %vm485_vm7, %v1919_v40  ;;  %v1717_v49 = vperm.slane %v1709_v51, 0 }
 0x22d   : > { %3589 = vst.msk [vmem:[%s4506_s13 + $0x41] sm:$0x1] %vm679_vm8, %v1020_v48  ;;  %v1962_v62 = vpop.f32.mrf.mxu3  ;;  %v1921_v48 = vrot.slane %v4993_v42, 7 }
 0x22e   : > { %1724 = vrot.lane.b32.xlu0 %v1716_v45, %s3925_s14  ;;  %v1977_v45 = vadd.f32 %v1973_v24, %v1961_v27 }
 0x22f   : > { %v1191_v38 = vpop.xlane.xlu0 %1190  ;;  %3685 = vst.msk [vmem:[%s4506_s13 + $0x74] sm:$0x1] %vm485_vm7, %v1921_v48 }
 0x230   : > { %v4983_v13 = vadd.f32 %v1191_v38, %v989_v33 }
 0x231   : > { %1195 = vadd.xlane.f32.xlu2 %v1194_v16 }
 0x233   : > { %v2014_v39 = vpop.f32.mrf.mxu1 }
 0x234   : > { %v1024_v50 = vpop.permute.xlu1 %1023  ;;  %v2018_v4 = vadd.f32 %v2014_v39, %v1977_v45 }
 0x235   : > { %3591 = vst.msk [vmem:[%s4506_s13 + $0x61] sm:$0x1] %vm679_vm8, %v1024_v50  ;;  %v2052_v34 = vpop.f32.mrf.mxu3  ;;  %v1566_v50 = vmul.f32 %v4878_v18, %v4878_v18 }
 0x236   : > { %1728 = vrot.lane.b32.xlu0 %v1718_v10, %s3925_s14  ;;  %v2037_v16 = vadd.f32 %v2033_v47, %v2018_v4  ;;  %v2162_v47 = vpop.f32.mrf.mxu0 }
 0x237   : > { %1705 = vadd.xlane.f32.xlu1 %v1704_v55  ;;  %v5000_v63 = vpop.xlane.xlu0 %1348  ;;  %v1567_v29 = vsel %vm459_vm6, %v1566_v50, 0.0 }
 0x238   : > { %v5047_v1 = vadd.f32 %v2052_v34, %v2037_v16 }
 0x23a   : > { %v2057_v26 = vsel %vm459_vm6, %v5047_v1, 0.0  ;;  %v2068_v61 = vrot.slane %v5047_v1, 2  ;;  %v2072_v55 = vrot.slane %v5047_v1, 6  ;;  %v2074_v18 = vperm.slane %v5047_v1, 0 }
 0x23b   : > { %v2016_v3 = vpop.f32.mrf.mxu1 }
 0x23c   : > { %v2076_v11 = vperm.slane %v2068_v61, 0  ;;  %v2080_v7 = vperm.slane %v2072_v55, 0 }
 0x23d   : > { %v2054_v44 = vpop.f32.mrf.mxu3 }
 0x23e   : > { %1734 = vrot.lane.b32.xlu0 %v1721_v56, %s3925_s14 }
 0x243   : > { %v2176_v2 = vpop.f32.mrf.mxu1 }
 0x244   : > { %v2177_v62 = vadd.f32 %v2176_v2, %v2160_v8 }
 0x245   : > { %v2235_v24 = vpop.f32.mrf.mxu3 }
 0x246   : > { %1738 = vrot.lane.b32.xlu0 %v1723_v57, %s3925_s14  ;;  %v2194_v57 = vpop.f32.mrf.mxu2 }
 0x249   : > { %1371 = vrot.lane.b32.xlu2 %v1361_v37, %s3925_s14  ;;  %v1720_v37 = vperm.slane %v1712_v43, 0 }
 0x24a   : > { %v1370_v19 = vpop.permute.xlu0 %1369 }
 0x24b   : > { %3623 = vst.msk [vmem:[%s4506_s13 + $0x12] sm:$0x1] %vm679_vm8, %v1370_v19  ;;  %v2198_v19 = vadd.f32 %v2194_v57, %v2177_v62  ;;  %v2178_v59 = vpop.f32.mrf.mxu1  ;;  %v2070_v62 = vrot.slane %v5047_v1, 4 }
 0x24d   : > { %v2239_v3 = vadd.f32 %v2235_v24, %v2198_v19 }
 0x250   : > { %1730 = vrot.lane.b32.xlu1 %v1719_v22, %s3925_s14  ;;  %v2196_v22 = vpop.f32.mrf.mxu2 }
 0x251   : > { %1375 = vrot.lane.b32.xlu2 %v1363_v23, %s3925_s14  ;;  %v2237_v23 = vpop.f32.mrf.mxu3 }
 0x252   : > { %v1374_v28 = vpop.permute.xlu0 %1373  ;;  %v2073_v23 = vrot.slane %v5047_v1, 7 }
 0x253   : > { %3625 = vst.msk [vmem:[%s4506_s13 + $0x32] sm:$0x1] %vm679_vm8, %v1374_v28  ;;  %v993_v53 = vpop.xlane.xlu2 %992  ;;  %v1722_v28 = vperm.slane %v1714_v12, 0  ;;  %v2273_v25 = vpop.f32.mrf.mxu1  ;;  %v2078_v12 = vperm.slane %v2070_v62, 0 }
 0x254   : > { %v5016_v33 = vadd.f32 %v993_v53, %v4955_v41  ;;  %v1918_v41 = vrot.slane %v4993_v42, 4  ;;  %v2254_v53 = vpop.f32.mrf.mxu0 }
 0x255   : > { %v2258_v21 = vadd.f32 %v2254_v53, %v2239_v3 }
 0x256   : > { %3682 = vst.msk [vmem:[%s4506_s13 + $0x44] sm:$0x1] %vm485_vm7, %v1918_v41 }
 0x257   : > { %v5085_v32 = vadd.f32 %v2273_v25, %v2258_v21  ;;  %v2081_v21 = vperm.slane %v2073_v23, 0  ;;  %v2067_v25 = vrot.slane %v5047_v1, 1 }
 0x259   : > { %1377 = vrot.lane.b32.xlu2 %v1364_v35, %s3925_s14  ;;  %v2334_v31 = vpop.f32.mrf.mxu3  ;;  %3719 = vst.msk [vmem:[%s4506_s13 + $0x5] sm:$0x1] %vm485_vm7, %v5085_v32  ;;  %v2282_v0 = vmul.f32 %v5085_v32, %v5085_v32  ;;  %v2292_v57 = vrot.slane %v5085_v32, 4  ;;  %v2295_v24 = vrot.slane %v5085_v32, 7  ;;  %v2289_v47 = vrot.slane %v5085_v32, 1 }
 0x25a   : > { %v1382_v36 = vpop.permute.xlu0 %1381  ;;  %v2294_v19 = vrot.slane %v5085_v32, 6 }
 0x25b   : > { %3629 = vst.msk [vmem:[%s4506_s13 + $0x72] sm:$0x1] %vm679_vm8, %v1382_v36  ;;  %v1018_v20 = vpop.permute.xlu2 %1017  ;;  %v2283_v27 = vsel %vm459_vm6, %v2282_v0, 0.0  ;;  %v2275_v36 = vpop.f32.mrf.mxu1 }
 0x25c   : > { %3588 = vst.msk [vmem:[%s4506_s13 + $0x31] sm:$0x1] %vm679_vm8, %v1018_v20  ;;  %v2256_v35 = vpop.f32.mrf.mxu0 }
 0x25d   : > { %3723 = vst.msk [vmem:[%s4506_s13 + $0x45] sm:$0x1] %vm485_vm7, %v2292_v57 }
 0x25e   : > { %3726 = vst.msk [vmem:[%s4506_s13 + $0x75] sm:$0x1] %vm485_vm7, %v2295_v24 }
 0x25f   : > { %v1344_v14 = vpop.xlane.xlu1 %1343  ;;  %3720 = vst.msk [vmem:[%s4506_s13 + $0x15] sm:$0x1] %vm485_vm7, %v2289_v47 }
 0x260   : > { %v1345_v15 = vadd.f32 %v1344_v14, %v4983_v13  ;;  %v1904_v13 = vsel %vm459_vm6, %v4993_v42, 0.0  ;;  %v2061_v14 = vmul.f32 %v5047_v1, %v5047_v1  ;;  %3725 = vst.msk [vmem:[%s4506_s13 + $0x65] sm:$0x1] %vm485_vm7, %v2294_v19  ;;  %v2278_v19 = vsel %vm459_vm6, %v5085_v32, 0.0 }
 0x261   : > { %v2336_v48 = vpop.f32.mrf.mxu3 }
 0x263   : > { %v1022_v38 = vpop.permute.xlu2 %1021 }
 0x264   : > { %3590 = vst.msk [vmem:[%s4506_s13 + $0x51] sm:$0x1] %vm679_vm8, %v1022_v38 }
 0x269   : > { %v2410_v61 = vpop.f32.mrf.mxu3 }
 0x26b   : > { %v1026_v9 = vpop.permute.xlu2 %1025 }
 0x26c   : > { %3592 = vst.msk [vmem:[%s4506_s13 + $0x71] sm:$0x1] %vm679_vm8, %v1026_v9  ;;  %v2062_v9 = vsel %vm459_vm6, %v2061_v14, 0.0 }
 0x270   : > { %2058 = vadd.xlane.f32.xlu0 %v2057_v26  ;;  %v2372_v26 = vpop.f32.mrf.mxu1 }
 0x277   : > { %v1368_v46 = vpop.permute.xlu1 %1367 }
 0x278   : > { %3622 = vst.msk [vmem:[%s4506_s13 + $0x2] sm:$0x1] %vm679_vm8, %v1368_v46  ;;  %v2374_v55 = vpop.f32.mrf.mxu1 }
 0x27a   : > { %1905 = vadd.xlane.f32.xlu1 %v1904_v13 }
 0x27f   : > { %v1380_v10 = vpop.permute.xlu1 %1379 }
 0x280   : > { %3628 = vst.msk [vmem:[%s4506_s13 + $0x62] sm:$0x1] %vm679_vm8, %v1380_v10  ;;  %v2534_v3 = vpop.f32.mrf.mxu1 }
 0x282   : > { %1568 = vadd.xlane.f32.xlu2 %v1567_v29 }
 0x284   : > { %2086 = vrot.lane.b32.xlu0 %v2076_v11, %s3925_s14 }
 0x285   : > { %v1564_v60 = vpop.xlane.xlu0 %1563 }
 0x286   : > { %v1565_v5 = vadd.f32 %v1564_v60, %v1345_v15  ;;  %v2347_v15 = vpop.f32.mrf.mxu0 }
 0x28c   : > { %2094 = vrot.lane.b32.xlu0 %v2080_v7, %s3925_s14  ;;  %v2412_v7 = vpop.f32.mrf.mxu3 }
 0x28d   : > { %v1701_v56 = vpop.xlane.xlu0 %1700 }
 0x28e   : > { %v5066_v54 = vadd.f32 %v1701_v56, %v1565_v5  ;;  %v2349_v10 = vpop.f32.mrf.mxu0  ;;  %v1908_v56 = vmul.f32 %v4993_v42, %v4993_v42  ;;  %v2291_v42 = vrot.slane %v5085_v32, 3 }
 0x290   : > { %3722 = vst.msk [vmem:[%s4506_s13 + $0x35] sm:$0x1] %vm485_vm7, %v2291_v42 }
 0x293   : > { %2082 = vrot.lane.b32.xlu1 %v2074_v18, %s3925_s14  ;;  %v2069_v18 = vrot.slane %v5047_v1, 3 }
 0x295   : > { %v2077_v43 = vperm.slane %v2069_v18, 0 }
 0x296   : > { %v2518_v59 = vpop.f32.mrf.mxu0 }
 0x29a   : > { %1726 = vrot.lane.b32.xlu2 %v1717_v49, %s3925_s14  ;;  %v1909_v49 = vsel %vm459_vm6, %v1908_v56, 0.0 }
 0x2a0   : > { %v1725_v39 = vpop.permute.xlu0 %1724 }
 0x2a1   : > { %3659 = vst.msk [vmem:[%s4506_s13 + $0x3] sm:$0x1] %vm679_vm8, %v1725_v39  ;;  %v2290_v39 = vrot.slane %v5085_v32, 2 }
 0x2a2   : > { %1732 = vrot.lane.b32.xlu2 %v1720_v37, %s3925_s14 }
 0x2a3   : > { %3721 = vst.msk [vmem:[%s4506_s13 + $0x25] sm:$0x1] %vm485_vm7, %v2290_v39 }
 0x2a4   : > { %v1196_v17 = vpop.xlane.xlu2 %1195 }
 0x2a5   : > { %v5078_v34 = vadd.f32 %v1196_v17, %v5016_v33  ;;  %v2321_v33 = vpop.f32.mrf.mxu2  ;;  %v2293_v17 = vrot.slane %v5085_v32, 5 }
 0x2a6   : > { %v2335_v20 = vadd.f32 %v2334_v31, %v2321_v33  ;;  %v2520_v33 = vpop.f32.mrf.mxu0  ;;  %v2536_v31 = vpop.f32.mrf.mxu1 }
 0x2a7   : > { %3724 = vst.msk [vmem:[%s4506_s13 + $0x55] sm:$0x1] %vm485_vm7, %v2293_v17 }
 0x2a8   : > { %v1729_v52 = vpop.permute.xlu0 %1728  ;;  %v2351_v38 = vadd.f32 %v2347_v15, %v2335_v20  ;;  %v2071_v20 = vrot.slane %v5047_v1, 5 }
 0x2a9   : > { %3661 = vst.msk [vmem:[%s4506_s13 + $0x23] sm:$0x1] %vm679_vm8, %v1729_v52 }
 0x2aa   : > { %1736 = vrot.lane.b32.xlu2 %v1722_v28, %s3925_s14  ;;  %v5101_v4 = vpop.xlane.xlu1 %1705  ;;  %v2376_v46 = vadd.f32 %v2372_v26, %v2351_v38  ;;  %v2577_v28 = vpop.f32.mrf.mxu3  ;;  %v2079_v26 = vperm.slane %v2071_v20, 0 }
 0x2ac   : > { %v1372_v44 = vpop.permute.xlu2 %1371 }
 0x2ad   : > { %3624 = vst.msk [vmem:[%s4506_s13 + $0x22] sm:$0x1] %vm679_vm8, %v1372_v44  ;;  %v2323_v40 = vpop.f32.mrf.mxu2  ;;  %v2535_v44 = vadd.f32 %v2534_v3, %v2518_v59 }
 0x2ae   : > { %v2596_v14 = vpop.f32.mrf.mxu0 }
 0x2b0   : > { %v1735_v6 = vpop.permute.xlu0 %1734 }
 0x2b1   : > { %3664 = vst.msk [vmem:[%s4506_s13 + $0x53] sm:$0x1] %vm679_vm8, %v1735_v6 }
 0x2b2   : > { %v2579_v35 = vpop.f32.mrf.mxu3 }
 0x2b4   : > { %v1376_v41 = vpop.permute.xlu2 %1375 }
 0x2b5   : > { %3626 = vst.msk [vmem:[%s4506_s13 + $0x42] sm:$0x1] %vm679_vm8, %v1376_v41  ;;  %v2391_v13 = vpop.f32.mrf.mxu2 }
 0x2b6   : > { %2284 = vadd.xlane.f32.xlu0 %v2283_v27  ;;  %v2395_v50 = vadd.f32 %v2391_v13, %v2376_v46  ;;  %v2075_v27 = vperm.slane %v2067_v25, 0 }
 0x2b8   : > { %v1739_v45 = vpop.permute.xlu0 %1738  ;;  %v5106_v29 = vadd.f32 %v2410_v61, %v2395_v50  ;;  %v2598_v50 = vpop.f32.mrf.mxu0 }
 0x2b9   : > { %3666 = vst.msk [vmem:[%s4506_s13 + $0x73] sm:$0x1] %vm679_vm8, %v1739_v45  ;;  %v3074_v45 = vsel %vm330_vm4, %v4437_v30, 0  ;;  %v1350_v30 = vadd.f32 %v5000_v63, %v5078_v34 }
 0x2ba   : > { %v2432_v60 = vperm.slane %v5106_v29, 0  ;;  %v2427_v51 = vrot.slane %v5106_v29, 3  ;;  %v2428_v2 = vrot.slane %v5106_v29, 4  ;;  %v2431_v22 = vrot.slane %v5106_v29, 7  ;;  %3083 = vmatpush.bf16.msrb.mxu1 %v3074_v45  ;;  %v2676_v46 = vpop.f32.mrf.mxu3 }
 0x2bb   : > { %v2415_v47 = vsel %vm459_vm6, %v5106_v29, 0.0  ;;  %v2419_v59 = vmul.f32 %v5106_v29, %v5106_v29  ;;  %v2426_v3 = vrot.slane %v5106_v29, 2 }
 0x2bc   : > { %v1378_v16 = vpop.permute.xlu2 %1377  ;;  %v2435_v8 = vperm.slane %v2427_v51, 0  ;;  %v2436_v37 = vperm.slane %v2428_v2, 0  ;;  %v2439_v53 = vperm.slane %v2431_v22, 0 }
 0x2bd   : > { %3627 = vst.msk [vmem:[%s4506_s13 + $0x52] sm:$0x1] %vm679_vm8, %v1378_v16  ;;  %2063 = vadd.xlane.f32.xlu1 %v2062_v9  ;;  %v2393_v5 = vpop.f32.mrf.mxu2  ;;  %v2615_v16 = vpop.f32.mrf.mxu1  ;;  %3804 = vmatmul.msk.bf16.vlgmr.msrb.gmra.mxu1 %vm326_vm5, %v4754_v58  ;;  %v2420_v22 = vsel %vm459_vm6, %v2419_v59, 0.0  ;;  %v2434_v32 = vperm.slane %v2426_v3, 0 }
 0x2c0   : > { %v2689_v34 = vpop.f32.mrf.mxu0 }
 0x2c2   : > { %v1731_v11 = vpop.permute.xlu1 %1730  ;;  %v2678_v58 = vpop.f32.mrf.mxu3 }
 0x2c3   : > { %3662 = vst.msk [vmem:[%s4506_s13 + $0x33] sm:$0x1] %vm679_vm8, %v1731_v11 }
 0x2c5   : > { %v2552_v52 = vpop.f32.mrf.mxu2  ;;  %v2617_v10 = vpop.f32.mrf.mxu1 }
 0x2c6   : > { %v2556_v6 = vadd.f32 %v2552_v52, %v2535_v44 }
 0x2c8   : > { %v2581_v36 = vadd.f32 %v2577_v28, %v2556_v6  ;;  %v2691_v42 = vpop.f32.mrf.mxu0  ;;  %v2430_v28 = vrot.slane %v5106_v29, 6 }
 0x2ca   : > { %2440 = vrot.lane.b32.xlu0 %v2432_v60, %s3925_s14  ;;  %v2600_v38 = vadd.f32 %v2596_v14, %v2581_v36  ;;  %v2425_v36 = vrot.slane %v5106_v29, 1 }
 0x2cc   : > { %v5156_v13 = vadd.f32 %v2615_v16, %v2600_v38  ;;  %v2429_v16 = vrot.slane %v5106_v29, 5 }
 0x2cd   : > { %v2554_v0 = vpop.f32.mrf.mxu2  ;;  %v2729_v56 = vpop.f32.mrf.mxu1 }
 0x2ce   : > { %3752 = vst.msk [vmem:[%s4506_s13 + $0x6] sm:$0x1] %vm485_vm7, %v5156_v13  ;;  %v2633_v44 = vrot.slane %v5156_v13, 3  ;;  %v2636_v25 = vrot.slane %v5156_v13, 6  ;;  %v2634_v33 = vrot.slane %v5156_v13, 4  ;;  %v2632_v6 = vrot.slane %v5156_v13, 2 }
 0x2cf   : > { %v2438_v0 = vperm.slane %v2430_v28, 0  ;;  %v2637_v35 = vrot.slane %v5156_v13, 7  ;;  %v2620_v3 = vsel %vm459_vm6, %v5156_v13, 0.0 }
 0x2d0   : > { %3755 = vst.msk [vmem:[%s4506_s13 + $0x36] sm:$0x1] %vm485_vm7, %v2633_v44  ;;  %v2875_v20 = vpop.f32.mrf.mxu0 }
 0x2d1   : > { %3758 = vst.msk [vmem:[%s4506_s13 + $0x66] sm:$0x1] %vm485_vm7, %v2636_v25 }
 0x2d2   : > { %2446 = vrot.lane.b32.xlu0 %v2435_v8, %s3925_s14  ;;  %v2767_v8 = vpop.f32.mrf.mxu3  ;;  %3756 = vst.msk [vmem:[%s4506_s13 + $0x46] sm:$0x1] %vm485_vm7, %v2634_v33 }
 0x2d3   : > { %1910 = vadd.xlane.f32.xlu2 %v1909_v49  ;;  %3754 = vst.msk [vmem:[%s4506_s13 + $0x26] sm:$0x1] %vm485_vm7, %v2632_v6 }
 0x2d4   : > { %3759 = vst.msk [vmem:[%s4506_s13 + $0x76] sm:$0x1] %vm485_vm7, %v2637_v35 }
 0x2d5   : > { %v2663_v9 = vpop.f32.mrf.mxu2  ;;  %v2731_v57 = vpop.f32.mrf.mxu1 }
 0x2d6   : > { %2088 = vrot.lane.b32.xlu1 %v2077_v43, %s3925_s14  ;;  %v2677_v60 = vadd.f32 %v2676_v46, %v2663_v9  ;;  %v2624_v57 = vmul.f32 %v5156_v13, %v5156_v13 }
 0x2d8   : > { %v2693_v7 = vadd.f32 %v2689_v34, %v2677_v60 }
 0x2da   : > { %2448 = vrot.lane.b32.xlu0 %v2436_v37, %s3925_s14  ;;  %v2733_v51 = vadd.f32 %v2729_v56, %v2693_v7  ;;  %v2769_v39 = vpop.f32.mrf.mxu3 }
 0x2dd   : > { %v2665_v11 = vpop.f32.mrf.mxu2 }
 0x2de   : > { %2090 = vrot.lane.b32.xlu1 %v2078_v12, %s3925_s14 }
 0x2e2   : > { %2454 = vrot.lane.b32.xlu0 %v2439_v53, %s3925_s14  ;;  %v2949_v38 = vpop.f32.mrf.mxu3 }
 0x2e3   : > { %v2059_v41 = vpop.xlane.xlu0 %2058 }
 0x2e5   : > { %v2748_v18 = vpop.f32.mrf.mxu2 }
 0x2e6   : > { %2096 = vrot.lane.b32.xlu1 %v2081_v21, %s3925_s14  ;;  %v2752_v49 = vadd.f32 %v2748_v18, %v2733_v51  ;;  %v2631_v21 = vrot.slane %v5156_v13, 1 }
 0x2e8   : > { %v5179_v2 = vadd.f32 %v2767_v8, %v2752_v49  ;;  %3753 = vst.msk [vmem:[%s4506_s13 + $0x16] sm:$0x1] %vm485_vm7, %v2631_v21 }
 0x2ea   : > { %v2772_v24 = vsel %vm459_vm6, %v5179_v2, 0.0  ;;  %v2782_v17 = vrot.slane %v5179_v2, 1  ;;  %v2784_v23 = vrot.slane %v5179_v2, 3  ;;  %v2787_v53 = vrot.slane %v5179_v2, 6 }
 0x2eb   : > { %2084 = vrot.lane.b32.xlu2 %v2075_v27, %s3925_s14  ;;  %v2635_v27 = vrot.slane %v5156_v13, 5  ;;  %v2776_v28 = vmul.f32 %v5179_v2, %v5179_v2  ;;  %v2789_v25 = vperm.slane %v5179_v2, 0 }
 0x2ec   : > { %v2790_v12 = vperm.slane %v2782_v17, 0  ;;  %v2792_v52 = vperm.slane %v2784_v23, 0  ;;  %v2795_v31 = vperm.slane %v2787_v53, 0 }
 0x2ed   : > { %v1906_v40 = vpop.xlane.xlu1 %1905  ;;  %v2750_v62 = vpop.f32.mrf.mxu2  ;;  %3757 = vst.msk [vmem:[%s4506_s13 + $0x56] sm:$0x1] %vm485_vm7, %v2635_v27  ;;  %v2785_v27 = vrot.slane %v5179_v2, 4 }
 0x2ee   : > { %v1907_v48 = vadd.f32 %v1906_v40, %v5066_v54  ;;  %v2433_v40 = vperm.slane %v2425_v36, 0 }
 0x2f0   : > { %v5154_v15 = vadd.f32 %v2059_v41, %v1907_v48  ;;  %v2891_v48 = vpop.f32.mrf.mxu1 }
 0x2f1   : > { %v2892_v46 = vadd.f32 %v2891_v48, %v2875_v20 }
 0x2f3   : > { %2092 = vrot.lane.b32.xlu2 %v2079_v26, %s3925_s14  ;;  %v2437_v26 = vperm.slane %v2429_v16, 0  ;;  %v2793_v16 = vperm.slane %v2785_v27, 0 }
 0x2f5   : > { %v1569_v1 = vpop.xlane.xlu2 %1568  ;;  %v2909_v14 = vpop.f32.mrf.mxu2 }
 0x2f6   : > { %v1570_v54 = vadd.f32 %v1569_v1, %v1350_v30  ;;  %v2087_v61 = vpop.permute.xlu0 %2086  ;;  %v2877_v30 = vpop.f32.mrf.mxu0  ;;  %v2913_v10 = vadd.f32 %v2909_v14, %v2892_v46 }
 0x2f7   : > { %3698 = vst.msk [vmem:[%s4506_s13 + $0x24] sm:$0x1] %vm679_vm8, %v2087_v61  ;;  %v2951_v61 = vpop.f32.mrf.mxu3 }
 0x2f8   : > { %v5169_v55 = vadd.f32 %v5101_v4, %v1570_v54  ;;  %v2893_v1 = vpop.f32.mrf.mxu1  ;;  %v2783_v61 = vrot.slane %v5179_v2, 2 }
 0x2fd   : > { %v1727_v5 = vpop.permute.xlu2 %1726  ;;  %v2911_v54 = vpop.f32.mrf.mxu2 }
 0x2fe   : > { %3660 = vst.msk [vmem:[%s4506_s13 + $0x13] sm:$0x1] %vm679_vm8, %v1727_v5  ;;  %v2095_v63 = vpop.permute.xlu0 %2094  ;;  %v2953_v5 = vadd.f32 %v2949_v38, %v2913_v10  ;;  %v2968_v34 = vpop.f32.mrf.mxu0 }
 0x2ff   : > { %3702 = vst.msk [vmem:[%s4506_s13 + $0x64] sm:$0x1] %vm679_vm8, %v2095_v63 }
 0x300   : > { %v2987_v7 = vpop.f32.mrf.mxu1  ;;  %v2972_v18 = vadd.f32 %v2968_v34, %v2953_v5 }
 0x302   : > { %v5238_v49 = vadd.f32 %v2987_v7, %v2972_v18 }
 0x304   : > { %3793 = vst.msk [vmem:[%s4506_s13 + $0x7] sm:$0x1] %vm485_vm7, %v5238_v49  ;;  %v2996_v8 = vmul.f32 %v5238_v49, %v5238_v49  ;;  %v3005_v6 = vrot.slane %v5238_v49, 3  ;;  %v3003_v35 = vrot.slane %v5238_v49, 1  ;;  %v3006_v36 = vrot.slane %v5238_v49, 4 }
 0x305   : > { %v2083_v4 = vpop.permute.xlu1 %2082  ;;  %v1733_v43 = vpop.permute.xlu2 %1732  ;;  %v3004_v20 = vrot.slane %v5238_v49, 2  ;;  %v3009_v14 = vrot.slane %v5238_v49, 7  ;;  %v3007_v38 = vrot.slane %v5238_v49, 5 }
 0x306   : > { %3696 = vst.msk [vmem:[%s4506_s13 + $0x4] sm:$0x1] %vm679_vm8, %v2083_v4  ;;  %v2970_v4 = vpop.f32.mrf.mxu0  ;;  %v2997_v39 = vsel %vm459_vm6, %v2996_v8, 0.0 }
 0x307   : > { %3663 = vst.msk [vmem:[%s4506_s13 + $0x43] sm:$0x1] %vm679_vm8, %v1733_v43 }
 0x308   : > { %v2989_v43 = vpop.f32.mrf.mxu1  ;;  %3796 = vst.msk [vmem:[%s4506_s13 + $0x37] sm:$0x1] %vm485_vm7, %v3005_v6 }
 0x309   : > { %3794 = vst.msk [vmem:[%s4506_s13 + $0x17] sm:$0x1] %vm485_vm7, %v3003_v35  ;;  %v2992_v43 = vsel %vm459_vm6, %v5238_v49, 0.0 }
 0x30a   : > { %3797 = vst.msk [vmem:[%s4506_s13 + $0x47] sm:$0x1] %vm485_vm7, %v3006_v36 }
 0x30b   : > { %3795 = vst.msk [vmem:[%s4506_s13 + $0x27] sm:$0x1] %vm485_vm7, %v3004_v20  ;;  %v3185_v20 = vld [vmem:[#allocation2] sm:$0xff] }
 0x30c   : > { %2773 = vadd.xlane.f32.xlu0 %v2772_v24  ;;  %3800 = vst.msk [vmem:[%s4506_s13 + $0x77] sm:$0x1] %vm485_vm7, %v3009_v14 }
 0x30d   : > { %v1737_v37 = vpop.permute.xlu2 %1736  ;;  %3798 = vst.msk [vmem:[%s4506_s13 + $0x57] sm:$0x1] %vm485_vm7, %v3007_v38  ;;  %v3189_v38 = vld [vmem:[#allocation3] sm:$0xff] }
 0x30e   : > { %3665 = vst.msk [vmem:[%s4506_s13 + $0x63] sm:$0x1] %vm679_vm8, %v1737_v37  ;;  %v2625_v37 = vsel %vm459_vm6, %v2624_v57, 0.0  ;;  %v3061_v59 = vpop.f32.mrf.mxu0 }
 0x310   : > { %2416 = vadd.xlane.f32.xlu1 %v2415_v47  ;;  %v3035_v47 = vpop.f32.mrf.mxu2 }
 0x318   : > { %v3037_v17 = vpop.f32.mrf.mxu2 }
 0x31c   : > { %2279 = vadd.xlane.f32.xlu2 %v2278_v19  ;;  %v3048_v19 = vpop.f32.mrf.mxu3 }
 0x320   : > { %2799 = vrot.lane.b32.xlu0 %v2790_v12, %s3925_s14  ;;  %v3104_v21 = vpop.f32.mrf.mxu2 }
 0x324   : > { %2421 = vadd.xlane.f32.xlu2 %v2420_v22  ;;  %v3050_v12 = vpop.f32.mrf.mxu3  ;;  %v3049_v22 = vadd.f32 %v3048_v19, %v3035_v47 }
 0x326   : > { %v3065_v23 = vadd.f32 %v3061_v59, %v3049_v22 }
 0x328   : > { %2803 = vrot.lane.b32.xlu0 %v2792_v52, %s3925_s14  ;;  %v3063_v52 = vpop.f32.mrf.mxu0  ;;  %v3106_v48 = vpop.f32.mrf.mxu2 }
 0x329   : > { %2444 = vrot.lane.b32.xlu1 %v2434_v32, %s3925_s14  ;;  %v2285_v41 = vpop.xlane.xlu0 %2284 }
 0x32c   : > { %v3123_v44 = vpop.f32.mrf.mxu3 }
 0x330   : > { %2809 = vrot.lane.b32.xlu0 %v2795_v31, %s3925_s14  ;;  %v2064_v9 = vpop.xlane.xlu1 %2063  ;;  %v2777_v31 = vsel %vm459_vm6, %v2776_v28, 0.0 }
 0x331   : > { %2452 = vrot.lane.b32.xlu1 %v2438_v0, %s3925_s14  ;;  %v3008_v0 = vrot.slane %v5238_v49, 6 }
 0x333   : > { %3799 = vst.msk [vmem:[%s4506_s13 + $0x67] sm:$0x1] %vm485_vm7, %v3008_v0 }
 0x33a   : > { %v3085_v32 = vpop.f32.mrf.mxu1 }
 0x33b   : > { %v3089_v53 = vadd.f32 %v3085_v32, %v3065_v23 }
 0x33c   : > { %2442 = vrot.lane.b32.xlu2 %v2433_v40, %s3925_s14  ;;  %v2441_v45 = vpop.permute.xlu0 %2440 }
 0x33d   : > { %3733 = vst.msk [vmem:[%s4506_s13 + $0x5] sm:$0x1] %vm679_vm8, %v2441_v45  ;;  %v3108_v33 = vadd.f32 %v3104_v21, %v3089_v53  ;;  %v3125_v45 = vpop.f32.mrf.mxu3 }
 0x33f   : > { %v5266_v13 = vadd.f32 %v3123_v44, %v3108_v33 }
 0x341   : > { %v3143_v1 = vrot.slane %v5266_v13, 6  ;;  %v3138_v57 = vrot.slane %v5266_v13, 1  ;;  %v3144_v49 = vrot.slane %v5266_v13, 7  ;;  %v3139_v12 = vrot.slane %v5266_v13, 2 }
 0x342   : > { %v3087_v40 = vpop.f32.mrf.mxu1 }
 0x343   : > { %v3151_v54 = vperm.slane %v3143_v1, 0  ;;  %v3152_v17 = vperm.slane %v3144_v49, 0  ;;  %v3147_v59 = vperm.slane %v3139_v12, 0 }
 0x344   : > { %2450 = vrot.lane.b32.xlu2 %v2437_v26, %s3925_s14  ;;  %v2447_v11 = vpop.permute.xlu0 %2446  ;;  %v2788_v26 = vrot.slane %v5179_v2, 7 }
 0x345   : > { %3736 = vst.msk [vmem:[%s4506_s13 + $0x35] sm:$0x1] %vm679_vm8, %v2447_v11  ;;  %v2786_v11 = vrot.slane %v5179_v2, 5 }
 0x346   : > { %v1911_v50 = vpop.xlane.xlu2 %1910  ;;  %v2796_v30 = vperm.slane %v2788_v26, 0 }
 0x347   : > { %v1912_v58 = vadd.f32 %v1911_v50, %v5169_v55  ;;  %v2791_v50 = vperm.slane %v2783_v61, 0  ;;  %v2794_v5 = vperm.slane %v2786_v11, 0 }
 0x348   : > { %v2089_v29 = vpop.permute.xlu1 %2088 }
 0x349   : > { %3699 = vst.msk [vmem:[%s4506_s13 + $0x34] sm:$0x1] %vm679_vm8, %v2089_v29  ;;  %v2065_v60 = vadd.f32 %v2064_v9, %v1912_v58  ;;  %v3140_v9 = vrot.slane %v5266_v13, 3 }
 0x34b   : > { %v5234_v63 = vadd.f32 %v2285_v41, %v2065_v60  ;;  %v3145_v41 = vperm.slane %v5266_v13, 0  ;;  %v3148_v46 = vperm.slane %v3140_v9, 0 }
 0x34c   : > { %v2449_v51 = vpop.permute.xlu0 %2448 }
 0x34d   : > { %3737 = vst.msk [vmem:[%s4506_s13 + $0x45] sm:$0x1] %vm679_vm8, %v2449_v51 }
 0x34e   : > { %v2085_v56 = vpop.permute.xlu2 %2084 }
 0x34f   : > { %3697 = vst.msk [vmem:[%s4506_s13 + $0x14] sm:$0x1] %vm679_vm8, %v2085_v56 }
 0x350   : > { %v2091_v55 = vpop.permute.xlu1 %2090 }
 0x351   : > { %3700 = vst.msk [vmem:[%s4506_s13 + $0x44] sm:$0x1] %vm679_vm8, %v2091_v55 }
 0x354   : > { %v2455_v62 = vpop.permute.xlu0 %2454 }
 0x355   : > { %3740 = vst.msk [vmem:[%s4506_s13 + $0x75] sm:$0x1] %vm679_vm8, %v2455_v62 }
 0x356   : > { %v2093_v42 = vpop.permute.xlu2 %2092 }
 0x357   : > { %3701 = vst.msk [vmem:[%s4506_s13 + $0x54] sm:$0x1] %vm679_vm8, %v2093_v42  ;;  %v3132_v42 = vmul.f32 %v5266_v13, %v5266_v13 }
 0x358   : > { %v2097_v24 = vpop.permute.xlu1 %2096 }
 0x359   : > { %3703 = vst.msk [vmem:[%s4506_s13 + $0x74] sm:$0x1] %vm679_vm8, %v2097_v24  ;;  %v3133_v62 = vsel %vm459_vm6, %v3132_v42, 0.0  ;;  %v3146_v24 = vperm.slane %v3138_v57, 0 }
 0x35a   : > { %2998 = vadd.xlane.f32.xlu0 %v2997_v39  ;;  %v3141_v39 = vrot.slane %v5266_v13, 4 }
 0x35b   : > { %2626 = vadd.xlane.f32.xlu1 %v2625_v37 }
 0x35c   : > { %v3149_v37 = vperm.slane %v3141_v39, 0 }
 0x36d   : > { %2621 = vadd.xlane.f32.xlu2 %v2620_v3  ;;  %v3142_v3 = vrot.slane %v5266_v13, 5 }
 0x36e   : > { %3153 = vrot.lane.b32.xlu0 %v3145_v41, %s3925_s14 }
 0x36f   : > { %v3150_v32 = vperm.slane %v3142_v3, 0 }
 0x374   : > { %2797 = vrot.lane.b32.xlu1 %v2789_v25, %s3925_s14 }
 0x375   : > { %2778 = vadd.xlane.f32.xlu2 %v2777_v31 }
 0x376   : > { %3159 = vrot.lane.b32.xlu0 %v3148_v46, %s3925_s14 }
 0x37c   : > { %2805 = vrot.lane.b32.xlu1 %v2793_v16, %s3925_s14 }
 0x37e   : > { %3165 = vrot.lane.b32.xlu0 %v3151_v54, %s3925_s14 }
 0x37f   : > { %v5303_v34 = vpop.xlane.xlu0 %2773 }
 0x383   : > { %v2417_v29 = vpop.xlane.xlu1 %2416 }
 0x384   : > { %2811 = vrot.lane.b32.xlu1 %v2796_v30, %s3925_s14 }
 0x38d   : > { %2801 = vrot.lane.b32.xlu2 %v2791_v50, %s3925_s14 }
 0x38f   : > { %v2280_v10 = vpop.xlane.xlu2 %2279 }
 0x390   : > { %v2281_v58 = vadd.f32 %v2280_v10, %v5154_v15 }
 0x392   : > { %v2418_v60 = vadd.f32 %v2417_v29, %v2281_v58  ;;  %v2800_v2 = vpop.permute.xlu0 %2799 }
 0x393   : > { %3771 = vst.msk [vmem:[%s4506_s13 + $0x16] sm:$0x1] %vm679_vm8, %v2800_v2 }
 0x395   : > { %2807 = vrot.lane.b32.xlu2 %v2794_v5, %s3925_s14 }
 0x397   : > { %v2422_v7 = vpop.xlane.xlu2 %2421 }
 0x398   : > { %v2423_v56 = vadd.f32 %v2422_v7, %v5234_v63  ;;  %v3128_v63 = vsel %vm459_vm6, %v5266_v13, 0.0 }
 0x39a   : > { %v2804_v8 = vpop.permute.xlu0 %2803 }
 0x39b   : > { %v2445_v18 = vpop.permute.xlu1 %2444  ;;  %3773 = vst.msk [vmem:[%s4506_s13 + $0x36] sm:$0x1] %vm679_vm8, %v2804_v8 }
 0x39c   : > { %3735 = vst.msk [vmem:[%s4506_s13 + $0x25] sm:$0x1] %vm679_vm8, %v2445_v18 }
 0x39f   : > { %v2443_v51 = vpop.permute.xlu2 %2442 }
 0x3a0   : > { %3734 = vst.msk [vmem:[%s4506_s13 + $0x15] sm:$0x1] %vm679_vm8, %v2443_v51 }
 0x3a2   : > { %v2810_v4 = vpop.permute.xlu0 %2809 }
 0x3a3   : > { %v2453_v15 = vpop.permute.xlu1 %2452  ;;  %3776 = vst.msk [vmem:[%s4506_s13 + $0x66] sm:$0x1] %vm679_vm8, %v2810_v4 }
 0x3a4   : > { %3739 = vst.msk [vmem:[%s4506_s13 + $0x65] sm:$0x1] %vm679_vm8, %v2453_v15 }
 0x3a7   : > { %v2451_v55 = vpop.permute.xlu2 %2450 }
 0x3a8   : > { %3738 = vst.msk [vmem:[%s4506_s13 + $0x55] sm:$0x1] %vm679_vm8, %v2451_v55 }
 0x3ae   : > { %3129 = vadd.xlane.f32.xlu1 %v3128_v63 }
 0x3be   : > { %2993 = vadd.xlane.f32.xlu2 %v2992_v43 }
 0x3c6   : > { %3134 = vadd.xlane.f32.xlu2 %v3133_v62 }
 0x3c7   : > { %3155 = vrot.lane.b32.xlu1 %v3146_v24, %s3925_s14 }
 0x3cd   : > { %v2999_v52 = vpop.xlane.xlu0 %2998 }
 0x3ce   : > { %v2627_v47 = vpop.xlane.xlu1 %2626 }
 0x3cf   : > { %v2628_v19 = vadd.f32 %v2627_v47, %v2423_v56  ;;  %3161 = vrot.lane.b32.xlu1 %v3149_v37, %s3925_s14 }
 0x3d7   : > { %3167 = vrot.lane.b32.xlu1 %v3152_v17, %s3925_s14 }
 0x3de   : > { %3157 = vrot.lane.b32.xlu2 %v3147_v59, %s3925_s14 }
 0x3e0   : > { %v2622_v22 = vpop.xlane.xlu2 %2621  ;;  %v3154_v44 = vpop.permute.xlu0 %3153 }
 0x3e1   : > { %v2623_v23 = vadd.f32 %v2622_v22, %v2418_v60  ;;  %3807 = vst.msk [vmem:[%s4506_s13 + $0x7] sm:$0x1] %vm679_vm8, %v3154_v44 }
 0x3e3   : > { %v2775_v27 = vadd.f32 %v5303_v34, %v2623_v23 }
 0x3e6   : > { %v2798_v28 = vpop.permute.xlu1 %2797  ;;  %3163 = vrot.lane.b32.xlu2 %v3150_v32, %s3925_s14 }
 0x3e7   : > { %3770 = vst.msk [vmem:[%s4506_s13 + $0x6] sm:$0x1] %vm679_vm8, %v2798_v28 }
 0x3e8   : > { %v2779_v53 = vpop.xlane.xlu2 %2778  ;;  %v3160_v13 = vpop.permute.xlu0 %3159 }
 0x3e9   : > { %v2780_v21 = vadd.f32 %v2779_v53, %v2628_v19  ;;  %3810 = vst.msk [vmem:[%s4506_s13 + $0x37] sm:$0x1] %vm679_vm8, %v3160_v13 }
 0x3eb   : > { %v3000_v25 = vadd.f32 %v2999_v52, %v2780_v21 }
 0x3ee   : > { %v2806_v33 = vpop.permute.xlu1 %2805 }
 0x3ef   : > { %3774 = vst.msk [vmem:[%s4506_s13 + $0x46] sm:$0x1] %vm679_vm8, %v2806_v33 }
 0x3f0   : > { %v2802_v31 = vpop.permute.xlu2 %2801  ;;  %v3166_v35 = vpop.permute.xlu0 %3165 }
 0x3f1   : > { %3772 = vst.msk [vmem:[%s4506_s13 + $0x26] sm:$0x1] %vm679_vm8, %v2802_v31 }
 0x3f2   : > { %3813 = vst.msk [vmem:[%s4506_s13 + $0x67] sm:$0x1] %vm679_vm8, %v3166_v35 }
 0x3f6   : > { %v2812_v6 = vpop.permute.xlu1 %2811 }
 0x3f7   : > { %3777 = vst.msk [vmem:[%s4506_s13 + $0x76] sm:$0x1] %vm679_vm8, %v2812_v6 }
 0x3f8   : > { %v2808_v0 = vpop.permute.xlu2 %2807 }
 0x3f9   : > { %3775 = vst.msk [vmem:[%s4506_s13 + $0x56] sm:$0x1] %vm679_vm8, %v2808_v0 }
 0x421   : > { %v3130_v41 = vpop.xlane.xlu1 %3129 }
 0x431   : > { %v2994_v36 = vpop.xlane.xlu2 %2993 }
 0x432   : > { %v2995_v40 = vadd.f32 %v2994_v36, %v2775_v27 }
 0x434   : > { %v3131_v48 = vadd.f32 %v3130_v41, %v2995_v40 }
 0x436   : > { %v3186_v45 = vadd.f32 %v3185_v20, %v3131_v48 }
 0x438   : > { %3188 = vst.msk [vmem:[#allocation2] sm:$0xff] %vm3187_vm9, %v3186_v45 }
 0x439   : > { %v3156_v14 = vpop.permute.xlu1 %3155  ;;  %v3135_v16 = vpop.xlane.xlu2 %3134 }
 0x43a   : > { %3808 = vst.msk [vmem:[%s4506_s13 + $0x17] sm:$0x1] %vm679_vm8, %v3156_v14  ;;  %v3136_v9 = vadd.f32 %v3135_v16, %v3000_v25 }
 0x43c   : > { %v3190_v26 = vadd.f32 %v3189_v38, %v3136_v9 }
 0x43e   : > { %3191 = vst.msk [vmem:[#allocation3] sm:$0xff] %vm3187_vm9, %v3190_v26 }
 0x441   : > { %v3162_v46 = vpop.permute.xlu1 %3161  ;;  %v3158_v30 = vpop.permute.xlu2 %3157 }
 0x442   : > { %3811 = vst.msk [vmem:[%s4506_s13 + $0x47] sm:$0x1] %vm679_vm8, %v3162_v46 }
 0x443   : > { %3809 = vst.msk [vmem:[%s4506_s13 + $0x27] sm:$0x1] %vm679_vm8, %v3158_v30 }
 0x447   : > { %3195 = sbr.rel (%p3815_p8) target bundleno = 1292 (0x50c), region = 44 }
 0x449   : > { %v3168_v1 = vpop.permute.xlu1 %3167  ;;  %v3164_v54 = vpop.permute.xlu2 %3163 }
 0x44a   : > { %3814 = vst.msk [vmem:[%s4506_s13 + $0x77] sm:$0x1] %vm679_vm8, %v3168_v1 }
 0x44b   : > { %3812 = vst.msk [vmem:[%s4506_s13 + $0x57] sm:$0x1] %vm679_vm8, %v3164_v54 }
 0x44c   : > { %v3196_v61 = vld [vmem:[#allocation2] sm:$0xff]  ;;  %v3198_v50 = vld [vmem:[#allocation3] sm:$0xff]  ;;  %v3926_v10 = vmov 0   ;;  %vm3379_vm13 = vcmask 523264  }
 0x44d   : > { %3877 = vset.pattern.permute.xlu0 %v3926_v10  ;;  %v3197_v11 = vmul.f32 0.0009765625, %v3196_v61  ;;  %v3199_v58 = vmul.f32 0.0009765625, %v3198_v50  ;;  %3879 = vset.pattern.permute.xlu2 %v3926_v10  ;;  %v3213_v15 = vld [vmem:[%s3988_s29] sm:$0xff] }
 0x44e   : > { %3878 = vset.pattern.permute.xlu1 %v3926_v10  ;;  %v3214_v12 = vld [vmem:[%s3998_s9] sm:$0xff] }
 0x44f   : > { %v3200_v29 = vmul.f32 %v3197_v11, %v3197_v11  ;;  %v3224_v24 = vmul.f32 %v3213_v15, %v3197_v11 }
 0x451   : > { %v3201_v60 = vsub.f32 %v3199_v58, %v3200_v29 }
 0x452   : > { %v3235_v45 = vld [vmem:[%s4003_s12] sm:$0xff]  ;;  %v3236_v14 = vld [vmem:[%s4003_s12 + $0x8] sm:$0xff]  ;;  %v3241_v10 = vld [vmem:[%s4003_s12 + $0x30] sm:$0xff] }
 0x453   : > { %v3202_v5 = vadd.f32 1e-05, %v3201_v60  ;;  %v3242_v11 = vld [vmem:[%s4003_s12 + $0x38] sm:$0xff] }
 0x455   : > { %3880 = vrsqrt.f32 %v3202_v5  ;;  %vm3209_vm10 = vweird.f32 %v3202_v5 }
 0x45b   : > { %v3881_v34 = vpop.eup %3880 }
 0x45c   : > { %v3204_v7 = vmul.f32 %v3881_v34, %v3202_v5  ;;  %vm3210_vm11 = vweird.f32 %v3881_v34 }
 0x45d   : > { %vm3211_vm12 = vmor %vm3209_vm10, %vm3210_vm11 }
 0x45e   : > { %v3205_v56 = vmul.f32 %v3881_v34, %v3204_v7  ;;  %v3247_v7 = vld [vmem:[%s4003_s12 + $0x60] sm:$0xff] }
 0x460   : > { %v3206_v18 = vmul.f32 0.5, %v3205_v56  ;;  %v3248_v56 = vld [vmem:[%s4003_s12 + $0x68] sm:$0xff] }
 0x462   : > { %v3207_v2 = vsub.f32 1.5, %v3206_v18 }
 0x464   : > { %v3208_v51 = vmul.f32 %v3881_v34, %v3207_v2 }
 0x466   : > { %v3212_v55 = vsel %vm3211_vm12, %v3881_v34, %v3208_v51 }
 0x467   : > { %v3215_v8 = vmul.f32 %v3213_v15, %v3212_v55  ;;  %v3225_v19 = vmul.f32 %v3224_v24, %v3212_v55 }
 0x469   : > { %v3251_v63 = vperm.slane %v3215_v8, 0  ;;  %v3220_v4 = vrot.slane %v3215_v8, 4  ;;  %v3218_v43 = vrot.slane %v3215_v8, 2  ;;  %v3217_v62 = vrot.slane %v3215_v8, 1 }
 0x46a   : > { %v3221_v39 = vrot.slane %v3215_v8, 5  ;;  %v3219_v37 = vrot.slane %v3215_v8, 3  ;;  %v3222_v59 = vrot.slane %v3215_v8, 6  ;;  %v3226_v22 = vsub.f32 %v3214_v12, %v3225_v19 }
 0x46b   : > { %3260 = vperm.xlu0 %3877, %v3251_v63   ;;  %v3255_v42 = vperm.slane %v3220_v4, 0  ;;  %v3253_v57 = vperm.slane %v3218_v43, 0  ;;  %v3252_v47 = vperm.slane %v3217_v62, 0  ;;  %v3223_v3 = vrot.slane %v3215_v8, 7 }
 0x46c   : > { %v3256_v49 = vperm.slane %v3221_v39, 0  ;;  %v3254_v17 = vperm.slane %v3219_v37, 0  ;;  %v3257_v23 = vperm.slane %v3222_v59, 0  ;;  %v3307_v52 = vperm.slane %v3226_v22, 0  ;;  %v3239_v39 = vld [vmem:[%s4003_s12 + $0x20] sm:$0xff]  ;;  %v3240_v37 = vld [vmem:[%s4003_s12 + $0x28] sm:$0xff] }
 0x46d   : > { %3276 = vperm.xlu2 %3879, %v3255_v42   ;;  %3268 = vperm.xlu1 %3878, %v3253_v57   ;;  %v3258_v32 = vperm.slane %v3223_v3, 0  ;;  %v3228_v28 = vrot.slane %v3226_v22, 1  ;;  %v3230_v53 = vrot.slane %v3226_v22, 3  ;;  %v3229_v21 = vrot.slane %v3226_v22, 2  ;;  %v3237_v42 = vld [vmem:[%s4003_s12 + $0x10] sm:$0xff]  ;;  %v3238_v57 = vld [vmem:[%s4003_s12 + $0x18] sm:$0xff] }
 0x46e   : > { %v3231_v31 = vrot.slane %v3226_v22, 4  ;;  %v3233_v13 = vrot.slane %v3226_v22, 6  ;;  %v3232_v6 = vrot.slane %v3226_v22, 5  ;;  %v3234_v41 = vrot.slane %v3226_v22, 7 }
 0x46f   : > { %v3308_v44 = vperm.slane %v3228_v28, 0  ;;  %v3310_v25 = vperm.slane %v3230_v53, 0  ;;  %v3309_v33 = vperm.slane %v3229_v21, 0  ;;  %v3243_v53 = vld [vmem:[%s4003_s12 + $0x40] sm:$0xff]  ;;  %v3244_v21 = vld [vmem:[%s4003_s12 + $0x48] sm:$0xff] }
 0x470   : > { %v3311_v0 = vperm.slane %v3231_v31, 0  ;;  %v3313_v35 = vperm.slane %v3233_v13, 0  ;;  %v3312_v27 = vperm.slane %v3232_v6, 0  ;;  %v3314_v36 = vperm.slane %v3234_v41, 0  ;;  %v3246_v31 = vld [vmem:[%s4003_s12 + $0x58] sm:$0xff] }
 0x473   : > { %3264 = vperm.xlu0 %3877, %v3252_v47  }
 0x475   : > { %3280 = vperm.xlu2 %3879, %v3256_v49   ;;  %3272 = vperm.xlu1 %3878, %v3254_v17  }
 0x47b   : > { %3284 = vperm.xlu0 %3877, %v3257_v23  }
 0x47d   : > { %3316 = vperm.xlu2 %3879, %v3307_v52   ;;  %3288 = vperm.xlu1 %3878, %v3258_v32  }
 0x483   : > { %3320 = vperm.xlu0 %3877, %v3308_v44  }
 0x485   : > { %3328 = vperm.xlu2 %3879, %v3310_v25   ;;  %3324 = vperm.xlu1 %3878, %v3309_v33   ;;  %v3245_v33 = vld [vmem:[%s4003_s12 + $0x50] sm:$0xff] }
 0x48b   : > { %3332 = vperm.xlu0 %3877, %v3311_v0  }
 0x48d   : > { %3340 = vperm.xlu2 %3879, %v3313_v35   ;;  %3336 = vperm.xlu1 %3878, %v3312_v27  }
 0x493   : > { %3344 = vperm.xlu0 %3877, %v3314_v36  }
 0x4c7   : > { %v5368_v40 = vpop.permute.xlu2 %3276 }
 0x4c8   : > { %v3299_v13 = vmul.f32 %v5368_v40, %v3243_v53  ;;  %v3300_v6 = vmul.f32 %v5368_v40, %v3244_v21  ;;  %v3249_v40 = vld [vmem:[%s4003_s12 + $0x70] sm:$0xff] }
 0x4cf   : > { %v5370_v20 = vpop.permute.xlu2 %3280 }
 0x4d0   : > { %v3301_v35 = vmul.f32 %v5370_v20, %v3245_v33  ;;  %v3302_v27 = vmul.f32 %v5370_v20, %v3246_v31 }
 0x4d7   : > { %v3317_v48 = vpop.permute.xlu2 %3316 }
 0x4dd   : > { %v3261_v38 = vpop.permute.xlu0 %3260 }
 0x4de   : > { %v3291_v16 = vmul.f32 %v3261_v38, %v3235_v45  ;;  %v3292_v9 = vmul.f32 %v3261_v38, %v3236_v14 }
 0x4df   : > { %v3269_v26 = vpop.permute.xlu1 %3268  ;;  %v3329_v61 = vpop.permute.xlu2 %3328 }
 0x4e0   : > { %v3347_v46 = vadd.f32 %v3317_v48, %v3291_v16  ;;  %v3348_v30 = vadd.f32 %v3317_v48, %v3292_v9  ;;  %v3295_v17 = vmul.f32 %v3269_v26, %v3239_v39  ;;  %v3296_v12 = vmul.f32 %v3269_v26, %v3240_v37  ;;  %v3250_v9 = vld [vmem:[%s4003_s12 + $0x78] sm:$0xff] }
 0x4e2   : > { %v3363_v1 = vmax.f32 %v3347_v46, 0.0  ;;  %v3364_v54 = vmax.f32 %v3348_v30, 0.0 }
 0x4e4   : > { %3380 = vst.msk [vmem:[%s4003_s12] sm:$0xff] %vm3379_vm13, %v3363_v1 }
 0x4e5   : > { %3381 = vst.msk [vmem:[%s4003_s12 + $0x8] sm:$0xff] %vm3379_vm13, %v3364_v54  ;;  %v3265_v50 = vpop.permute.xlu0 %3264 }
 0x4e6   : > { %v3293_v47 = vmul.f32 %v3265_v50, %v3237_v42  ;;  %v3294_v19 = vmul.f32 %v3265_v50, %v3238_v57 }
 0x4e7   : > { %v3273_v58 = vpop.permute.xlu1 %3272  ;;  %v3341_v8 = vpop.permute.xlu2 %3340 }
 0x4e8   : > { %v3297_v29 = vmul.f32 %v3273_v58, %v3241_v10  ;;  %v3298_v60 = vmul.f32 %v3273_v58, %v3242_v11 }
 0x4ea   : > { %v3353_v5 = vadd.f32 %v3329_v61, %v3297_v29  ;;  %v3354_v34 = vadd.f32 %v3329_v61, %v3298_v60 }
 0x4ec   : > { %v3369_v18 = vmax.f32 %v3353_v5, 0.0  ;;  %v3370_v2 = vmax.f32 %v3354_v34, 0.0 }
 0x4ed   : > { %v3285_v51 = vpop.permute.xlu0 %3284 }
 0x4ee   : > { %3386 = vst.msk [vmem:[%s4003_s12 + $0x30] sm:$0xff] %vm3379_vm13, %v3369_v18  ;;  %v3303_v15 = vmul.f32 %v3285_v51, %v3247_v7  ;;  %v3304_v55 = vmul.f32 %v3285_v51, %v3248_v56 }
 0x4ef   : > { %3387 = vst.msk [vmem:[%s4003_s12 + $0x38] sm:$0xff] %vm3379_vm13, %v3370_v2  ;;  %v3289_v63 = vpop.permute.xlu1 %3288 }
 0x4f0   : > { %v3359_v4 = vadd.f32 %v3341_v8, %v3303_v15  ;;  %v3360_v43 = vadd.f32 %v3341_v8, %v3304_v55  ;;  %v3305_v20 = vmul.f32 %v3289_v63, %v3249_v40  ;;  %v3306_v30 = vmul.f32 %v3289_v63, %v3250_v9 }
 0x4f2   : > { %v3375_v62 = vmax.f32 %v3359_v4, 0.0  ;;  %v3376_v24 = vmax.f32 %v3360_v43, 0.0 }
 0x4f4   : > { %3392 = vst.msk [vmem:[%s4003_s12 + $0x60] sm:$0xff] %vm3379_vm13, %v3375_v62 }
 0x4f5   : > { %3393 = vst.msk [vmem:[%s4003_s12 + $0x68] sm:$0xff] %vm3379_vm13, %v3376_v24  ;;  %v3321_v49 = vpop.permute.xlu0 %3320 }
 0x4f6   : > { %v3349_v59 = vadd.f32 %v3321_v49, %v3293_v47  ;;  %v3350_v22 = vadd.f32 %v3321_v49, %v3294_v19 }
 0x4f7   : > { %v3325_v3 = vpop.permute.xlu1 %3324 }
 0x4f8   : > { %v3365_v23 = vmax.f32 %v3349_v59, 0.0  ;;  %v3366_v52 = vmax.f32 %v3350_v22, 0.0  ;;  %v3351_v32 = vadd.f32 %v3325_v3, %v3295_v17  ;;  %v3352_v28 = vadd.f32 %v3325_v3, %v3296_v12 }
 0x4fa   : > { %3382 = vst.msk [vmem:[%s4003_s12 + $0x10] sm:$0xff] %vm3379_vm13, %v3365_v23  ;;  %v3367_v44 = vmax.f32 %v3351_v32, 0.0  ;;  %v3368_v25 = vmax.f32 %v3352_v28, 0.0 }
 0x4fb   : > { %3383 = vst.msk [vmem:[%s4003_s12 + $0x18] sm:$0xff] %vm3379_vm13, %v3366_v52 }
 0x4fc   : > { %3384 = vst.msk [vmem:[%s4003_s12 + $0x20] sm:$0xff] %vm3379_vm13, %v3367_v44 }
 0x4fd   : > { %3385 = vst.msk [vmem:[%s4003_s12 + $0x28] sm:$0xff] %vm3379_vm13, %v3368_v25  ;;  %v3333_v0 = vpop.permute.xlu0 %3332 }
 0x4fe   : > { %v3355_v41 = vadd.f32 %v3333_v0, %v3299_v13  ;;  %v3356_v36 = vadd.f32 %v3333_v0, %v3300_v6 }
 0x4ff   : > { %v3337_v48 = vpop.permute.xlu1 %3336 }
 0x500   : > { %v3371_v45 = vmax.f32 %v3355_v41, 0.0  ;;  %v3372_v14 = vmax.f32 %v3356_v36, 0.0  ;;  %v3357_v38 = vadd.f32 %v3337_v48, %v3301_v35  ;;  %v3358_v16 = vadd.f32 %v3337_v48, %v3302_v27 }
 0x502   : > { %3388 = vst.msk [vmem:[%s4003_s12 + $0x40] sm:$0xff] %vm3379_vm13, %v3371_v45  ;;  %v3373_v26 = vmax.f32 %v3357_v38, 0.0  ;;  %v3374_v46 = vmax.f32 %v3358_v16, 0.0 }
 0x503   : > { %3389 = vst.msk [vmem:[%s4003_s12 + $0x48] sm:$0xff] %vm3379_vm13, %v3372_v14 }
 0x504   : > { %3390 = vst.msk [vmem:[%s4003_s12 + $0x50] sm:$0xff] %vm3379_vm13, %v3373_v26 }
 0x505   : > { %3391 = vst.msk [vmem:[%s4003_s12 + $0x58] sm:$0xff] %vm3379_vm13, %v3374_v46  ;;  %v3345_v1 = vpop.permute.xlu0 %3344 }
 0x506   : > { %v3361_v54 = vadd.f32 %v3345_v1, %v3305_v20  ;;  %v3362_v61 = vadd.f32 %v3345_v1, %v3306_v30 }
 0x508   : > { %v3377_v50 = vmax.f32 %v3361_v54, 0.0  ;;  %v3378_v10 = vmax.f32 %v3362_v61, 0.0 }
 0x50a   : > { %3394 = vst.msk [vmem:[%s4003_s12 + $0x70] sm:$0xff] %vm3379_vm13, %v3377_v50 }
 0x50b   : > { %3395 = vst.msk [vmem:[%s4003_s12 + $0x78] sm:$0xff] %vm3379_vm13, %v3378_v10 }
 0x50c PF: > { %s14_s19 = sadd.s32 1, %s3920_s19   ;;  %s5444_s15 = smov %s3912_s17 }
 0x50d   : > { %p11_p9 = scmp.ge.s32.totalorder %s14_s19, 6   ;;  %s5445_s16 = smov %s3916_s18 }
 0x50e   : > { %s5446_s17 = smov %s5449_s20  ;;  %s5447_s18 = smov %s5453_s21 }
 0x50f   :  { %13 = sbr.rel (!%p11_p9) target bundleno = 3 (0x3), region = 99 }

</bundles_post_ra>
